<compile_context>
chip_gen: v7x
topology: tpu7x:2x2x1
jax: 0.10.0
libtpu: 0.0.40
codegen_flags: <defaults>
</compile_context>

<pallas_src>
import functools

import jax
import jax.numpy as jnp
from jax import lax
from jax.experimental import pallas as pl
from jax.experimental.pallas import tpu as pltpu

EPS = 1e-5
LANE = 128
MXU_DTYPE = jnp.bfloat16          # matmul operand dtype (f32 accumulation)
ACT_DTYPE = jnp.bfloat16          # inter-pass activation storage in HBM


def _vmem_limit_bytes():
    """~75% of per-core VMEM: 48 MiB on v7x (64 MiB/TC), 96 MiB on v5e/v6e."""
    cap = 128 * 1024 * 1024
    try:
        info = pltpu.get_tpu_info()
        cap = int(getattr(info, "vmem_capacity_bytes", cap)) or cap
    except Exception:
        pass
    return int(min(100 * 1024 * 1024, max(32 * 1024 * 1024, (cap * 3) // 4)))


_CPARAMS = pltpu.CompilerParams(
    dimension_semantics=("parallel",),        # shard the batch grid across TCs
    vmem_limit_bytes=_vmem_limit_bytes(),
)


def _round_up(c, m=LANE):
    return ((c + m - 1) // m) * m


def _pad2(a, rows, cols):
    return jnp.pad(a, ((0, rows - a.shape[0]), (0, cols - a.shape[1])))


def _padvec(v, cols):
    return jnp.pad(v, (0, cols - v.shape[0])).reshape(1, cols)


def _group_spec(block):
    zeros = (0,) * (len(block) - 1)
    return pl.BlockSpec(block, lambda i: (i,) + zeros)


def _full_spec(block):
    zeros = (0,) * len(block)
    return pl.BlockSpec(block, lambda i: zeros)


def _stats(y):
    """Per-channel (sum, sum-of-squares) of an (M, C) f32 matrix -> (1, 2, C).
    Kept as a VALU/XLU reduce: the passes are HBM-bound, so it overlaps DMA."""
    return jnp.concatenate(
        [jnp.sum(y, axis=0, keepdims=True),
         jnp.sum(y * y, axis=0, keepdims=True)], axis=0)[None]


def _fold_bn(psums, gamma, beta, count):
    """Fold full-batch stats + (gamma, beta) into per-channel scale / bias."""
    tot = jnp.sum(psums, axis=0)                              # (2, C)
    mean = tot[0] / count
    var = jnp.maximum(tot[1] / count - mean * mean, 0.0)      # biased variance
    scale = gamma.reshape(-1) * lax.rsqrt(var + EPS)
    bias = beta.reshape(-1) - mean * scale
    return scale.reshape(1, -1), bias.reshape(1, -1)


def _images_per_step(N, H, W, Ho, Wo, cmax):
    """Images per grid step: batch small spatial stages so the MXU M-dim sees
    >= 512 rows, subject to a per-block VMEM budget and keeping >= min(4, N)
    grid steps for pipelining / megacore sharding."""
    bt = 1
    for d in range(1, N + 1):
        if N % d:
            continue
        if d > 1 and ((N // d) < min(4, N)
                      or d * H * W * cmax * 4 > 4 * 1024 * 1024):
            break
        bt = d
        if d * Ho * Wo >= 512:
            break
    return bt


def _rows_per_chunk(Ho, Wo, bt, Pp):
    """Output rows of the 3x3 conv per inner chunk: >= ~512 MXU rows while the
    bf16 im2col patch stays under ~4 MiB (bounded independent of H, W)."""
    target = -(-512 // (bt * Wo))                                    # ceil
    cap = max(1, (4 * 1024 * 1024) // (bt * Wo * 9 * Pp * 2))
    return max(1, min(Ho, target, cap))


@functools.partial(jax.jit, static_argnames=("stride",))
def bottleneck_forward(x_nchw, params, stride=1):
    N, Cin, H, W = x_nchw.shape
    P = params["w1"].shape[0]
    C4 = 4 * P
    Ho = (H - 1) // stride + 1
    Wo = (W - 1) // stride + 1
    has_sc_conv = (stride != 1) or (Cin != C4)

    # channel padding up to the 128-lane width => lane-dense matmuls / stores
    # (no-op for production channel counts, which are already multiples of 128)
    Ci, Pp, Co = _round_up(Cin), _round_up(P), _round_up(C4)
    f32 = jnp.float32

    x = jnp.transpose(x_nchw, (0, 2, 3, 1)).astype(f32)           # NCHW -> NHWC
    if Ci != Cin:
        x = jnp.pad(x, ((0, 0), (0, 0), (0, 0), (0, Ci - Cin)))

    bt = _images_per_step(N, H, W, Ho, Wo, max(Ci, Pp, Co))
    G = N // bt

    # torch conv weights are (O, I, kh, kw); convert to bf16 matmul layouts.
    w1 = _pad2(params["w1"][:, :, 0, 0].T, Ci, Pp).astype(MXU_DTYPE)     # (Ci,Pp)
    w2 = jnp.transpose(params["w2"], (2, 3, 1, 0))                       # (3,3,I,O)
    w2 = jnp.pad(w2, ((0, 0), (0, 0), (0, Pp - P), (0, Pp - P)))
    w2 = w2.reshape(9 * Pp, Pp).astype(MXU_DTYPE)                        # fused taps
    w3 = _pad2(params["w3"][:, :, 0, 0].T, Pp, Co).astype(MXU_DTYPE)     # (Pp,Co)

    g1, b1 = _padvec(params["g1"], Pp), _padvec(params["b1"], Pp)
    g2, b2 = _padvec(params["g2"], Pp), _padvec(params["b2"], Pp)
    g3, b3 = _padvec(params["g3"], Co), _padvec(params["b3"], Co)

    # ------------------ pass 1: conv1 (1x1) + batch stats --------------------
    # Also emits the (strided) bf16 subsample of x consumed by the shortcut
    # conv in pass 3, so the full-resolution f32 x is never re-read.
    def k1(x_ref, w1_ref, y1_ref, s1_ref, *maybe_xsc):
        xv = x_ref[...].reshape(bt * H * W, Ci)
        y = jnp.dot(xv.astype(MXU_DTYPE), w1_ref[...],
                    preferred_element_type=jnp.float32)
        s1_ref[...] = _stats(y)                                   # f32 stats
        y1_ref[...] = y.astype(ACT_DTYPE).reshape(bt, H, W, Pp)   # bf16 store
        if has_sc_conv:
            xs = x_ref[...]
            if stride > 1:
                xs = xs[:, ::stride, ::stride, :]
            maybe_xsc[0][...] = xs.astype(ACT_DTYPE)

    p1_out_shape = [jax.ShapeDtypeStruct((N, H, W, Pp), ACT_DTYPE),
                    jax.ShapeDtypeStruct((G, 2, Pp), f32)]
    p1_out_specs = [_group_spec((bt, H, W, Pp)), _group_spec((1, 2, Pp))]
    if has_sc_conv:
        p1_out_shape.append(jax.ShapeDtypeStruct((N, Ho, Wo, Ci), ACT_DTYPE))
        p1_out_specs.append(_group_spec((bt, Ho, Wo, Ci)))

    res1 = pl.pallas_call(
        k1,
        grid=(G,),
        out_shape=tuple(p1_out_shape),
        in_specs=[_group_spec((bt, H, W, Ci)), _full_spec((Ci, Pp))],
        out_specs=tuple(p1_out_specs),
        compiler_params=_CPARAMS,
    )(x, w1)
    if has_sc_conv:
        y1, s1, xsc = res1
    else:
        y1, s1 = res1
    scale1, bias1 = _fold_bn(s1, g1, b1, N * H * W)

    # --------- pass 2: bn1 + relu + conv2 (3x3/stride, fused K=9*Pp) ---------
    rt = _rows_per_chunk(Ho, Wo, bt, Pp)
    n_chunks = -(-Ho // rt)

    def k2(y1_ref, w2_ref, sc_ref, bi_ref, y2_ref, s2_ref, pad_ref):
        a = (y1_ref[...].astype(f32).reshape(bt * H * W, Pp)
             * sc_ref[...] + bi_ref[...])
        a = jnp.maximum(a, 0.0).astype(ACT_DTYPE).reshape(bt, H, W, Pp)
        # zero only the 1-pixel halo; the interior is fully overwritten below.
        # The full padded image stays resident, so the halo remains valid for
        # every row chunk (no stale-scratch hazard from the row tiling).
        zr = jnp.zeros((bt, 1, W + 2, Pp), ACT_DTYPE)
        zc = jnp.zeros((bt, H + 2, 1, Pp), ACT_DTYPE)
        pad_ref[:, 0:1, :, :] = zr
        pad_ref[:, H + 1:H + 2, :, :] = zr
        pad_ref[:, :, 0:1, :] = zc
        pad_ref[:, :, W + 1:W + 2, :] = zc
        pad_ref[:, 1:H + 1, 1:W + 1, :] = a

        w2v = w2_ref[...]
        stats = jnp.zeros((1, 2, Pp), f32)
        for c in range(n_chunks):                 # static row-chunk loop
            r0 = c * rt
            r = min(rt, Ho - r0)
            rows_in = (r - 1) * stride + 3
            xp = pad_ref[:, r0 * stride:r0 * stride + rows_in, :, :]
            taps = [xp[:, kh:kh + (r - 1) * stride + 1:stride,
                        kw:kw + (Wo - 1) * stride + 1:stride, :]
                    for kh in range(3) for kw in range(3)]
            patch = jnp.concatenate(taps, axis=-1).reshape(bt * r * Wo, 9 * Pp)
            y = jnp.dot(patch, w2v, preferred_element_type=jnp.float32)
            stats = stats + _stats(y)
            y2_ref[:, r0:r0 + r, :, :] = (
                y.astype(ACT_DTYPE).reshape(bt, r, Wo, Pp))
        s2_ref[...] = stats

    y2, s2 = pl.pallas_call(
        k2,
        grid=(G,),
        out_shape=(jax.ShapeDtypeStruct((N, Ho, Wo, Pp), ACT_DTYPE),
                   jax.ShapeDtypeStruct((G, 2, Pp), f32)),
        in_specs=[_group_spec((bt, H, W, Pp)), _full_spec((9 * Pp, Pp)),
                  _full_spec((1, Pp)), _full_spec((1, Pp))],
        out_specs=(_group_spec((bt, Ho, Wo, Pp)), _group_spec((1, 2, Pp))),
        scratch_shapes=[pltpu.VMEM((bt, H + 2, W + 2, Pp), ACT_DTYPE)],
        compiler_params=_CPARAMS,
    )(y1, w2, scale1, bias1)
    scale2, bias2 = _fold_bn(s2, g2, b2, N * Ho * Wo)

    # -------- pass 3: bn2 + relu + conv3 (1x1) [+ shortcut 1x1 conv] ---------
    if has_sc_conv:
        wsc = _pad2(params["wsc"][:, :, 0, 0].T, Ci, Co).astype(MXU_DTYPE)
        gsc, bsc = _padvec(params["gsc"], Co), _padvec(params["bsc"], Co)

        def k3(y2_ref, w3_ref, sc_ref, bi_ref, xsc_ref, wsc_ref,
               y3_ref, s3_ref, ysc_ref, ssc_ref):
            a = (y2_ref[...].astype(f32).reshape(bt * Ho * Wo, Pp)
                 * sc_ref[...] + bi_ref[...])
            a = jnp.maximum(a, 0.0).astype(MXU_DTYPE)
            y = jnp.dot(a, w3_ref[...], preferred_element_type=jnp.float32)
            s3_ref[...] = _stats(y)
            y3_ref[...] = y.astype(ACT_DTYPE).reshape(bt, Ho, Wo, Co)
            xv = xsc_ref[...].reshape(bt * Ho * Wo, Ci)
            s = jnp.dot(xv, wsc_ref[...], preferred_element_type=jnp.float32)
            ssc_ref[...] = _stats(s)
            ysc_ref[...] = s.astype(ACT_DTYPE).reshape(bt, Ho, Wo, Co)

        y3, s3, ysc, ssc = pl.pallas_call(
            k3,
            grid=(G,),
            out_shape=(jax.ShapeDtypeStruct((N, Ho, Wo, Co), ACT_DTYPE),
                       jax.ShapeDtypeStruct((G, 2, Co), f32),
                       jax.ShapeDtypeStruct((N, Ho, Wo, Co), ACT_DTYPE),
                       jax.ShapeDtypeStruct((G, 2, Co), f32)),
            in_specs=[_group_spec((bt, Ho, Wo, Pp)), _full_spec((Pp, Co)),
                      _full_spec((1, Pp)), _full_spec((1, Pp)),
                      _group_spec((bt, Ho, Wo, Ci)), _full_spec((Ci, Co))],
            out_specs=(_group_spec((bt, Ho, Wo, Co)), _group_spec((1, 2, Co)),
                       _group_spec((bt, Ho, Wo, Co)), _group_spec((1, 2, Co))),
            compiler_params=_CPARAMS,
        )(y2, w3, scale2, bias2, xsc, wsc)
        scale3, bias3 = _fold_bn(s3, g3, b3, N * Ho * Wo)
        scalesc, biassc = _fold_bn(ssc, gsc, bsc, N * Ho * Wo)

        # ------------ pass 4: bn3 + bn_sc + residual add + relu --------------
        def k4(y3_ref, ysc_ref, sc3_ref, b3_ref, scs_ref, bcs_ref, o_ref):
            y = (y3_ref[...].astype(f32).reshape(bt * Ho * Wo, Co)
                 * sc3_ref[...] + b3_ref[...])
            s = (ysc_ref[...].astype(f32).reshape(bt * Ho * Wo, Co)
                 * scs_ref[...] + bcs_ref[...])
            o_ref[...] = jnp.maximum(y + s, 0.0).reshape(bt, Ho, Wo, Co)

        out = pl.pallas_call(
            k4,
            grid=(G,),
            out_shape=jax.ShapeDtypeStruct((N, Ho, Wo, Co), f32),
            in_specs=[_group_spec((bt, Ho, Wo, Co)),
                      _group_spec((bt, Ho, Wo, Co)),
                      _full_spec((1, Co)), _full_spec((1, Co)),
                      _full_spec((1, Co)), _full_spec((1, Co))],
            out_specs=_group_spec((bt, Ho, Wo, Co)),
            compiler_params=_CPARAMS,
        )(y3, ysc, scale3, bias3, scalesc, biassc)
    else:
        # identity shortcut: stride == 1 and Cin == 4*P  =>  Ci == Co, Ho == H
        def k3(y2_ref, w3_ref, sc_ref, bi_ref, y3_ref, s3_ref):
            a = (y2_ref[...].astype(f32).reshape(bt * Ho * Wo, Pp)
                 * sc_ref[...] + bi_ref[...])
            a = jnp.maximum(a, 0.0).astype(MXU_DTYPE)
            y = jnp.dot(a, w3_ref[...], preferred_element_type=jnp.float32)
            s3_ref[...] = _stats(y)
            y3_ref[...] = y.astype(ACT_DTYPE).reshape(bt, Ho, Wo, Co)

        y3, s3 = pl.pallas_call(
            k3,
            grid=(G,),
            out_shape=(jax.ShapeDtypeStruct((N, Ho, Wo, Co), ACT_DTYPE),
                       jax.ShapeDtypeStruct((G, 2, Co), f32)),
            in_specs=[_group_spec((bt, Ho, Wo, Pp)), _full_spec((Pp, Co)),
                      _full_spec((1, Pp)), _full_spec((1, Pp))],
            out_specs=(_group_spec((bt, Ho, Wo, Co)), _group_spec((1, 2, Co))),
            compiler_params=_CPARAMS,
        )(y2, w3, scale2, bias2)
        scale3, bias3 = _fold_bn(s3, g3, b3, N * Ho * Wo)

        def k4(y3_ref, x_ref, sc3_ref, b3_ref, o_ref):
            y = (y3_ref[...].astype(f32).reshape(bt * Ho * Wo, Co)
                 * sc3_ref[...] + b3_ref[...])
            s = x_ref[...].reshape(bt * Ho * Wo, Co)      # exact f32 residual
            o_ref[...] = jnp.maximum(y + s, 0.0).reshape(bt, Ho, Wo, Co)

        out = pl.pallas_call(
            k4,
            grid=(G,),
            out_shape=jax.ShapeDtypeStruct((N, Ho, Wo, Co), f32),
            in_specs=[_group_spec((bt, Ho, Wo, Co)),
                      _group_spec((bt, H, W, Ci)),
                      _full_spec((1, Co)), _full_spec((1, Co))],
            out_specs=_group_spec((bt, Ho, Wo, Co)),
            compiler_params=_CPARAMS,
        )(y3, x, scale3, bias3)

    if Co != C4:
        out = out[..., :C4]                        # drop lane padding (if any)
    return jnp.transpose(out, (0, 3, 1, 2))        # back to NCHW


# ----------------------- pure-JAX reference (for checking) ------------------
def bottleneck_ref(x_nchw, params, stride=1):
    """Mirrors the PyTorch forward; conv operands are rounded to bf16 with f32
    accumulation to match the kernel's MXU precision (intermediates stay f32)."""
    x = jnp.transpose(x_nchw, (0, 2, 3, 1)).astype(jnp.float32)

    def conv(inp, w, s=1, pad=0):
        w_hwio = jnp.transpose(w, (2, 3, 1, 0)).astype(MXU_DTYPE)
        return lax.conv_general_dilated(
            inp.astype(MXU_DTYPE), w_hwio, (s, s), [(pad, pad), (pad, pad)],
            dimension_numbers=("NHWC", "HWIO", "NHWC"),
            preferred_element_type=jnp.float32)

    def bn(y, g, b):
        mean = jnp.mean(y, axis=(0, 1, 2), keepdims=True)
        var = jnp.mean((y - mean) ** 2, axis=(0, 1, 2), keepdims=True)
        return (y - mean) * lax.rsqrt(var + EPS) * g + b

    out = jax.nn.relu(bn(conv(x, params["w1"]), params["g1"], params["b1"]))
    out = jax.nn.relu(bn(conv(out, params["w2"], stride, 1),
                         params["g2"], params["b2"]))
    out = bn(conv(out, params["w3"]), params["g3"], params["b3"])
    Cin, C4 = x.shape[-1], 4 * params["w1"].shape[0]
    if stride != 1 or Cin != C4:
        sc = bn(conv(x, params["wsc"], stride), params["gsc"], params["bsc"])
    else:
        sc = x
    out = jax.nn.relu(out + sc)
    return jnp.transpose(out, (0, 3, 1, 2))


if __name__ == "__main__":
    def make_params(key, Cin, P):
        Cout = 4 * P
        ks = jax.random.split(key, 12)
        return {
            "w1":  0.1 * jax.random.normal(ks[0], (P, Cin, 1, 1), jnp.float32),
            "w2":  0.1 * jax.random.normal(ks[1], (P, P, 3, 3), jnp.float32),
            "w3":  0.1 * jax.random.normal(ks[2], (Cout, P, 1, 1), jnp.float32),
            "wsc": 0.1 * jax.random.normal(ks[3], (Cout, Cin, 1, 1), jnp.float32),
            "g1":  1.0 + 0.1 * jax.random.normal(ks[4], (P,), jnp.float32),
            "b1":  0.1 * jax.random.normal(ks[5], (P,), jnp.float32),
            "g2":  1.0 + 0.1 * jax.random.normal(ks[6], (P,), jnp.float32),
            "b2":  0.1 * jax.random.normal(ks[7], (P,), jnp.float32),
            "g3":  1.0 + 0.1 * jax.random.normal(ks[8], (Cout,), jnp.float32),
            "b3":  0.1 * jax.random.normal(ks[9], (Cout,), jnp.float32),
            "gsc": 1.0 + 0.1 * jax.random.normal(ks[10], (Cout,), jnp.float32),
            "bsc": 0.1 * jax.random.normal(ks[11], (Cout,), jnp.float32),
        }

    # (N, Cin, planes, H, W, stride) — small shapes exercising every code path:
    #   cfg 0: projection shortcut, 2 images batched per grid step
    #   cfg 1: stride-2 downsample + projection shortcut (strided subsample)
    #   cfg 2: identity shortcut, multi-chunk row-tiled 3x3 conv
    configs = [
        (8, 8, 4, 8, 8, 1),
        (8, 8, 4, 8, 8, 2),
        (4, 16, 4, 32, 32, 1),
    ]

    key = jax.random.PRNGKey(0)
    for idx, (N, Cin, P, H, W, stride) in enumerate(configs):
        kp, kx, key = jax.random.split(key, 3)
        params = make_params(kp, Cin, P)
        x = jax.random.normal(kx, (N, Cin, H, W), jnp.float32)

        out = jax.block_until_ready(bottleneck_forward(x, params, stride=stride))
        ref = bottleneck_ref(x, params, stride=stride)

        Ho = (H - 1) // stride + 1
        Wo = (W - 1) // stride + 1
        assert out.shape == (N, 4 * P, Ho, Wo), (idx, out.shape)

        diff = jnp.abs(out - ref)
        max_err = float(jnp.max(diff))
        mean_err = float(jnp.mean(diff))
        # bf16 MXU operands + bf16 inter-pass activation storage, amplified by
        # BN normalization, account for a few 1e-2 worst-case; real bugs
        # (wrong conv/BN/residual) would be O(1).
        assert max_err < 1e-1, f"cfg{idx}: max mismatch vs reference: {max_err}"
        assert mean_err < 1e-2, f"cfg{idx}: mean mismatch vs reference: {mean_err}"

    print("KERNEL_OK")
</pallas_src>

<mosaic_0001>
module attributes {stable_mosaic.version = 11 : i64} {
  func.func @k1(%arg0: i32, %arg1: memref<2x8x8x128xf32, #tpu.memory_space<vmem>>, %arg2: memref<128x128xbf16, #tpu.memory_space<vmem>>, %arg3: memref<2x8x8x128xbf16, #tpu.memory_space<vmem>>, %arg4: memref<1x2x128xf32, #tpu.memory_space<vmem>>, %arg5: memref<2x8x8x128xbf16, #tpu.memory_space<vmem>>) attributes {dimension_semantics = [#tpu.dimension_semantics<parallel>], iteration_bounds = array<i64: 4>, scalar_prefetch = 0 : i64, scratch_operands = 0 : i64, tpu.core_type = #tpu.core_type<tc>, window_params = [{transform_indices = @transform_0, window_bounds = array<i64: 2, 8, 8, 128>}, {pipeline_mode = #tpu.pipeline_mode<synchronous>, transform_indices = @transform_1, window_bounds = array<i64: 128, 128>}, {transform_indices = @transform_2, window_bounds = array<i64: 2, 8, 8, 128>}, {transform_indices = @transform_3, window_bounds = array<i64: 1, 2, 128>}, {transform_indices = @transform_4, window_bounds = array<i64: 2, 8, 8, 128>}]} {
    %c0 = arith.constant 0 : index
    %c0_0 = arith.constant 0 : index
    %c0_1 = arith.constant 0 : index
    %c0_2 = arith.constant 0 : index
    %0 = vector.load %arg1[%c0, %c0_0, %c0_1, %c0_2] : memref<2x8x8x128xf32, #tpu.memory_space<vmem>>, vector<2x8x8x128xf32>
    %1 = vector.shape_cast %0 : vector<2x8x8x128xf32> to vector<128x128xf32>
    %2 = arith.truncf %1 : vector<128x128xf32> to vector<128x128xbf16>
    %c0_3 = arith.constant 0 : index
    %c0_4 = arith.constant 0 : index
    %3 = vector.load %arg2[%c0_3, %c0_4] : memref<128x128xbf16, #tpu.memory_space<vmem>>, vector<128x128xbf16>
    %cst = arith.constant dense<0.000000e+00> : vector<128x128xf32>
    %4 = tpu.matmul %2, %3, %cst {dimension_numbers = #tpu.dot_dimension_numbers<[1], [0], [0], [1], [0, 0, 1, 1], [], []>} : vector<128x128xbf16>, vector<128x128xbf16>, vector<128x128xf32> -> vector<128x128xf32>
    %cst_5 = arith.constant dense<0.000000e+00> : vector<128xf32>
    %5 = vector.multi_reduction <add>, %4, %cst_5 [0] : vector<128x128xf32> to vector<128xf32>
    %6 = vector.shape_cast %5 : vector<128xf32> to vector<1x128xf32>
    %7 = arith.mulf %4, %4 : vector<128x128xf32>
    %cst_6 = arith.constant dense<0.000000e+00> : vector<128xf32>
    %8 = vector.multi_reduction <add>, %7, %cst_6 [0] : vector<128x128xf32> to vector<128xf32>
    %9 = vector.shape_cast %8 : vector<128xf32> to vector<1x128xf32>
    %10 = tpu.concatenate %6, %9 in 0 : vector<1x128xf32>, vector<1x128xf32> -> vector<2x128xf32>
    %11 = vector.shape_cast %10 : vector<2x128xf32> to vector<1x2x128xf32>
    %c0_7 = arith.constant 0 : index
    %c0_8 = arith.constant 0 : index
    %c0_9 = arith.constant 0 : index
    %12 = vector.load %arg4[%c0_7, %c0_8, %c0_9] : memref<1x2x128xf32, #tpu.memory_space<vmem>>, vector<1x2x128xf32>
    tpu.vector_store %arg4[%c0_7, %c0_8, %c0_9], %11 {strides = array<i32>} : memref<1x2x128xf32, #tpu.memory_space<vmem>>, vector<1x2x128xf32>,
    %13 = arith.truncf %4 : vector<128x128xf32> to vector<128x128xbf16>
    %14 = vector.shape_cast %13 : vector<128x128xbf16> to vector<2x8x8x128xbf16>
    %c0_10 = arith.constant 0 : index
    %c0_11 = arith.constant 0 : index
    %c0_12 = arith.constant 0 : index
    %c0_13 = arith.constant 0 : index
    %15 = vector.load %arg3[%c0_10, %c0_11, %c0_12, %c0_13] : memref<2x8x8x128xbf16, #tpu.memory_space<vmem>>, vector<2x8x8x128xbf16>
    tpu.vector_store %arg3[%c0_10, %c0_11, %c0_12, %c0_13], %14 {strides = array<i32>} : memref<2x8x8x128xbf16, #tpu.memory_space<vmem>>, vector<2x8x8x128xbf16>,
    %c0_14 = arith.constant 0 : index
    %c0_15 = arith.constant 0 : index
    %c0_16 = arith.constant 0 : index
    %c0_17 = arith.constant 0 : index
    %16 = vector.load %arg1[%c0_14, %c0_15, %c0_16, %c0_17] : memref<2x8x8x128xf32, #tpu.memory_space<vmem>>, vector<2x8x8x128xf32>
    %17 = arith.truncf %16 : vector<2x8x8x128xf32> to vector<2x8x8x128xbf16>
    %c0_18 = arith.constant 0 : index
    %c0_19 = arith.constant 0 : index
    %c0_20 = arith.constant 0 : index
    %c0_21 = arith.constant 0 : index
    %18 = vector.load %arg5[%c0_18, %c0_19, %c0_20, %c0_21] : memref<2x8x8x128xbf16, #tpu.memory_space<vmem>>, vector<2x8x8x128xbf16>
    tpu.vector_store %arg5[%c0_18, %c0_19, %c0_20, %c0_21], %17 {strides = array<i32>} : memref<2x8x8x128xbf16, #tpu.memory_space<vmem>>, vector<2x8x8x128xbf16>,
    return
  }
  func.func @transform_0(%arg0: i32) -> (i32, i32, i32, i32) {
    %c0_i32 = arith.constant 0 : i32
    %c0_i32_0 = arith.constant 0 : i32
    %c0_i32_1 = arith.constant 0 : i32
    %c0_i32_2 = arith.constant 0 : i32
    return %arg0, %c0_i32, %c0_i32_0, %c0_i32_1 : i32, i32, i32, i32
  }
  func.func @transform_1(%arg0: i32) -> (i32, i32) {
    %c0_i32 = arith.constant 0 : i32
    %c0_i32_0 = arith.constant 0 : i32
    %c0_i32_1 = arith.constant 0 : i32
    return %c0_i32, %c0_i32_0 : i32, i32
  }
  func.func @transform_2(%arg0: i32) -> (i32, i32, i32, i32) {
    %c0_i32 = arith.constant 0 : i32
    %c0_i32_0 = arith.constant 0 : i32
    %c0_i32_1 = arith.constant 0 : i32
    %c0_i32_2 = arith.constant 0 : i32
    return %arg0, %c0_i32, %c0_i32_0, %c0_i32_1 : i32, i32, i32, i32
  }
  func.func @transform_3(%arg0: i32) -> (i32, i32, i32) {
    %c0_i32 = arith.constant 0 : i32
    %c0_i32_0 = arith.constant 0 : i32
    %c0_i32_1 = arith.constant 0 : i32
    return %arg0, %c0_i32, %c0_i32_0 : i32, i32, i32
  }
  func.func @transform_4(%arg0: i32) -> (i32, i32, i32, i32) {
    %c0_i32 = arith.constant 0 : i32
    %c0_i32_0 = arith.constant 0 : i32
    %c0_i32_1 = arith.constant 0 : i32
    %c0_i32_2 = arith.constant 0 : i32
    return %arg0, %c0_i32, %c0_i32_0, %c0_i32_1 : i32, i32, i32, i32
  }
}

module attributes {stable_mosaic.version = 11 : i64} {
  func.func @k2(%arg0: i32, %arg1: memref<2x8x8x128xbf16, #tpu.memory_space<vmem>>, %arg2: memref<1152x128xbf16, #tpu.memory_space<vmem>>, %arg3: memref<1x128xf32, #tpu.memory_space<vmem>>, %arg4: memref<1x128xf32, #tpu.memory_space<vmem>>, %arg5: memref<2x8x8x128xbf16, #tpu.memory_space<vmem>>, %arg6: memref<1x2x128xf32, #tpu.memory_space<vmem>>, %arg7: memref<2x10x10x128xbf16, #tpu.memory_space<vmem>>) attributes {dimension_semantics = [#tpu.dimension_semantics<parallel>], iteration_bounds = array<i64: 4>, scalar_prefetch = 0 : i64, scratch_operands = 1 : i64, tpu.core_type = #tpu.core_type<tc>, window_params = [{transform_indices = @transform_0, window_bounds = array<i64: 2, 8, 8, 128>}, {pipeline_mode = #tpu.pipeline_mode<synchronous>, transform_indices = @transform_1, window_bounds = array<i64: 1152, 128>}, {pipeline_mode = #tpu.pipeline_mode<synchronous>, transform_indices = @transform_2, window_bounds = array<i64: 1, 128>}, {pipeline_mode = #tpu.pipeline_mode<synchronous>, transform_indices = @transform_3, window_bounds = array<i64: 1, 128>}, {transform_indices = @transform_4, window_bounds = array<i64: 2, 8, 8, 128>}, {transform_indices = @transform_5, window_bounds = array<i64: 1, 2, 128>}]} {
    %c0 = arith.constant 0 : index
    %c0_0 = arith.constant 0 : index
    %c0_1 = arith.constant 0 : index
    %c0_2 = arith.constant 0 : index
    %0 = vector.load %arg1[%c0, %c0_0, %c0_1, %c0_2] : memref<2x8x8x128xbf16, #tpu.memory_space<vmem>>, vector<2x8x8x128xbf16>
    %1 = arith.extf %0 : vector<2x8x8x128xbf16> to vector<2x8x8x128xf32>
    %2 = vector.shape_cast %1 : vector<2x8x8x128xf32> to vector<128x128xf32>
    %c0_3 = arith.constant 0 : index
    %c0_4 = arith.constant 0 : index
    %3 = vector.load %arg3[%c0_3, %c0_4] : memref<1x128xf32, #tpu.memory_space<vmem>>, vector<1x128xf32>
    %4 = vector.broadcast %3 : vector<1x128xf32> to vector<128x128xf32>
    %5 = arith.mulf %2, %4 : vector<128x128xf32>
    %c0_5 = arith.constant 0 : index
    %c0_6 = arith.constant 0 : index
    %6 = vector.load %arg4[%c0_5, %c0_6] : memref<1x128xf32, #tpu.memory_space<vmem>>, vector<1x128xf32>
    %7 = vector.broadcast %6 : vector<1x128xf32> to vector<128x128xf32>
    %8 = arith.addf %5, %7 : vector<128x128xf32>
    %cst = arith.constant 0.000000e+00 : f32
    %9 = vector.broadcast %cst : f32 to vector<128x128xf32>
    %10 = arith.maximumf %8, %9 : vector<128x128xf32>
    %11 = arith.truncf %10 : vector<128x128xf32> to vector<128x128xbf16>
    %12 = vector.shape_cast %11 : vector<128x128xbf16> to vector<2x8x8x128xbf16>
    %cst_7 = arith.constant 0.000000e+00 : bf16
    %13 = vector.broadcast %cst_7 : bf16 to vector<2x1x10x128xbf16>
    %cst_8 = arith.constant 0.000000e+00 : bf16
    %14 = vector.broadcast %cst_8 : bf16 to vector<2x10x1x128xbf16>
    %c0_9 = arith.constant 0 : index
    %c0_10 = arith.constant 0 : index
    %c0_11 = arith.constant 0 : index
    %c0_12 = arith.constant 0 : index
    %15 = vector.load %arg7[%c0_9, %c0_10, %c0_11, %c0_12] : memref<2x10x10x128xbf16, #tpu.memory_space<vmem>>, vector<2x1x10x128xbf16>
    tpu.vector_store %arg7[%c0_9, %c0_10, %c0_11, %c0_12], %13 {strides = array<i32>} : memref<2x10x10x128xbf16, #tpu.memory_space<vmem>>, vector<2x1x10x128xbf16>,
    %c0_13 = arith.constant 0 : index
    %c9 = arith.constant 9 : index
    %c0_14 = arith.constant 0 : index
    %c0_15 = arith.constant 0 : index
    %16 = vector.load %arg7[%c0_13, %c9, %c0_14, %c0_15] : memref<2x10x10x128xbf16, #tpu.memory_space<vmem>>, vector<2x1x10x128xbf16>
    tpu.vector_store %arg7[%c0_13, %c9, %c0_14, %c0_15], %13 {strides = array<i32>} : memref<2x10x10x128xbf16, #tpu.memory_space<vmem>>, vector<2x1x10x128xbf16>,
    %c0_16 = arith.constant 0 : index
    %c0_17 = arith.constant 0 : index
    %c0_18 = arith.constant 0 : index
    %c0_19 = arith.constant 0 : index
    %17 = vector.load %arg7[%c0_16, %c0_17, %c0_18, %c0_19] : memref<2x10x10x128xbf16, #tpu.memory_space<vmem>>, vector<2x10x1x128xbf16>
    tpu.vector_store %arg7[%c0_16, %c0_17, %c0_18, %c0_19], %14 {strides = array<i32>} : memref<2x10x10x128xbf16, #tpu.memory_space<vmem>>, vector<2x10x1x128xbf16>,
    %c0_20 = arith.constant 0 : index
    %c0_21 = arith.constant 0 : index
    %c9_22 = arith.constant 9 : index
    %c0_23 = arith.constant 0 : index
    %18 = vector.load %arg7[%c0_20, %c0_21, %c9_22, %c0_23] : memref<2x10x10x128xbf16, #tpu.memory_space<vmem>>, vector<2x10x1x128xbf16>
    tpu.vector_store %arg7[%c0_20, %c0_21, %c9_22, %c0_23], %14 {strides = array<i32>} : memref<2x10x10x128xbf16, #tpu.memory_space<vmem>>, vector<2x10x1x128xbf16>,
    %c0_24 = arith.constant 0 : index
    %c1 = arith.constant 1 : index
    %c1_25 = arith.constant 1 : index
    %c0_26 = arith.constant 0 : index
    %19 = vector.load %arg7[%c0_24, %c1, %c1_25, %c0_26] : memref<2x10x10x128xbf16, #tpu.memory_space<vmem>>, vector<2x8x8x128xbf16>
    tpu.vector_store %arg7[%c0_24, %c1, %c1_25, %c0_26], %12 {strides = array<i32>} : memref<2x10x10x128xbf16, #tpu.memory_space<vmem>>, vector<2x8x8x128xbf16>,
    %c0_27 = arith.constant 0 : index
    %c0_28 = arith.constant 0 : index
    %20 = vector.load %arg2[%c0_27, %c0_28] : memref<1152x128xbf16, #tpu.memory_space<vmem>>, vector<1152x128xbf16>
    %cst_29 = arith.constant 0.000000e+00 : f32
    %21 = vector.broadcast %cst_29 : f32 to vector<1x2x128xf32>
    %c0_30 = arith.constant 0 : index
    %c0_31 = arith.constant 0 : index
    %c0_32 = arith.constant 0 : index
    %c0_33 = arith.constant 0 : index
    %22 = vector.load %arg7[%c0_30, %c0_31, %c0_32, %c0_33] : memref<2x10x10x128xbf16, #tpu.memory_space<vmem>>, vector<2x10x10x128xbf16>
    %23 = vector.extract_strided_slice %22 {offsets = [0, 0, 0, 0], sizes = [2, 8, 8, 128], strides = [1, 1, 1, 1]} : vector<2x10x10x128xbf16> to vector<2x8x8x128xbf16>
    %24 = vector.extract_strided_slice %22 {offsets = [0, 0, 1, 0], sizes = [2, 8, 8, 128], strides = [1, 1, 1, 1]} : vector<2x10x10x128xbf16> to vector<2x8x8x128xbf16>
    %25 = vector.extract_strided_slice %22 {offsets = [0, 0, 2, 0], sizes = [2, 8, 8, 128], strides = [1, 1, 1, 1]} : vector<2x10x10x128xbf16> to vector<2x8x8x128xbf16>
    %26 = vector.extract_strided_slice %22 {offsets = [0, 1, 0, 0], sizes = [2, 8, 8, 128], strides = [1, 1, 1, 1]} : vector<2x10x10x128xbf16> to vector<2x8x8x128xbf16>
    %27 = vector.extract_strided_slice %22 {offsets = [0, 1, 1, 0], sizes = [2, 8, 8, 128], strides = [1, 1, 1, 1]} : vector<2x10x10x128xbf16> to vector<2x8x8x128xbf16>
    %28 = vector.extract_strided_slice %22 {offsets = [0, 1, 2, 0], sizes = [2, 8, 8, 128], strides = [1, 1, 1, 1]} : vector<2x10x10x128xbf16> to vector<2x8x8x128xbf16>
    %29 = vector.extract_strided_slice %22 {offsets = [0, 2, 0, 0], sizes = [2, 8, 8, 128], strides = [1, 1, 1, 1]} : vector<2x10x10x128xbf16> to vector<2x8x8x128xbf16>
    %30 = vector.extract_strided_slice %22 {offsets = [0, 2, 1, 0], sizes = [2, 8, 8, 128], strides = [1, 1, 1, 1]} : vector<2x10x10x128xbf16> to vector<2x8x8x128xbf16>
    %31 = vector.extract_strided_slice %22 {offsets = [0, 2, 2, 0], sizes = [2, 8, 8, 128], strides = [1, 1, 1, 1]} : vector<2x10x10x128xbf16> to vector<2x8x8x128xbf16>
    %32 = tpu.concatenate %23, %24, %25, %26, %27, %28, %29, %30, %31 in 3 : vector<2x8x8x128xbf16>, vector<2x8x8x128xbf16>, vector<2x8x8x128xbf16>, vector<2x8x8x128xbf16>, vector<2x8x8x128xbf16>, vector<2x8x8x128xbf16>, vector<2x8x8x128xbf16>, vector<2x8x8x128xbf16>, vector<2x8x8x128xbf16> -> vector<2x8x8x1152xbf16>
    %33 = vector.shape_cast %32 : vector<2x8x8x1152xbf16> to vector<128x1152xbf16>
    %cst_34 = arith.constant dense<0.000000e+00> : vector<128x128xf32>
    %34 = tpu.matmul %33, %20, %cst_34 {dimension_numbers = #tpu.dot_dimension_numbers<[1], [0], [0], [1], [0, 0, 1, 1], [], []>} : vector<128x1152xbf16>, vector<1152x128xbf16>, vector<128x128xf32> -> vector<128x128xf32>
    %cst_35 = arith.constant dense<0.000000e+00> : vector<128xf32>
    %35 = vector.multi_reduction <add>, %34, %cst_35 [0] : vector<128x128xf32> to vector<128xf32>
    %36 = vector.shape_cast %35 : vector<128xf32> to vector<1x128xf32>
    %37 = arith.mulf %34, %34 : vector<128x128xf32>
    %cst_36 = arith.constant dense<0.000000e+00> : vector<128xf32>
    %38 = vector.multi_reduction <add>, %37, %cst_36 [0] : vector<128x128xf32> to vector<128xf32>
    %39 = vector.shape_cast %38 : vector<128xf32> to vector<1x128xf32>
    %40 = tpu.concatenate %36, %39 in 0 : vector<1x128xf32>, vector<1x128xf32> -> vector<2x128xf32>
    %41 = vector.shape_cast %40 : vector<2x128xf32> to vector<1x2x128xf32>
    %42 = arith.addf %21, %41 : vector<1x2x128xf32>
    %43 = arith.truncf %34 : vector<128x128xf32> to vector<128x128xbf16>
    %44 = vector.shape_cast %43 : vector<128x128xbf16> to vector<2x8x8x128xbf16>
    %c0_37 = arith.constant 0 : index
    %c0_38 = arith.constant 0 : index
    %c0_39 = arith.constant 0 : index
    %c0_40 = arith.constant 0 : index
    %45 = vector.load %arg5[%c0_37, %c0_38, %c0_39, %c0_40] : memref<2x8x8x128xbf16, #tpu.memory_space<vmem>>, vector<2x8x8x128xbf16>
    tpu.vector_store %arg5[%c0_37, %c0_38, %c0_39, %c0_40], %44 {strides = array<i32>} : memref<2x8x8x128xbf16, #tpu.memory_space<vmem>>, vector<2x8x8x128xbf16>,
    %c0_41 = arith.constant 0 : index
    %c0_42 = arith.constant 0 : index
    %c0_43 = arith.constant 0 : index
    %46 = vector.load %arg6[%c0_41, %c0_42, %c0_43] : memref<1x2x128xf32, #tpu.memory_space<vmem>>, vector<1x2x128xf32>
    tpu.vector_store %arg6[%c0_41, %c0_42, %c0_43], %42 {strides = array<i32>} : memref<1x2x128xf32, #tpu.memory_space<vmem>>, vector<1x2x128xf32>,
    return
  }
  func.func @transform_0(%arg0: i32) -> (i32, i32, i32, i32) {
    %c0_i32 = arith.constant 0 : i32
    %c0_i32_0 = arith.constant 0 : i32
    %c0_i32_1 = arith.constant 0 : i32
    %c0_i32_2 = arith.constant 0 : i32
    return %arg0, %c0_i32, %c0_i32_0, %c0_i32_1 : i32, i32, i32, i32
  }
  func.func @transform_1(%arg0: i32) -> (i32, i32) {
    %c0_i32 = arith.constant 0 : i32
    %c0_i32_0 = arith.constant 0 : i32
    %c0_i32_1 = arith.constant 0 : i32
    return %c0_i32, %c0_i32_0 : i32, i32
  }
  func.func @transform_2(%arg0: i32) -> (i32, i32) {
    %c0_i32 = arith.constant 0 : i32
    %c0_i32_0 = arith.constant 0 : i32
    %c0_i32_1 = arith.constant 0 : i32
    return %c0_i32, %c0_i32_0 : i32, i32
  }
  func.func @transform_3(%arg0: i32) -> (i32, i32) {
    %c0_i32 = arith.constant 0 : i32
    %c0_i32_0 = arith.constant 0 : i32
    %c0_i32_1 = arith.constant 0 : i32
    return %c0_i32, %c0_i32_0 : i32, i32
  }
  func.func @transform_4(%arg0: i32) -> (i32, i32, i32, i32) {
    %c0_i32 = arith.constant 0 : i32
    %c0_i32_0 = arith.constant 0 : i32
    %c0_i32_1 = arith.constant 0 : i32
    %c0_i32_2 = arith.constant 0 : i32
    return %arg0, %c0_i32, %c0_i32_0, %c0_i32_1 : i32, i32, i32, i32
  }
  func.func @transform_5(%arg0: i32) -> (i32, i32, i32) {
    %c0_i32 = arith.constant 0 : i32
    %c0_i32_0 = arith.constant 0 : i32
    %c0_i32_1 = arith.constant 0 : i32
    return %arg0, %c0_i32, %c0_i32_0 : i32, i32, i32
  }
}

module attributes {stable_mosaic.version = 11 : i64} {
  func.func @k3(%arg0: i32, %arg1: memref<2x8x8x128xbf16, #tpu.memory_space<vmem>>, %arg2: memref<128x128xbf16, #tpu.memory_space<vmem>>, %arg3: memref<1x128xf32, #tpu.memory_space<vmem>>, %arg4: memref<1x128xf32, #tpu.memory_space<vmem>>, %arg5: memref<2x8x8x128xbf16, #tpu.memory_space<vmem>>, %arg6: memref<128x128xbf16, #tpu.memory_space<vmem>>, %arg7: memref<2x8x8x128xbf16, #tpu.memory_space<vmem>>, %arg8: memref<1x2x128xf32, #tpu.memory_space<vmem>>, %arg9: memref<2x8x8x128xbf16, #tpu.memory_space<vmem>>, %arg10: memref<1x2x128xf32, #tpu.memory_space<vmem>>) attributes {dimension_semantics = [#tpu.dimension_semantics<parallel>], iteration_bounds = array<i64: 4>, scalar_prefetch = 0 : i64, scratch_operands = 0 : i64, tpu.core_type = #tpu.core_type<tc>, window_params = [{transform_indices = @transform_0, window_bounds = array<i64: 2, 8, 8, 128>}, {pipeline_mode = #tpu.pipeline_mode<synchronous>, transform_indices = @transform_1, window_bounds = array<i64: 128, 128>}, {pipeline_mode = #tpu.pipeline_mode<synchronous>, transform_indices = @transform_2, window_bounds = array<i64: 1, 128>}, {pipeline_mode = #tpu.pipeline_mode<synchronous>, transform_indices = @transform_3, window_bounds = array<i64: 1, 128>}, {transform_indices = @transform_4, window_bounds = array<i64: 2, 8, 8, 128>}, {pipeline_mode = #tpu.pipeline_mode<synchronous>, transform_indices = @transform_5, window_bounds = array<i64: 128, 128>}, {transform_indices = @transform_6, window_bounds = array<i64: 2, 8, 8, 128>}, {transform_indices = @transform_7, window_bounds = array<i64: 1, 2, 128>}, {transform_indices = @transform_8, window_bounds = array<i64: 2, 8, 8, 128>}, {transform_indices = @transform_9, window_bounds = array<i64: 1, 2, 128>}]} {
    %c0 = arith.constant 0 : index
    %c0_0 = arith.constant 0 : index
    %c0_1 = arith.constant 0 : index
    %c0_2 = arith.constant 0 : index
    %0 = vector.load %arg1[%c0, %c0_0, %c0_1, %c0_2] : memref<2x8x8x128xbf16, #tpu.memory_space<vmem>>, vector<2x8x8x128xbf16>
    %1 = arith.extf %0 : vector<2x8x8x128xbf16> to vector<2x8x8x128xf32>
    %2 = vector.shape_cast %1 : vector<2x8x8x128xf32> to vector<128x128xf32>
    %c0_3 = arith.constant 0 : index
    %c0_4 = arith.constant 0 : index
    %3 = vector.load %arg3[%c0_3, %c0_4] : memref<1x128xf32, #tpu.memory_space<vmem>>, vector<1x128xf32>
    %4 = vector.broadcast %3 : vector<1x128xf32> to vector<128x128xf32>
    %5 = arith.mulf %2, %4 : vector<128x128xf32>
    %c0_5 = arith.constant 0 : index
    %c0_6 = arith.constant 0 : index
    %6 = vector.load %arg4[%c0_5, %c0_6] : memref<1x128xf32, #tpu.memory_space<vmem>>, vector<1x128xf32>
    %7 = vector.broadcast %6 : vector<1x128xf32> to vector<128x128xf32>
    %8 = arith.addf %5, %7 : vector<128x128xf32>
    %cst = arith.constant 0.000000e+00 : f32
    %9 = vector.broadcast %cst : f32 to vector<128x128xf32>
    %10 = arith.maximumf %8, %9 : vector<128x128xf32>
    %11 = arith.truncf %10 : vector<128x128xf32> to vector<128x128xbf16>
    %c0_7 = arith.constant 0 : index
    %c0_8 = arith.constant 0 : index
    %12 = vector.load %arg2[%c0_7, %c0_8] : memref<128x128xbf16, #tpu.memory_space<vmem>>, vector<128x128xbf16>
    %cst_9 = arith.constant dense<0.000000e+00> : vector<128x128xf32>
    %13 = tpu.matmul %11, %12, %cst_9 {dimension_numbers = #tpu.dot_dimension_numbers<[1], [0], [0], [1], [0, 0, 1, 1], [], []>} : vector<128x128xbf16>, vector<128x128xbf16>, vector<128x128xf32> -> vector<128x128xf32>
    %cst_10 = arith.constant dense<0.000000e+00> : vector<128xf32>
    %14 = vector.multi_reduction <add>, %13, %cst_10 [0] : vector<128x128xf32> to vector<128xf32>
    %15 = vector.shape_cast %14 : vector<128xf32> to vector<1x128xf32>
    %16 = arith.mulf %13, %13 : vector<128x128xf32>
    %cst_11 = arith.constant dense<0.000000e+00> : vector<128xf32>
    %17 = vector.multi_reduction <add>, %16, %cst_11 [0] : vector<128x128xf32> to vector<128xf32>
    %18 = vector.shape_cast %17 : vector<128xf32> to vector<1x128xf32>
    %19 = tpu.concatenate %15, %18 in 0 : vector<1x128xf32>, vector<1x128xf32> -> vector<2x128xf32>
    %20 = vector.shape_cast %19 : vector<2x128xf32> to vector<1x2x128xf32>
    %c0_12 = arith.constant 0 : index
    %c0_13 = arith.constant 0 : index
    %c0_14 = arith.constant 0 : index
    %21 = vector.load %arg8[%c0_12, %c0_13, %c0_14] : memref<1x2x128xf32, #tpu.memory_space<vmem>>, vector<1x2x128xf32>
    tpu.vector_store %arg8[%c0_12, %c0_13, %c0_14], %20 {strides = array<i32>} : memref<1x2x128xf32, #tpu.memory_space<vmem>>, vector<1x2x128xf32>,
    %22 = arith.truncf %13 : vector<128x128xf32> to vector<128x128xbf16>
    %23 = vector.shape_cast %22 : vector<128x128xbf16> to vector<2x8x8x128xbf16>
    %c0_15 = arith.constant 0 : index
    %c0_16 = arith.constant 0 : index
    %c0_17 = arith.constant 0 : index
    %c0_18 = arith.constant 0 : index
    %24 = vector.load %arg7[%c0_15, %c0_16, %c0_17, %c0_18] : memref<2x8x8x128xbf16, #tpu.memory_space<vmem>>, vector<2x8x8x128xbf16>
    tpu.vector_store %arg7[%c0_15, %c0_16, %c0_17, %c0_18], %23 {strides = array<i32>} : memref<2x8x8x128xbf16, #tpu.memory_space<vmem>>, vector<2x8x8x128xbf16>,
    %c0_19 = arith.constant 0 : index
    %c0_20 = arith.constant 0 : index
    %c0_21 = arith.constant 0 : index
    %c0_22 = arith.constant 0 : index
    %25 = vector.load %arg5[%c0_19, %c0_20, %c0_21, %c0_22] : memref<2x8x8x128xbf16, #tpu.memory_space<vmem>>, vector<2x8x8x128xbf16>
    %26 = vector.shape_cast %25 : vector<2x8x8x128xbf16> to vector<128x128xbf16>
    %c0_23 = arith.constant 0 : index
    %c0_24 = arith.constant 0 : index
    %27 = vector.load %arg6[%c0_23, %c0_24] : memref<128x128xbf16, #tpu.memory_space<vmem>>, vector<128x128xbf16>
    %cst_25 = arith.constant dense<0.000000e+00> : vector<128x128xf32>
    %28 = tpu.matmul %26, %27, %cst_25 {dimension_numbers = #tpu.dot_dimension_numbers<[1], [0], [0], [1], [0, 0, 1, 1], [], []>} : vector<128x128xbf16>, vector<128x128xbf16>, vector<128x128xf32> -> vector<128x128xf32>
    %cst_26 = arith.constant dense<0.000000e+00> : vector<128xf32>
    %29 = vector.multi_reduction <add>, %28, %cst_26 [0] : vector<128x128xf32> to vector<128xf32>
    %30 = vector.shape_cast %29 : vector<128xf32> to vector<1x128xf32>
    %31 = arith.mulf %28, %28 : vector<128x128xf32>
    %cst_27 = arith.constant dense<0.000000e+00> : vector<128xf32>
    %32 = vector.multi_reduction <add>, %31, %cst_27 [0] : vector<128x128xf32> to vector<128xf32>
    %33 = vector.shape_cast %32 : vector<128xf32> to vector<1x128xf32>
    %34 = tpu.concatenate %30, %33 in 0 : vector<1x128xf32>, vector<1x128xf32> -> vector<2x128xf32>
    %35 = vector.shape_cast %34 : vector<2x128xf32> to vector<1x2x128xf32>
    %c0_28 = arith.constant 0 : index
    %c0_29 = arith.constant 0 : index
    %c0_30 = arith.constant 0 : index
    %36 = vector.load %arg10[%c0_28, %c0_29, %c0_30] : memref<1x2x128xf32, #tpu.memory_space<vmem>>, vector<1x2x128xf32>
    tpu.vector_store %arg10[%c0_28, %c0_29, %c0_30], %35 {strides = array<i32>} : memref<1x2x128xf32, #tpu.memory_space<vmem>>, vector<1x2x128xf32>,
    %37 = arith.truncf %28 : vector<128x128xf32> to vector<128x128xbf16>
    %38 = vector.shape_cast %37 : vector<128x128xbf16> to vector<2x8x8x128xbf16>
    %c0_31 = arith.constant 0 : index
    %c0_32 = arith.constant 0 : index
    %c0_33 = arith.constant 0 : index
    %c0_34 = arith.constant 0 : index
    %39 = vector.load %arg9[%c0_31, %c0_32, %c0_33, %c0_34] : memref<2x8x8x128xbf16, #tpu.memory_space<vmem>>, vector<2x8x8x128xbf16>
    tpu.vector_store %arg9[%c0_31, %c0_32, %c0_33, %c0_34], %38 {strides = array<i32>} : memref<2x8x8x128xbf16, #tpu.memory_space<vmem>>, vector<2x8x8x128xbf16>,
    return
  }
  func.func @transform_0(%arg0: i32) -> (i32, i32, i32, i32) {
    %c0_i32 = arith.constant 0 : i32
    %c0_i32_0 = arith.constant 0 : i32
    %c0_i32_1 = arith.constant 0 : i32
    %c0_i32_2 = arith.constant 0 : i32
    return %arg0, %c0_i32, %c0_i32_0, %c0_i32_1 : i32, i32, i32, i32
  }
  func.func @transform_1(%arg0: i32) -> (i32, i32) {
    %c0_i32 = arith.constant 0 : i32
    %c0_i32_0 = arith.constant 0 : i32
    %c0_i32_1 = arith.constant 0 : i32
    return %c0_i32, %c0_i32_0 : i32, i32
  }
  func.func @transform_2(%arg0: i32) -> (i32, i32) {
    %c0_i32 = arith.constant 0 : i32
    %c0_i32_0 = arith.constant 0 : i32
    %c0_i32_1 = arith.constant 0 : i32
    return %c0_i32, %c0_i32_0 : i32, i32
  }
  func.func @transform_3(%arg0: i32) -> (i32, i32) {
    %c0_i32 = arith.constant 0 : i32
    %c0_i32_0 = arith.constant 0 : i32
    %c0_i32_1 = arith.constant 0 : i32
    return %c0_i32, %c0_i32_0 : i32, i32
  }
  func.func @transform_4(%arg0: i32) -> (i32, i32, i32, i32) {
    %c0_i32 = arith.constant 0 : i32
    %c0_i32_0 = arith.constant 0 : i32
    %c0_i32_1 = arith.constant 0 : i32
    %c0_i32_2 = arith.constant 0 : i32
    return %arg0, %c0_i32, %c0_i32_0, %c0_i32_1 : i32, i32, i32, i32
  }
  func.func @transform_5(%arg0: i32) -> (i32, i32) {
    %c0_i32 = arith.constant 0 : i32
    %c0_i32_0 = arith.constant 0 : i32
    %c0_i32_1 = arith.constant 0 : i32
    return %c0_i32, %c0_i32_0 : i32, i32
  }
  func.func @transform_6(%arg0: i32) -> (i32, i32, i32, i32) {
    %c0_i32 = arith.constant 0 : i32
    %c0_i32_0 = arith.constant 0 : i32
    %c0_i32_1 = arith.constant 0 : i32
    %c0_i32_2 = arith.constant 0 : i32
    return %arg0, %c0_i32, %c0_i32_0, %c0_i32_1 : i32, i32, i32, i32
  }
  func.func @transform_7(%arg0: i32) -> (i32, i32, i32) {
    %c0_i32 = arith.constant 0 : i32
    %c0_i32_0 = arith.constant 0 : i32
    %c0_i32_1 = arith.constant 0 : i32
    return %arg0, %c0_i32, %c0_i32_0 : i32, i32, i32
  }
  func.func @transform_8(%arg0: i32) -> (i32, i32, i32, i32) {
    %c0_i32 = arith.constant 0 : i32
    %c0_i32_0 = arith.constant 0 : i32
    %c0_i32_1 = arith.constant 0 : i32
    %c0_i32_2 = arith.constant 0 : i32
    return %arg0, %c0_i32, %c0_i32_0, %c0_i32_1 : i32, i32, i32, i32
  }
  func.func @transform_9(%arg0: i32) -> (i32, i32, i32) {
    %c0_i32 = arith.constant 0 : i32
    %c0_i32_0 = arith.constant 0 : i32
    %c0_i32_1 = arith.constant 0 : i32
    return %arg0, %c0_i32, %c0_i32_0 : i32, i32, i32
  }
}

module attributes {stable_mosaic.version = 11 : i64} {
  func.func @k4(%arg0: i32, %arg1: memref<2x8x8x128xbf16, #tpu.memory_space<vmem>>, %arg2: memref<2x8x8x128xbf16, #tpu.memory_space<vmem>>, %arg3: memref<1x128xf32, #tpu.memory_space<vmem>>, %arg4: memref<1x128xf32, #tpu.memory_space<vmem>>, %arg5: memref<1x128xf32, #tpu.memory_space<vmem>>, %arg6: memref<1x128xf32, #tpu.memory_space<vmem>>, %arg7: memref<2x8x8x128xf32, #tpu.memory_space<vmem>>) attributes {dimension_semantics = [#tpu.dimension_semantics<parallel>], iteration_bounds = array<i64: 4>, scalar_prefetch = 0 : i64, scratch_operands = 0 : i64, tpu.core_type = #tpu.core_type<tc>, window_params = [{transform_indices = @transform_0, window_bounds = array<i64: 2, 8, 8, 128>}, {transform_indices = @transform_1, window_bounds = array<i64: 2, 8, 8, 128>}, {pipeline_mode = #tpu.pipeline_mode<synchronous>, transform_indices = @transform_2, window_bounds = array<i64: 1, 128>}, {pipeline_mode = #tpu.pipeline_mode<synchronous>, transform_indices = @transform_3, window_bounds = array<i64: 1, 128>}, {pipeline_mode = #tpu.pipeline_mode<synchronous>, transform_indices = @transform_4, window_bounds = array<i64: 1, 128>}, {pipeline_mode = #tpu.pipeline_mode<synchronous>, transform_indices = @transform_5, window_bounds = array<i64: 1, 128>}, {transform_indices = @transform_6, window_bounds = array<i64: 2, 8, 8, 128>}]} {
    %c0 = arith.constant 0 : index
    %c0_0 = arith.constant 0 : index
    %c0_1 = arith.constant 0 : index
    %c0_2 = arith.constant 0 : index
    %0 = vector.load %arg1[%c0, %c0_0, %c0_1, %c0_2] : memref<2x8x8x128xbf16, #tpu.memory_space<vmem>>, vector<2x8x8x128xbf16>
    %1 = arith.extf %0 : vector<2x8x8x128xbf16> to vector<2x8x8x128xf32>
    %2 = vector.shape_cast %1 : vector<2x8x8x128xf32> to vector<128x128xf32>
    %c0_3 = arith.constant 0 : index
    %c0_4 = arith.constant 0 : index
    %3 = vector.load %arg3[%c0_3, %c0_4] : memref<1x128xf32, #tpu.memory_space<vmem>>, vector<1x128xf32>
    %4 = vector.broadcast %3 : vector<1x128xf32> to vector<128x128xf32>
    %5 = arith.mulf %2, %4 : vector<128x128xf32>
    %c0_5 = arith.constant 0 : index
    %c0_6 = arith.constant 0 : index
    %6 = vector.load %arg4[%c0_5, %c0_6] : memref<1x128xf32, #tpu.memory_space<vmem>>, vector<1x128xf32>
    %7 = vector.broadcast %6 : vector<1x128xf32> to vector<128x128xf32>
    %8 = arith.addf %5, %7 : vector<128x128xf32>
    %c0_7 = arith.constant 0 : index
    %c0_8 = arith.constant 0 : index
    %c0_9 = arith.constant 0 : index
    %c0_10 = arith.constant 0 : index
    %9 = vector.load %arg2[%c0_7, %c0_8, %c0_9, %c0_10] : memref<2x8x8x128xbf16, #tpu.memory_space<vmem>>, vector<2x8x8x128xbf16>
    %10 = arith.extf %9 : vector<2x8x8x128xbf16> to vector<2x8x8x128xf32>
    %11 = vector.shape_cast %10 : vector<2x8x8x128xf32> to vector<128x128xf32>
    %c0_11 = arith.constant 0 : index
    %c0_12 = arith.constant 0 : index
    %12 = vector.load %arg5[%c0_11, %c0_12] : memref<1x128xf32, #tpu.memory_space<vmem>>, vector<1x128xf32>
    %13 = vector.broadcast %12 : vector<1x128xf32> to vector<128x128xf32>
    %14 = arith.mulf %11, %13 : vector<128x128xf32>
    %c0_13 = arith.constant 0 : index
    %c0_14 = arith.constant 0 : index
    %15 = vector.load %arg6[%c0_13, %c0_14] : memref<1x128xf32, #tpu.memory_space<vmem>>, vector<1x128xf32>
    %16 = vector.broadcast %15 : vector<1x128xf32> to vector<128x128xf32>
    %17 = arith.addf %14, %16 : vector<128x128xf32>
    %18 = arith.addf %8, %17 : vector<128x128xf32>
    %cst = arith.constant 0.000000e+00 : f32
    %19 = vector.broadcast %cst : f32 to vector<128x128xf32>
    %20 = arith.maximumf %18, %19 : vector<128x128xf32>
    %21 = vector.shape_cast %20 : vector<128x128xf32> to vector<2x8x8x128xf32>
    %c0_15 = arith.constant 0 : index
    %c0_16 = arith.constant 0 : index
    %c0_17 = arith.constant 0 : index
    %c0_18 = arith.constant 0 : index
    %22 = vector.load %arg7[%c0_15, %c0_16, %c0_17, %c0_18] : memref<2x8x8x128xf32, #tpu.memory_space<vmem>>, vector<2x8x8x128xf32>
    tpu.vector_store %arg7[%c0_15, %c0_16, %c0_17, %c0_18], %21 {strides = array<i32>} : memref<2x8x8x128xf32, #tpu.memory_space<vmem>>, vector<2x8x8x128xf32>,
    return
  }
  func.func @transform_0(%arg0: i32) -> (i32, i32, i32, i32) {
    %c0_i32 = arith.constant 0 : i32
    %c0_i32_0 = arith.constant 0 : i32
    %c0_i32_1 = arith.constant 0 : i32
    %c0_i32_2 = arith.constant 0 : i32
    return %arg0, %c0_i32, %c0_i32_0, %c0_i32_1 : i32, i32, i32, i32
  }
  func.func @transform_1(%arg0: i32) -> (i32, i32, i32, i32) {
    %c0_i32 = arith.constant 0 : i32
    %c0_i32_0 = arith.constant 0 : i32
    %c0_i32_1 = arith.constant 0 : i32
    %c0_i32_2 = arith.constant 0 : i32
    return %arg0, %c0_i32, %c0_i32_0, %c0_i32_1 : i32, i32, i32, i32
  }
  func.func @transform_2(%arg0: i32) -> (i32, i32) {
    %c0_i32 = arith.constant 0 : i32
    %c0_i32_0 = arith.constant 0 : i32
    %c0_i32_1 = arith.constant 0 : i32
    return %c0_i32, %c0_i32_0 : i32, i32
  }
  func.func @transform_3(%arg0: i32) -> (i32, i32) {
    %c0_i32 = arith.constant 0 : i32
    %c0_i32_0 = arith.constant 0 : i32
    %c0_i32_1 = arith.constant 0 : i32
    return %c0_i32, %c0_i32_0 : i32, i32
  }
  func.func @transform_4(%arg0: i32) -> (i32, i32) {
    %c0_i32 = arith.constant 0 : i32
    %c0_i32_0 = arith.constant 0 : i32
    %c0_i32_1 = arith.constant 0 : i32
    return %c0_i32, %c0_i32_0 : i32, i32
  }
  func.func @transform_5(%arg0: i32) -> (i32, i32) {
    %c0_i32 = arith.constant 0 : i32
    %c0_i32_0 = arith.constant 0 : i32
    %c0_i32_1 = arith.constant 0 : i32
    return %c0_i32, %c0_i32_0 : i32, i32
  }
  func.func @transform_6(%arg0: i32) -> (i32, i32, i32, i32) {
    %c0_i32 = arith.constant 0 : i32
    %c0_i32_0 = arith.constant 0 : i32
    %c0_i32_1 = arith.constant 0 : i32
    %c0_i32_2 = arith.constant 0 : i32
    return %arg0, %c0_i32, %c0_i32_0, %c0_i32_1 : i32, i32, i32, i32
  }
}

</mosaic_0001>

<bundles_post_ra>
// kernel: bottleneck_forward.4
= control target key start
LH: loop header
LB: loop body
LE: loop exit
PB: predicated region body
PF: predicated region fallthrough
CT: control target
= control target key end

     0   :  { %10 = vsyncpa [#allocation3], 0  ;;  %s1722_s0 = inlined_call_operand.hbm [shape: f32[8,8,8,128], index: 0, kind: input, shape index: {}]   ;;  %s1723_s1 = inlined_call_operand.hbm [shape: bf16[128,128], index: 1, kind: input, shape index: {}]   ;;  %s1724_s2 = inlined_call_operand.hbm [shape: bf16[8,8,8,128], index: 2, kind: output, shape index: {0}]   ;;  %s1725_s3 = inlined_call_operand.hbm [shape: f32[4,2,128], index: 3, kind: output, shape index: {1}]   ;;  %s1726_s4 = inlined_call_operand.hbm [shape: bf16[8,8,8,128], index: 4, kind: output, shape index: {2}]  }
   0x1   :  { %12 = vsyncpa [#allocation3 + $0x1], 0 }
   0x2   :  { %13 = vsyncpa [#allocation6], 0 }
   0x3   :  { %14 = vsyncpa [#allocation4], 0 }
   0x4   :  { %16 = vsyncpa [#allocation4 + $0x1], 0 }
   0x5   :  { %17 = vsyncpa [#allocation9], 0 }
   0x6   :  { %19 = vsyncpa [#allocation9 + $0x1], 0  ;;  %s1364_s15 = smov 0   ;;  %s1366_s16 = smov 0  }
   0x7   :  { %s1368_s17 = smov 0   ;;  %s1370_s18 = smov 0  }
   0x8 LB: > { %s1385_s19 = sadd.s32 4294967295, %s1326_s18   ;;  %s827_s20 = sadd.s32 4294967294, %s1326_s18   ;;  %s1326_s18 = sphi %s1370_s18, %s1745_s18   ;;  %s1322_s17 = sphi %s1368_s17, %s1744_s17   ;;  %s1318_s16 = sphi %s1366_s16, %s1743_s16   ;;  %s1314_s15 = sphi %s1364_s15, %s1742_s15  }
   0x9   : > { %p45_p0 = scmp.ne.s32.totalorder %s1318_s16, %s1314_s15  ;;  %p1727_p1 = scmp.eq.s32.totalorder %s1385_s19, 0 }
   0xa   : > { %p96_p3 = scmp.eq.s32.totalorder %s827_s20, 3  ;;  %p828_p5 = scmp.ge.s32.totalorder %s1326_s18, 1 }
   0xb   : > { %p1396_p4 = por %p1727_p1, %p45_p0  ;;  %p155_p7 = scmp.lt.s32.totalorder %s1326_s18, 5 }
   0xc   : > { %p1401_p6 = por %p96_p3, %p45_p0  ;;  %s1328_s24 = smov [#allocation5]  }
   0xd   : > { %s1730_s21 = scalar_select %p1396_p4, 1, 0 }
   0xe   : > { %s1731_s22 = scalar_select %p1401_p6, 1, 0 }
   0xf   : > { %p1406_p8 = pnand %p828_p5, %p155_p7  ;;  %s167_s25 = sshll.u32 %s1328_s24, 4  ;;  %s168_s25 = int_to_ptr.vmem [resolvable:$true] %s167_s25 }
  0x10   : > { %s1419_s27 = sadd.s32 1, %s1326_s18   ;;  %s32_s28 = sadd.s32 1, %s1322_s17 }
  0x11   : > { %s1732_s23 = scalar_select %p1406_p8, 1, 0 }
  0x12   : > { %p1069_p9 = pneg %p1406_p8  ;;  %s29_s29 = ssub.s32 %s1326_s18, %s1419_s27 }
  0x13   : > { %s1138_s6 = scalar_lea.hbm %s1723_s1, 1024 }
  0x14   : > { %p1414_p10 = pnand %p1069_p9, %p1727_p1  ;;  %p1139_p11 = scmp.ne.s32.totalorder %s1723_s1, %s1138_s6 }
  0x15   : > { %p1145_p3 = scmp.lt.u32.totalorder %s1138_s6, %s1723_s1 }
  0x16   : > { %p1140_p12 = pneg %p1414_p10 }
  0x18   : > { %p1141_p13 = pnand %p1140_p12, %p1139_p11 }
  0x1a   : > { %p1142_p0 = pneg %p1141_p13 }
  0x1c   : > { %p1147_p5 = pnand %p1145_p3, %p1142_p0 }
  0x1e   : > { %1150 = shalt.err (!%p1147_p5)
}
  0x1f   : > { %s1151_s11 = scalar_lea.vmem %s168_s25, 1024  ;;  %p1159_p2 = scmp.lt.s32.totalorder %s168_s25, %s168_s25 }
  0x20   : > { %p1152_p7 = scmp.ne.s32.totalorder %s168_s25, %s1151_s11  ;;  %p1160_p6 = scmp.lt.s32.totalorder %s1151_s11, %s1151_s11 }
  0x22   : > { %p1154_p9 = pnand %p1152_p7, %p1140_p12  ;;  %p1161_p4 = por %p1160_p6, %p1159_p2 }
  0x24   : > { %p1155_p1 = pneg %p1154_p9 }
  0x26   : > { %p1162_p8 = pnand %p1161_p4, %p1155_p1 }
  0x28   : > { %1165 = shalt.err (!%p1162_p8)
}
  0x29   : > { %s1329_s12 = smov 64   ;;  %s1330_s13 = smov 4  }
  0x2a   : > { %1072 = dma.hbm_to_vmem [thread:$0]  (!%p1414_p10), %s1723_s1, 1024, %s168_s25, [#allocation6], %s1329_s12, %s1329_s12, %s1330_s13  }
  0x2b   : > { %p30_p11 = scmp.eq.s32.totalorder %s29_s29, 0  ;;  %p39_p2 = scmp.ne.s32.totalorder %s1322_s17, %s1318_s16 }
  0x2c   : > { %p40_p1 = scmp.eq.s32.totalorder %s1326_s18, 0  ;;  %p1088_p4 = scmp.lt.s32.totalorder %s1326_s18, 4 }
  0x2d   : > { %s1445_s30 = scalar_select %p30_p11, %s1322_s17, %s32_s28  }
  0x2e   : > { %p41_p6 = por %p40_p1, %p39_p2  ;;  %p1734_p8 = scmp.eq.s32.totalorder %s1385_s19, 3 }
  0x2f   : > { %s181_s6 = sand.u32 1, %s1322_s17   ;;  %s878_s7 = sshll.u32 %s1326_s18, 11 }
  0x30   : > { %p1449_p12 = por %p1734_p8, %p39_p2  ;;  %s831_s8 = sshll.u32 %s181_s6, 7 }
  0x31   : > { %s1458_s10 = scalar_lea.hbm %s1722_s0, %s878_s7  ;;  %s185_s25 = scalar_lea.vmem [#allocation2], %s831_s8 }
  0x32   : > { %s193_s28 = sshll.u32 %s185_s25, 4  ;;  %p1460_p10 = pnand %p1088_p4, %p41_p6  ;;  %s1464_s28 = int_to_ptr.vmem [resolvable:$true] %s193_s28 }
  0x33   : > { %s1466_s11 = scalar_lea.sflag [#allocation3], %s181_s6  ;;  %s1166_s12 = scalar_lea.hbm %s1458_s10, 2048 }
  0x34   : > { %p1167_p13 = scmp.ne.s32.totalorder %s1458_s10, %s1166_s12  ;;  %p1168_p0 = pneg %p1460_p10 }
  0x35   : > { %s1171_s24 = scalar_lea.hbm %s1722_s0, 8192  ;;  %p1172_p7 = scmp.lt.u32.totalorder %s1458_s10, %s1722_s0 }
  0x36   : > { %p1169_p3 = pnand %p1168_p0, %p1167_p13  ;;  %p1173_p9 = scmp.lt.u32.totalorder %s1171_s24, %s1166_s12 }
  0x37   : > { %p1175_p2 = scmp.lt.u32.totalorder %s1166_s12, %s1458_s10 }
  0x38   : > { %p1170_p5 = pneg %p1169_p3  ;;  %p1174_p11 = por %p1173_p9, %p1172_p7 }
  0x3a   : > { %p1176_p1 = por %p1175_p2, %p1174_p11 }
  0x3c   : > { %p1177_p4 = pnand %p1176_p1, %p1170_p5 }
  0x3e   : > { %1180 = shalt.err (!%p1177_p4)
}
  0x3f   : > { %s1181_s6 = scalar_lea.vmem %s1464_s28, 2048  ;;  %s1331_s26 = smov [#allocation2]  }
  0x40   : > { %p1182_p6 = scmp.ne.s32.totalorder %s1464_s28, %s1181_s6  ;;  %s1186_s9 = sshll.u32 %s1331_s26, 4  ;;  %s1187_s9 = int_to_ptr.vmem [resolvable:$false] %s1186_s9 }
  0x41   : > { %s1188_s25 = scalar_lea.vmem %s1187_s9, 4096  ;;  %p1189_p3 = scmp.lt.s32.totalorder %s1464_s28, %s1187_s9 }
  0x42   : > { %p1184_p8 = pnand %p1182_p6, %p1168_p0  ;;  %p1190_p7 = scmp.lt.s32.totalorder %s1188_s25, %s1181_s6 }
  0x44   : > { %p1185_p13 = pneg %p1184_p8  ;;  %p1191_p9 = por %p1190_p7, %p1189_p3 }
  0x46   : > { %p1192_p11 = pnand %p1191_p9, %p1185_p13 }
  0x48   : > { %1195 = shalt.err (!%p1192_p11)
}
  0x49   : > { %s1332_s12 = smov 128   ;;  %s1333_s13 = smov 8  }
  0x4a   : > { %1076 = dma.hbm_to_vmem [thread:$0]  (!%p1460_p10), %s1458_s10, 2048, %s1464_s28, %s1466_s11, %s1332_s12, %s1332_s12, %s1333_s13  }
  0x4b   : > { %p1737_p0 = scmp.ne.s32.totalorder %s1732_s23, 0 }
  0x4c   : > { %s1497_s14 = sand.u32 (!%p1737_p0), 1, %s1318_s16   ;;  %p1738_p5 = scmp.ne.s32.totalorder (!%p1737_p0), %s1730_s21, 0 }
  0x4d   : > { %205 = sbr.rel (%p1737_p0) target bundleno = 428 (0x1ac), region = 28  ;;  %s836_s24 = sshll.u32 (!%p1737_p0), %s1497_s14, 7 }
  0x4e   : > { %s208_s7 = scalar_lea.sflag (!%p1737_p0), [#allocation3], %s1497_s14  ;;  %s1501_s8 = scalar_lea.vmem (!%p1737_p0), [#allocation2], %s836_s24 }
  0x54   : > { %1297 = dma.done.wait (%p1738_p5), %s208_s7, 2048  }
  0x55   : > { %1299 = vsyncadd (%p1738_p5), %s208_s7, 4294965248  ;;  %p1739_p10 = scmp.eq.s32.totalorder %s1385_s19, 0 }
  0x57   : > { %1301 = dma.done.wait (%p1739_p10), [#allocation6], 1024   ;;  %p1740_p2 = pmov %p1739_p10 }
  0x58   : > { %v1130_v0 = vld [vmem:[#allocation5] sm:$0xff]   ;;  %v1131_v1 = vld [vmem:[#allocation5 + $0x8] sm:$0xff]   ;;  %v1132_v2 = vld [vmem:[#allocation5 + $0x10] sm:$0xff]   ;;  %s838_s21 = sshll.u32 %s1497_s14, 6  ;;  %s896_s29 = sshll.u32 %s1385_s19, 10 }
  0x59   : > { %1303 = vsyncadd (%p1740_p2), [#allocation6], 4294966272  ;;  %1009 = vmatprep.subr.bf16.mxu0 %v1130_v0  ;;  %1041 = vmatprep.subr.bf16.mxu1 %v1130_v0  ;;  %v1133_v3 = vld [vmem:[#allocation5 + $0x18] sm:$0xff]   ;;  %v254_v4 = vld [vmem:[%s1501_s8] sm:$0xff]  ;;  %s1528_s23 = scalar_lea.vmem [#allocation10], %s838_s21  ;;  %s1548_s10 = scalar_lea.vmem [#allocation7], %s838_s21 }
  0x5a   : > { %1010 = vmatpush3.bf16.msra.mxu0 %v1130_v0  ;;  %1049 = vmatpush3.bf16.msra.mxu1 %v1130_v0  ;;  %v255_v5 = vld [vmem:[%s1501_s8 + $0x8] sm:$0xff]  ;;  %v262_v7 = vld [vmem:[%s1501_s8 + $0x40] sm:$0xff]  ;;  %v1136_v12 = vld [vmem:[#allocation5 + $0x30] sm:$0xff]   ;;  %s653_s28 = sshll.u32 %s1548_s10, 4  ;;  %s1573_s26 = scalar_lea.hbm %s1724_s2, %s896_s29  ;;  %s1575_s28 = int_to_ptr.vmem [resolvable:$true] %s653_s28 }
  0x5b   : > { %1011 = vmatprep.subr.bf16.mxu0 %v1131_v1  ;;  %1042 = vmatprep.subr.bf16.mxu1 %v1131_v1  ;;  %v270_v6 = vpack.c.bf16 %v255_v5, %v254_v4  ;;  %v263_v8 = vld [vmem:[%s1501_s8 + $0x48] sm:$0xff]  ;;  %v1134_v9 = vld [vmem:[#allocation5 + $0x20] sm:$0xff]   ;;  %v1137_v13 = vld [vmem:[#allocation5 + $0x38] sm:$0xff]   ;;  %s629_s9 = scalar_lea.sflag [#allocation4], %s1497_s14  ;;  %s1196_s25 = scalar_lea.vmem %s1575_s28, 1024 }
  0x5c   : > { %v274_v10 = vpack.c.bf16 %v263_v8, %v262_v7  ;;  %v1135_v11 = vld [vmem:[#allocation5 + $0x28] sm:$0xff]   ;;  %v256_v14 = vld [vmem:[%s1501_s8 + $0x10] sm:$0xff]  ;;  %v257_v15 = vld [vmem:[%s1501_s8 + $0x18] sm:$0xff]  ;;  %p1197_p1 = scmp.ne.s32.totalorder %s1575_s28, %s1196_s25  ;;  %s1334_s12 = smov [#allocation7]  }
  0x5d   : > { %1025 = vmatprep.mubr.bf16.mxu0 %v270_v6  ;;  %v258_v16 = vld [vmem:[%s1501_s8 + $0x20] sm:$0xff]  ;;  %v264_v17 = vld [vmem:[%s1501_s8 + $0x50] sm:$0xff]  ;;  %v265_v18 = vld [vmem:[%s1501_s8 + $0x58] sm:$0xff]  ;;  %v271_v22 = vpack.c.bf16 %v257_v15, %v256_v14  ;;  %943 = vst [vmem:[%s1528_s23] sm:$0xff] %v270_v6   ;;  %s1200_s13 = sshll.u32 %s1334_s12, 4  ;;  %s1201_s13 = int_to_ptr.vmem [resolvable:$false] %s1200_s13 }
  0x5e   : > { %1012 = vmatpush3.bf16.msra.mxu0 %v1131_v1  ;;  %1050 = vmatpush3.bf16.msra.mxu1 %v1131_v1  ;;  %v259_v19 = vld [vmem:[%s1501_s8 + $0x28] sm:$0xff]  ;;  %v266_v20 = vld [vmem:[%s1501_s8 + $0x60] sm:$0xff]  ;;  %v275_v23 = vpack.c.bf16 %v265_v18, %v264_v17  ;;  %v260_v26 = vld [vmem:[%s1501_s8 + $0x30] sm:$0xff]  ;;  %989 = vst [vmem:[%s1528_s23 + $0x20] sm:$0xff] %v274_v10   ;;  %p1198_p4 = pnand %p1197_p1, %p1449_p12  ;;  %s1202_s24 = scalar_lea.vmem %s1201_s13, 2048 }
  0x5f   : > { %1013 = vmatprep.subr.bf16.mxu0 %v1132_v2  ;;  %1043 = vmatprep.subr.bf16.mxu1 %v1132_v2  ;;  %v267_v21 = vld [vmem:[%s1501_s8 + $0x68] sm:$0xff]  ;;  %v272_v24 = vpack.c.bf16 %v259_v19, %v258_v16  ;;  %v261_v27 = vld [vmem:[%s1501_s8 + $0x38] sm:$0xff]  ;;  %v268_v28 = vld [vmem:[%s1501_s8 + $0x70] sm:$0xff]  ;;  %986 = vst [vmem:[%s1528_s23 + $0x8] sm:$0xff] %v271_v22   ;;  %p1203_p8 = scmp.lt.s32.totalorder %s1575_s28, %s1201_s13  ;;  %p1204_p13 = scmp.lt.s32.totalorder %s1202_s24, %s1196_s25 }
  0x60   : > { %1033 = vmatprep.mubr.bf16.mxu1 %v274_v10  ;;  %v276_v25 = vpack.c.bf16 %v267_v21, %v266_v20  ;;  %v269_v29 = vld [vmem:[%s1501_s8 + $0x78] sm:$0xff]  ;;  %v273_v30 = vpack.c.bf16 %v261_v27, %v260_v26  ;;  %990 = vst [vmem:[%s1528_s23 + $0x28] sm:$0xff] %v275_v23   ;;  %p1199_p6 = pneg %p1198_p4 }
  0x61   : > { %v277_v31 = vpack.c.bf16 %v269_v29, %v268_v28  ;;  %987 = vst [vmem:[%s1528_s23 + $0x10] sm:$0xff] %v272_v24   ;;  %p1205_p3 = por %p1204_p13, %p1203_p8 }
  0x62   : > { %1014 = vmatpush3.bf16.msra.mxu0 %v1132_v2  ;;  %1051 = vmatpush3.bf16.msra.mxu1 %v1132_v2  ;;  %988 = vst [vmem:[%s1528_s23 + $0x18] sm:$0xff] %v273_v30   ;;  %991 = vst [vmem:[%s1528_s23 + $0x30] sm:$0xff] %v276_v25  }
  0x63   : > { %1015 = vmatprep.subr.bf16.mxu0 %v1133_v3  ;;  %1044 = vmatprep.subr.bf16.mxu1 %v1133_v3  ;;  %992 = vst [vmem:[%s1528_s23 + $0x38] sm:$0xff] %v277_v31   ;;  %p1206_p7 = pnand %p1205_p3, %p1199_p6 }
  0x66   : > { %1016 = vmatpush3.bf16.msra.mxu0 %v1133_v3  ;;  %1052 = vmatpush3.bf16.msra.mxu1 %v1133_v3 }
  0x67   : > { %1017 = vmatprep.subr.bf16.mxu0 %v1134_v9  ;;  %1045 = vmatprep.subr.bf16.mxu1 %v1134_v9 }
  0x6a   : > { %1018 = vmatpush3.bf16.msra.mxu0 %v1134_v9  ;;  %1053 = vmatpush3.bf16.msra.mxu1 %v1134_v9 }
  0x6b   : > { %1019 = vmatprep.subr.bf16.mxu0 %v1135_v11  ;;  %1046 = vmatprep.subr.bf16.mxu1 %v1135_v11 }
  0x6e   : > { %1020 = vmatpush3.bf16.msra.mxu0 %v1135_v11  ;;  %1054 = vmatpush3.bf16.msra.mxu1 %v1135_v11 }
  0x6f   : > { %1021 = vmatprep.subr.bf16.mxu0 %v1136_v12  ;;  %1047 = vmatprep.subr.bf16.mxu1 %v1136_v12 }
  0x72   : > { %1022 = vmatpush3.bf16.msra.mxu0 %v1136_v12  ;;  %1055 = vmatpush3.bf16.msra.mxu1 %v1136_v12 }
  0x73   : > { %1023 = vmatprep.subr.bf16.mxu0 %v1137_v13  ;;  %1048 = vmatprep.subr.bf16.mxu1 %v1137_v13 }
  0x76   : > { %1024 = vmatpush3.bf16.msra.mxu0 %v1137_v13  ;;  %1056 = vmatpush3.bf16.msra.mxu1 %v1137_v13 }
  0x79   : > { %1026 = vmatmul.mubr.bf16.vlgmr.msra.gmra.mrb[0].mxu0 %v271_v22  ;;  %1034 = vmatmul.mubr.bf16.vlgmr.msra.gmra.mrb[0].mxu1 %v275_v23 }
  0x7a   : > { %1029 = vmatprep.mubr.bf16.mxu0 %v272_v24  ;;  %1037 = vmatprep.mubr.bf16.mxu1 %v276_v25 }
  0x81   : > { %1030 = vmatmul.mubr.bf16.gmra.mrb[4].mxu0 %v273_v30  ;;  %1038 = vmatmul.mubr.bf16.gmra.mrb[4].mxu1 %v277_v31 }
 0x14c   : > { %v1027_v32 = vpop.f32.mrb[0].mxu0  ;;  %v1538_v33 = vpop.f32.mrb[0].mxu1 }
 0x14d   : > { %v376_v34 = vpop.f32.mrb[1].mxu0  ;;  %v1540_v35 = vpop.f32.mrb[1].mxu1  ;;  %v462_v47 = vmul.f32 %v1027_v32, %v1027_v32 }
 0x14e   : > { %v1028_v36 = vpop.f32.mrb[2].mxu0  ;;  %v1542_v37 = vpop.f32.mrb[2].mxu1  ;;  %v460_v42 = vmul.f32 %v376_v34, %v376_v34  ;;  %v468_v13 = vmul.f32 %v1540_v35, %v1540_v35 }
 0x14f   : > { %v907_v38 = vpack.c.bf16 %v1028_v36, %v1027_v32  ;;  %v379_v39 = vpop.f32.mrb[3].mxu0  ;;  %v927_v40 = vpack.c.bf16 %v1542_v37, %v1538_v33  ;;  %v1546_v41 = vpop.f32.mrb[3].mxu1  ;;  %v463_v50 = vmul.f32 %v1028_v36, %v1028_v36 }
 0x150   : > { %v439_v43 = vadd.f32 %v379_v39, %v376_v34  ;;  %v461_v44 = vmul.f32 %v379_v39, %v379_v39  ;;  %v902_v45 = vpack.c.bf16 %v379_v39, %v376_v34  ;;  %v922_v46 = vpack.c.bf16 %v1546_v41, %v1540_v35 }
 0x151   : > { %979 = vst [vmem:[%s1548_s10 + $0x8] sm:$0xff] %v907_v38   ;;  %983 = vst [vmem:[%s1548_s10 + $0x28] sm:$0xff] %v927_v40  }
 0x152   : > { %v440_v48 = vadd.f32 %v1027_v32, %v439_v43  ;;  %v476_v49 = vadd.f32 %v461_v44, %v460_v42  ;;  %903 = vst [vmem:[%s1548_s10] sm:$0xff] %v902_v45   ;;  %982 = vst [vmem:[%s1548_s10 + $0x20] sm:$0xff] %v922_v46  }
 0x154   : > { %v477_v51 = vadd.f32 %v476_v49, %v462_v47  ;;  %v1031_v52 = vpop.f32.mrb[4].mxu0  ;;  %v441_v53 = vadd.f32 %v1028_v36, %v440_v48  ;;  %v1556_v54 = vpop.f32.mrb[4].mxu1 }
 0x155   : > { %v392_v55 = vpop.f32.mrb[5].mxu0  ;;  %v1559_v56 = vpop.f32.mrb[5].mxu1  ;;  %v466_v7 = vmul.f32 %v1031_v52, %v1031_v52 }
 0x156   : > { %v442_v57 = vadd.f32 %v441_v53, %v392_v55  ;;  %v464_v58 = vmul.f32 %v392_v55, %v392_v55  ;;  %v478_v59 = vadd.f32 %v477_v51, %v463_v50  ;;  %v1032_v60 = vpop.f32.mrb[6].mxu0  ;;  %v1562_v61 = vpop.f32.mrb[6].mxu1 }
 0x157   : > { %v917_v62 = vpack.c.bf16 %v1032_v60, %v1031_v52  ;;  %v395_v63 = vpop.f32.mrb[7].mxu0  ;;  %v937_v0 = vpack.c.bf16 %v1562_v61, %v1556_v54  ;;  %v1566_v1 = vpop.f32.mrb[7].mxu1  ;;  %v467_v10 = vmul.f32 %v1032_v60, %v1032_v60 }
 0x158   : > { %v479_v2 = vadd.f32 %v478_v59, %v464_v58  ;;  %v443_v3 = vadd.f32 %v442_v57, %v395_v63  ;;  %v465_v4 = vmul.f32 %v395_v63, %v395_v63  ;;  %v912_v5 = vpack.c.bf16 %v395_v63, %v392_v55 }
 0x159   : > { %981 = vst [vmem:[%s1548_s10 + $0x18] sm:$0xff] %v917_v62   ;;  %985 = vst [vmem:[%s1548_s10 + $0x38] sm:$0xff] %v937_v0   ;;  %v932_v6 = vpack.c.bf16 %v1566_v1, %v1559_v56 }
 0x15a   : > { %v444_v8 = vadd.f32 %v1031_v52, %v443_v3  ;;  %v480_v9 = vadd.f32 %v479_v2, %v465_v4  ;;  %980 = vst [vmem:[%s1548_s10 + $0x10] sm:$0xff] %v912_v5  }
 0x15b   : > { %984 = vst [vmem:[%s1548_s10 + $0x30] sm:$0xff] %v932_v6  }
 0x15c   : > { %v481_v11 = vadd.f32 %v480_v9, %v466_v7  ;;  %v445_v12 = vadd.f32 %v1032_v60, %v444_v8 }
 0x15d   : > { %1209 = shalt.err (!%p1206_p7)
}
 0x15e   : > { %s1210_s7 = scalar_lea.hbm %s1573_s26, 1024  ;;  %s1214_s10 = scalar_lea.hbm %s1724_s2, 4096 }
 0x15f   : > { %p1211_p9 = scmp.ne.s32.totalorder %s1573_s26, %s1210_s7  ;;  %p1215_p5 = scmp.lt.u32.totalorder %s1573_s26, %s1724_s2 }
 0x160   : > { %p1216_p10 = scmp.lt.u32.totalorder %s1214_s10, %s1210_s7  ;;  %p1218_p1 = scmp.lt.u32.totalorder %s1210_s7, %s1573_s26 }
 0x161   : > { %p1212_p11 = pnand %p1211_p9, %p1449_p12 }
 0x162   : > { %p1217_p2 = por %p1216_p10, %p1215_p5 }
 0x163   : > { %p1213_p0 = pneg %p1212_p11 }
 0x164   : > { %p1219_p4 = por %p1218_p1, %p1217_p2 }
 0x166   : > { %p1220_p6 = pnand %p1219_p4, %p1213_p0 }
 0x168   : > { %1223 = shalt.err (!%p1220_p6)
}
 0x169   : > { %s1335_s25 = smov 64   ;;  %s1336_s12 = smov 4   ;;  %v446_v14 = vadd.f32 %v445_v12, %v1540_v35  ;;  %v482_v15 = vadd.f32 %v481_v11, %v467_v10  ;;  %v469_v18 = vmul.f32 %v1546_v41, %v1546_v41  ;;  %v470_v19 = vmul.f32 %v1538_v33, %v1538_v33 }
 0x16a   : > { %1063 = dma.vmem_to_hbm [thread:$0]  (%p1449_p12), %s1575_s28, 1024, %s1573_s26, %s629_s9, %s1335_s25, %s1335_s25, %s1336_s12   ;;  %v471_v22 = vmul.f32 %v1542_v37, %v1542_v37  ;;  %v472_v25 = vmul.f32 %v1559_v56, %v1559_v56  ;;  %v473_v30 = vmul.f32 %v1566_v1, %v1566_v1  ;;  %v474_v31 = vmul.f32 %v1556_v54, %v1556_v54 }
 0x16b   : > { %v483_v16 = vadd.f32 %v482_v15, %v468_v13  ;;  %v447_v17 = vadd.f32 %v446_v14, %v1546_v41  ;;  %v475_v34 = vmul.f32 %v1562_v61, %v1562_v61  ;;  %s839_s28 = sshll.u32 %s1497_s14, 1  ;;  %s633_s26 = sand.u32 1, %s1385_s19   ;;  %vm497_vm0 = vcmask 1040384  }
 0x16c   : > { %s871_s9 = sshll.u32 %s1385_s19, 5  ;;  %s242_s13 = scalar_lea.vmem [#allocation8], %s839_s28 }
 0x16d   : > { %v448_v20 = vadd.f32 %v1538_v33, %v447_v17  ;;  %v484_v21 = vadd.f32 %v483_v16, %v469_v18  ;;  %s669_s24 = sshll.u32 %s242_s13, 4  ;;  %s683_s7 = sshll.u32 %s1528_s23, 4  ;;  %s1643_s24 = int_to_ptr.vmem [resolvable:$true] %s669_s24  ;;  %s1645_s7 = int_to_ptr.vmem [resolvable:$true] %s683_s7 }
 0x16e   : > { %s1641_s10 = scalar_lea.hbm %s1725_s3, %s871_s9  ;;  %s1652_s23 = scalar_lea.hbm %s1726_s4, %s896_s29 }
 0x16f   : > { %v485_v23 = vadd.f32 %v484_v21, %v470_v19  ;;  %v449_v24 = vadd.f32 %v1542_v37, %v448_v20  ;;  %s1654_s6 = scalar_lea.sflag [#allocation9], %s633_s26  ;;  %s1224_s28 = scalar_lea.vmem %s1643_s24, 32 }
 0x170   : > { %p1225_p8 = scmp.ne.s32.totalorder %s1643_s24, %s1224_s28  ;;  %s1337_s9 = smov [#allocation8]  }
 0x171   : > { %v450_v26 = vadd.f32 %v449_v24, %v1559_v56  ;;  %v486_v27 = vadd.f32 %v485_v23, %v471_v22  ;;  %s1228_s8 = sshll.u32 %s1337_s9, 4  ;;  %s1229_s8 = int_to_ptr.vmem [resolvable:$false] %s1228_s8 }
 0x172   : > { %p1226_p13 = pnand %p1225_p8, %p1449_p12  ;;  %s1230_s21 = scalar_lea.vmem %s1229_s8, 64 }
 0x173   : > { %v487_v28 = vadd.f32 %v486_v27, %v472_v25  ;;  %v451_v29 = vadd.f32 %v450_v26, %v1566_v1  ;;  %p1231_p7 = scmp.lt.s32.totalorder %s1643_s24, %s1229_s8  ;;  %p1232_p9 = scmp.lt.s32.totalorder %s1230_s21, %s1224_s28 }
 0x174   : > { %p1227_p3 = pneg %p1226_p13 }
 0x175   : > { %v452_v32 = vadd.f32 %v1556_v54, %v451_v29  ;;  %v488_v33 = vadd.f32 %v487_v28, %v473_v30  ;;  %p1233_p11 = por %p1232_p9, %p1231_p7 }
 0x177   : > { %v453_v35 = vadd.f32 %v1562_v61, %v452_v32  ;;  %v489_v36 = vadd.f32 %v488_v33, %v474_v31  ;;  %p1234_p0 = pnand %p1233_p11, %p1227_p3 }
 0x179   : > { %v454_v37 = vrot.slane %v453_v35, 4  ;;  %v490_v38 = vadd.f32 %v489_v36, %v475_v34 }
 0x17b   : > { %v455_v39 = vadd.f32 %v454_v37, %v453_v35  ;;  %v491_v40 = vrot.slane %v490_v38, 4 }
 0x17d   : > { %v456_v41 = vrot.slane %v455_v39, 2  ;;  %v492_v42 = vadd.f32 %v491_v40, %v490_v38 }
 0x17f   : > { %v457_v43 = vadd.f32 %v456_v41, %v455_v39  ;;  %v493_v44 = vrot.slane %v492_v42, 2 }
 0x181   : > { %v458_v45 = vrot.slane %v457_v43, 1  ;;  %v494_v46 = vadd.f32 %v493_v44, %v492_v42 }
 0x183   : > { %v495_v47 = vrot.slane %v494_v46, 1  ;;  %v459_v48 = vadd.f32 %v458_v45, %v457_v43 }
 0x185   : > { %v496_v49 = vadd.f32 %v495_v47, %v494_v46 }
 0x187   : > { %v498_v50 = vsel %vm497_vm0, %v459_v48, %v496_v49 }
 0x188   : > { %499 = vst [vmem:[%s242_s13] sm:$0x3] %v498_v50 }
 0x189   : > { %1237 = shalt.err (!%p1234_p0)
}
 0x18a   : > { %s1238_s19 = scalar_lea.hbm %s1641_s10, 32  ;;  %s1242_s13 = scalar_lea.hbm %s1725_s3, 128 }
 0x18b   : > { %p1239_p5 = scmp.ne.s32.totalorder %s1641_s10, %s1238_s19  ;;  %p1243_p1 = scmp.lt.u32.totalorder %s1641_s10, %s1725_s3 }
 0x18c   : > { %p1244_p4 = scmp.lt.u32.totalorder %s1242_s13, %s1238_s19  ;;  %p1246_p8 = scmp.lt.u32.totalorder %s1238_s19, %s1641_s10 }
 0x18d   : > { %p1240_p10 = pnand %p1239_p5, %p1449_p12 }
 0x18e   : > { %p1245_p6 = por %p1244_p4, %p1243_p1 }
 0x18f   : > { %p1241_p2 = pneg %p1240_p10 }
 0x190   : > { %p1247_p13 = por %p1246_p8, %p1245_p6 }
 0x192   : > { %p1248_p3 = pnand %p1247_p13, %p1241_p2 }
 0x194   : > { %1251 = shalt.err (!%p1248_p3)
}
 0x195   : > { %1064 = dma.vmem_to_hbm [thread:$0]  (%p1449_p12), %s1643_s24, 32, %s1641_s10, %s1654_s6  }
 0x196   : > { %s1252_s28 = scalar_lea.vmem %s1645_s7, 1024  ;;  %s1338_s9 = smov [#allocation10]  }
 0x197   : > { %p1253_p7 = scmp.ne.s32.totalorder %s1645_s7, %s1252_s28  ;;  %s1256_s8 = sshll.u32 %s1338_s9, 4  ;;  %s1257_s8 = int_to_ptr.vmem [resolvable:$false] %s1256_s8 }
 0x198   : > { %s1258_s21 = scalar_lea.vmem %s1257_s8, 2048  ;;  %p1259_p0 = scmp.lt.s32.totalorder %s1645_s7, %s1257_s8 }
 0x199   : > { %p1254_p9 = pnand %p1253_p7, %p1449_p12  ;;  %p1260_p5 = scmp.lt.s32.totalorder %s1258_s21, %s1252_s28 }
 0x19b   : > { %p1255_p11 = pneg %p1254_p9  ;;  %p1261_p10 = por %p1260_p5, %p1259_p0 }
 0x19d   : > { %p1262_p2 = pnand %p1261_p10, %p1255_p11 }
 0x19f   : > { %1265 = shalt.err (!%p1262_p2)
}
 0x1a0   : > { %s1266_s24 = scalar_lea.hbm %s1652_s23, 1024  ;;  %s1270_s29 = scalar_lea.hbm %s1726_s4, 4096 }
 0x1a1   : > { %p1267_p1 = scmp.ne.s32.totalorder %s1652_s23, %s1266_s24  ;;  %p1271_p8 = scmp.lt.u32.totalorder %s1652_s23, %s1726_s4 }
 0x1a2   : > { %p1272_p13 = scmp.lt.u32.totalorder %s1270_s29, %s1266_s24  ;;  %p1274_p7 = scmp.lt.u32.totalorder %s1266_s24, %s1652_s23 }
 0x1a3   : > { %p1268_p4 = pnand %p1267_p1, %p1449_p12 }
 0x1a4   : > { %p1273_p3 = por %p1272_p13, %p1271_p8 }
 0x1a5   : > { %p1269_p6 = pneg %p1268_p4 }
 0x1a6   : > { %p1275_p9 = por %p1274_p7, %p1273_p3 }
 0x1a8   : > { %p1276_p11 = pnand %p1275_p9, %p1269_p6 }
 0x1aa   : > { %1279 = shalt.err (!%p1276_p11)
}
 0x1ab   : > { %1065 = dma.vmem_to_hbm [thread:$0]  (%p1449_p12), %s1645_s7, 1024, %s1652_s23, %s1654_s6, %s1335_s25, %s1335_s25, %s1336_s12  }
 0x1ac PF: > { %p1090_p0 = scmp.ge.s32.totalorder %s1326_s18, 2  ;;  %s698_s14 = sand.u32 1, %s1314_s15  }
 0x1ad   : > { %p1741_p5 = scmp.ne.s32.totalorder %s1731_s22, 0  ;;  %s699_s11 = scalar_lea.sflag [#allocation4], %s698_s14 }
 0x1af   : > { %p1078_p10 = pnand %p1090_p0, %p1741_p5 }
 0x1b1   : > { %1305 = dma.done.wait (!%p1078_p10), %s699_s11, 1024  }
 0x1b2   : > { %1307 = vsyncadd (!%p1078_p10), %s699_s11, 4294966272  ;;  %s707_s5 = sand.u32 1, %s827_s20  }
 0x1b3   : > { %s708_s28 = scalar_lea.sflag [#allocation9], %s707_s5 }
 0x1b4   : > { %1309 = dma.done.wait (!%p1078_p10), %s708_s28, 1056  }
 0x1b5   : > { %1311 = vsyncadd (!%p1078_p10), %s708_s28, 4294966240  ;;  %p22_p12 = scmp.ge.s32.totalorder %s1419_s27, 6   ;;  %s1742_s15 = smov %s1318_s16 }
 0x1b6   : > { %s1743_s16 = smov %s1322_s17  ;;  %s1744_s17 = smov %s1445_s30 }
 0x1b7   : > { %s1745_s18 = smov %s1419_s27  ;;  %24 = sbr.rel (!%p22_p12) target bundleno = 8 (0x8), region = 109 }
 0x1be   :  { %722 = vsyncpa [#allocation3], 1 }
 0x1bf   :  { %724 = vsyncpa [#allocation3 + $0x1], 1 }
 0x1c0   :  { %725 = vsyncpa [#allocation6], 1 }
 0x1c1   :  { %726 = vsyncpa [#allocation4], 1 }
 0x1c2   :  { %728 = vsyncpa [#allocation4 + $0x1], 1 }
 0x1c3   :  { %729 = vsyncpa [#allocation9], 1 }
 0x1c4   :  { %731 = vsyncpa [#allocation9 + $0x1], 1 }

// kernel: bottleneck_forward.7
= control target key start
LH: loop header
LB: loop body
LE: loop exit
PB: predicated region body
PF: predicated region fallthrough
CT: control target
= control target key end

     0   :  { %s1676_s0 = inlined_call_operand.hbm [shape: bf16[8,8,8,128], index: 0, kind: input, shape index: {}]   ;;  %s1677_s1 = inlined_call_operand.hbm [shape: bf16[8,8,8,128], index: 1, kind: input, shape index: {}]   ;;  %s1678_s2 = inlined_call_operand.hbm [shape: f32[1,128], index: 2, kind: input, shape index: {}]   ;;  %s1679_s3 = inlined_call_operand.hbm [shape: f32[1,128], index: 3, kind: input, shape index: {}]   ;;  %s1680_s4 = inlined_call_operand.hbm [shape: f32[1,128], index: 4, kind: input, shape index: {}]   ;;  %s1681_s5 = inlined_call_operand.hbm [shape: f32[1,128], index: 5, kind: input, shape index: {}]   ;;  %s1682_s6 = inlined_call_operand.hbm [shape: f32[8,8,8,128], index: 6, kind: output, shape index: {}]  }
   0x1   :  { %1686 = sst [smem:[#allocation20_spill]] %s1676_s0 }
   0x2   :  { %1687 = sst [smem:[#allocation21_spill]] %s1678_s2 }
   0x3   :  { %1688 = sst [smem:[#allocation22_spill]] %s1679_s3 }
   0x4   :  { %11 = vsyncpa [#allocation3], 0 }
   0x5   :  { %13 = vsyncpa [#allocation3 + $0x1], 0 }
   0x6   :  { %14 = vsyncpa [#allocation6], 0 }
   0x7   :  { %16 = vsyncpa [#allocation6 + $0x1], 0 }
   0x8   :  { %17 = vsyncpa [#allocation9], 0 }
   0x9   :  { %18 = vsyncpa [#allocation12], 0 }
   0xa   :  { %19 = vsyncpa [#allocation4], 0 }
   0xb   :  { %21 = vsyncpa [#allocation4 + $0x1], 0  ;;  %s1233_s21 = smov 0   ;;  %s1235_s22 = smov 0  }
   0xc   :  { %s1237_s23 = smov 0   ;;  %s1239_s24 = smov 0  }
   0xd LB: > { %s1254_s25 = sadd.s32 4294967295, %s1185_s24   ;;  %s718_s26 = sadd.s32 4294967294, %s1185_s24   ;;  %s1185_s24 = sphi %s1239_s24, %s1712_s24   ;;  %s1181_s23 = sphi %s1237_s23, %s1711_s23   ;;  %s1177_s22 = sphi %s1235_s22, %s1710_s22   ;;  %s1173_s21 = sphi %s1233_s21, %s1709_s21  }
   0xe   : > { %p47_p0 = scmp.ne.s32.totalorder %s1177_s22, %s1173_s21  ;;  %p1683_p1 = scmp.eq.s32.totalorder %s1254_s25, 0 }
   0xf   : > { %p187_p3 = scmp.eq.s32.totalorder %s718_s26, 3  ;;  %p719_p5 = scmp.ge.s32.totalorder %s1185_s24, 1 }
  0x10   : > { %p1263_p4 = por %p1683_p1, %p47_p0  ;;  %p194_p7 = scmp.lt.s32.totalorder %s1185_s24, 5 }
  0x11   : > { %p1268_p6 = por %p187_p3, %p47_p0  ;;  %s1187_s30 = smov [#allocation7]  }
  0x12   : > { %s1689_s27 = scalar_select %p1263_p4, 1, 0 }
  0x13   : > { %s1690_s28 = scalar_select %p1268_p6, 1, 0 }
  0x14   : > { %p1273_p8 = pnand %p719_p5, %p194_p7  ;;  %s207_s7 = sshll.u32 %s1187_s30, 4  ;;  %s208_s7 = int_to_ptr.vmem [resolvable:$true] %s207_s7 }
  0x15   : > { %s1188_s8 = smov [#allocation8]   ;;  %s1189_s11 = smov [#allocation10]  }
  0x16   : > { %s1691_s29 = scalar_select %p1273_p8, 1, 0 }
  0x17   : > { %p857_p9 = pneg %p1273_p8  ;;  %s218_s9 = sshll.u32 %s1188_s8, 4  ;;  %s1285_s9 = int_to_ptr.vmem [resolvable:$true] %s218_s9 }
  0x18   : > { %s229_s12 = sshll.u32 %s1189_s11, 4  ;;  %s1693_s2 = sld [smem:[#allocation21_spill]]  ;;  %s1287_s12 = int_to_ptr.vmem [resolvable:$true] %s229_s12 }
  0x19   : > { %p1281_p10 = pnand %p857_p9, %p1683_p1 }
  0x1b   : > { %p1297_p12 = pneg %p1281_p10 }
  0x1e   : > { %s931_s15 = scalar_lea.hbm %s1693_s2, 16 }
  0x1f   : > { %p932_p11 = scmp.ne.s32.totalorder %s1693_s2, %s931_s15  ;;  %p938_p3 = scmp.lt.u32.totalorder %s931_s15, %s1693_s2 }
  0x21   : > { %p934_p13 = pnand %p1297_p12, %p932_p11 }
  0x23   : > { %p935_p0 = pneg %p934_p13 }
  0x25   : > { %p940_p5 = pnand %p938_p3, %p935_p0 }
  0x27   : > { %943 = shalt.err (!%p940_p5)
}
  0x28   : > { %s944_s26 = scalar_lea.vmem %s208_s7, 16  ;;  %s951_s30 = scalar_lea.vmem %s208_s7, 32 }
  0x29   : > { %p945_p7 = scmp.ne.s32.totalorder %s208_s7, %s944_s26  ;;  %p952_p2 = scmp.lt.s32.totalorder %s208_s7, %s208_s7 }
  0x2a   : > { %p953_p6 = scmp.lt.s32.totalorder %s951_s30, %s944_s26 }
  0x2b   : > { %p947_p9 = pnand %p945_p7, %p1297_p12 }
  0x2c   : > { %p954_p4 = por %p953_p6, %p952_p2 }
  0x2d   : > { %p948_p1 = pneg %p947_p9 }
  0x2f   : > { %p955_p8 = pnand %p954_p4, %p948_p1 }
  0x31   : > { %958 = shalt.err (!%p955_p8)
}
  0x32   : > { %860 = dma.hbm_to_vmem [thread:$0]  (!%p1281_p10), %s1693_s2, 16, %s208_s7, [#allocation6]  }
  0x33   : > { %s1695_s3 = sld [smem:[#allocation22_spill]] }
  0x39   : > { %s959_s15 = scalar_lea.hbm %s1695_s3, 16 }
  0x3a   : > { %p960_p11 = scmp.ne.s32.totalorder %s1695_s3, %s959_s15  ;;  %p966_p1 = scmp.lt.u32.totalorder %s959_s15, %s1695_s3 }
  0x3c   : > { %p962_p13 = pnand %p960_p11, %p1297_p12 }
  0x3e   : > { %p963_p2 = pneg %p962_p13 }
  0x40   : > { %p968_p4 = pnand %p966_p1, %p963_p2 }
  0x42   : > { %971 = shalt.err (!%p968_p4)
}
  0x43   : > { %s972_s7 = scalar_lea.vmem %s1285_s9, 16  ;;  %s979_s26 = scalar_lea.vmem %s1285_s9, 32 }
  0x44   : > { %p973_p6 = scmp.ne.s32.totalorder %s1285_s9, %s972_s7  ;;  %p980_p3 = scmp.lt.s32.totalorder %s1285_s9, %s1285_s9 }
  0x45   : > { %p981_p5 = scmp.lt.s32.totalorder %s979_s26, %s972_s7 }
  0x46   : > { %p975_p8 = pnand %p973_p6, %p1297_p12 }
  0x47   : > { %p982_p7 = por %p981_p5, %p980_p3 }
  0x48   : > { %p976_p0 = pneg %p975_p8 }
  0x4a   : > { %p983_p9 = pnand %p982_p7, %p976_p0 }
  0x4c   : > { %986 = shalt.err (!%p983_p9)
}
  0x4d   : > { %863 = dma.hbm_to_vmem [thread:$0]  (!%p1281_p10), %s1695_s3, 16, %s1285_s9, [#allocation9]  }
  0x4e   : > { %s987_s14 = scalar_lea.hbm %s1680_s4, 16 }
  0x4f   : > { %p988_p11 = scmp.ne.s32.totalorder %s1680_s4, %s987_s14  ;;  %p994_p1 = scmp.lt.u32.totalorder %s987_s14, %s1680_s4 }
  0x51   : > { %p990_p13 = pnand %p988_p11, %p1297_p12 }
  0x53   : > { %p991_p2 = pneg %p990_p13 }
  0x55   : > { %p996_p4 = pnand %p994_p1, %p991_p2 }
  0x57   : > { %999 = shalt.err (!%p996_p4)
}
  0x58   : > { %s1000_s9 = scalar_lea.vmem %s1287_s12, 16  ;;  %s1007_s20 = scalar_lea.vmem %s1287_s12, 32 }
  0x59   : > { %p1001_p6 = scmp.ne.s32.totalorder %s1287_s12, %s1000_s9  ;;  %p1008_p3 = scmp.lt.s32.totalorder %s1287_s12, %s1287_s12 }
  0x5a   : > { %p1009_p5 = scmp.lt.s32.totalorder %s1007_s20, %s1000_s9 }
  0x5b   : > { %p1003_p8 = pnand %p1001_p6, %p1297_p12 }
  0x5c   : > { %p1010_p7 = por %p1009_p5, %p1008_p3 }
  0x5d   : > { %p1004_p0 = pneg %p1003_p8 }
  0x5f   : > { %p1011_p9 = pnand %p1010_p7, %p1004_p0 }
  0x61   : > { %1014 = shalt.err (!%p1011_p9)
}
  0x62   : > { %866 = dma.hbm_to_vmem [thread:$0]  (!%p1281_p10), %s1680_s4, 16, %s1287_s12, [#allocation9]  }
  0x63   : > { %s1190_s30 = smov [#allocation11]   ;;  %s1015_s14 = scalar_lea.hbm %s1681_s5, 16 }
  0x64   : > { %s240_s8 = sshll.u32 %s1190_s30, 4  ;;  %p1016_p11 = scmp.ne.s32.totalorder %s1681_s5, %s1015_s14  ;;  %s241_s8 = int_to_ptr.vmem [resolvable:$true] %s240_s8 }
  0x65   : > { %p1022_p1 = scmp.lt.u32.totalorder %s1015_s14, %s1681_s5 }
  0x66   : > { %p1018_p13 = pnand %p1016_p11, %p1297_p12 }
  0x68   : > { %p1019_p2 = pneg %p1018_p13 }
  0x6a   : > { %p1024_p4 = pnand %p1022_p1, %p1019_p2 }
  0x6c   : > { %1027 = shalt.err (!%p1024_p4)
}
  0x6d   : > { %s1028_s12 = scalar_lea.vmem %s241_s8, 16  ;;  %s1035_s9 = scalar_lea.vmem %s241_s8, 32 }
  0x6e   : > { %p1029_p6 = scmp.ne.s32.totalorder %s241_s8, %s1028_s12  ;;  %p1036_p3 = scmp.lt.s32.totalorder %s241_s8, %s241_s8 }
  0x6f   : > { %p1037_p5 = scmp.lt.s32.totalorder %s1035_s9, %s1028_s12 }
  0x70   : > { %p1031_p8 = pnand %p1029_p6, %p1297_p12 }
  0x71   : > { %p1038_p7 = por %p1037_p5, %p1036_p3 }
  0x72   : > { %p1032_p0 = pneg %p1031_p8 }
  0x74   : > { %p1039_p9 = pnand %p1038_p7, %p1032_p0 }
  0x76   : > { %1042 = shalt.err (!%p1039_p9)
}
  0x77   : > { %869 = dma.hbm_to_vmem [thread:$0]  (!%p1281_p10), %s1681_s5, 16, %s241_s8, [#allocation12]  }
  0x78   : > { %s1380_s18 = sadd.s32 1, %s1185_s24   ;;  %s34_s10 = sadd.s32 1, %s1181_s23 }
  0x79   : > { %s31_s26 = ssub.s32 %s1185_s24, %s1380_s18  ;;  %p41_p12 = scmp.ne.s32.totalorder %s1181_s23, %s1177_s22 }
  0x7a   : > { %p32_p11 = scmp.eq.s32.totalorder %s31_s26, 0  ;;  %p42_p13 = scmp.eq.s32.totalorder %s1185_s24, 0 }
  0x7b   : > { %p1696_p2 = scmp.eq.s32.totalorder %s1254_s25, 3  ;;  %p885_p4 = scmp.lt.s32.totalorder %s1185_s24, 4 }
  0x7c   : > { %s1396_s11 = scalar_select %p32_p11, %s1181_s23, %s34_s10  }
  0x7d   : > { %p1390_p1 = por %p1696_p2, %p41_p12  ;;  %p43_p6 = por %p42_p13, %p41_p12 }
  0x7e   : > { %s251_s13 = sand.u32 1, %s1181_s23   ;;  %s752_s8 = sshll.u32 %s1185_s24, 10 }
  0x7f   : > { %s1399_s14 = sshll.u32 %s251_s13, 6  ;;  %s1698_s0 = sld [smem:[#allocation20_spill]] }
  0x80   : > { %s255_s19 = scalar_lea.vmem [#allocation2], %s1399_s14  ;;  %p1412_p10 = pnand %p885_p4, %p43_p6 }
  0x81   : > { %s263_s12 = sshll.u32 %s255_s19, 4  ;;  %s1416_s20 = scalar_lea.sflag [#allocation3], %s251_s13  ;;  %s1410_s12 = int_to_ptr.vmem [resolvable:$true] %s263_s12 }
  0x82   : > { %p1045_p0 = pneg %p1412_p10 }
  0x85   : > { %s1407_s17 = scalar_lea.hbm %s1698_s0, %s752_s8  ;;  %s1048_s15 = scalar_lea.hbm %s1698_s0, 4096 }
  0x86   : > { %s1043_s7 = scalar_lea.hbm %s1407_s17, 1024  ;;  %p1049_p7 = scmp.lt.u32.totalorder %s1407_s17, %s1698_s0 }
  0x87   : > { %p1044_p8 = scmp.ne.s32.totalorder %s1407_s17, %s1043_s7  ;;  %p1050_p9 = scmp.lt.u32.totalorder %s1048_s15, %s1043_s7 }
  0x88   : > { %p1052_p11 = scmp.lt.u32.totalorder %s1043_s7, %s1407_s17 }
  0x89   : > { %p1046_p3 = pnand %p1045_p0, %p1044_p8  ;;  %p1051_p12 = por %p1050_p9, %p1049_p7 }
  0x8b   : > { %p1047_p5 = pneg %p1046_p3  ;;  %p1053_p13 = por %p1052_p11, %p1051_p12 }
  0x8d   : > { %p1054_p2 = pnand %p1053_p13, %p1047_p5 }
  0x8f   : > { %1057 = shalt.err (!%p1054_p2)
}
  0x90   : > { %s1058_s13 = scalar_lea.vmem %s1410_s12, 1024  ;;  %s1191_s10 = smov [#allocation2]  }
  0x91   : > { %p1059_p4 = scmp.ne.s32.totalorder %s1410_s12, %s1058_s13  ;;  %s1063_s26 = sshll.u32 %s1191_s10, 4  ;;  %s1064_s26 = int_to_ptr.vmem [resolvable:$false] %s1063_s26 }
  0x92   : > { %s1065_s16 = scalar_lea.vmem %s1064_s26, 2048  ;;  %p1066_p3 = scmp.lt.s32.totalorder %s1410_s12, %s1064_s26 }
  0x93   : > { %p1061_p6 = pnand %p1059_p4, %p1045_p0  ;;  %p1067_p7 = scmp.lt.s32.totalorder %s1065_s16, %s1058_s13 }
  0x95   : > { %p1062_p8 = pneg %p1061_p6  ;;  %p1068_p9 = por %p1067_p7, %p1066_p3 }
  0x97   : > { %p1069_p12 = pnand %p1068_p9, %p1062_p8 }
  0x99   : > { %1072 = shalt.err (!%p1069_p12)
}
  0x9a   : > { %s1192_s7 = smov 64   ;;  %s1193_s15 = smov 4  }
  0x9b   : > { %873 = dma.hbm_to_vmem [thread:$0]  (!%p1412_p10), %s1407_s17, 1024, %s1410_s12, %s1416_s20, %s1192_s7, %s1192_s7, %s1193_s15  }
  0x9c   : > { %s1452_s10 = scalar_lea.hbm %s1677_s1, %s752_s8  ;;  %s277_s26 = scalar_lea.vmem [#allocation5], %s1399_s14 }
  0x9d   : > { %s285_s16 = sshll.u32 %s277_s26, 4  ;;  %s273_s0 = sand.u32 1, %s1185_s24   ;;  %s1455_s16 = int_to_ptr.vmem [resolvable:$true] %s285_s16 }
  0x9e   : > { %s1458_s2 = scalar_lea.sflag [#allocation6], %s273_s0  ;;  %s1073_s3 = scalar_lea.hbm %s1452_s10, 1024 }
  0x9f   : > { %p1074_p5 = scmp.ne.s32.totalorder %s1452_s10, %s1073_s3  ;;  %s1078_s12 = scalar_lea.hbm %s1677_s1, 4096 }
  0xa0   : > { %p1079_p2 = scmp.lt.u32.totalorder %s1452_s10, %s1677_s1  ;;  %p1080_p4 = scmp.lt.u32.totalorder %s1078_s12, %s1073_s3 }
  0xa1   : > { %p1076_p11 = pnand %p1074_p5, %p1045_p0  ;;  %p1082_p8 = scmp.lt.u32.totalorder %s1073_s3, %s1452_s10 }
  0xa2   : > { %p1081_p6 = por %p1080_p4, %p1079_p2 }
  0xa3   : > { %p1077_p13 = pneg %p1076_p11 }
  0xa4   : > { %p1083_p3 = por %p1082_p8, %p1081_p6 }
  0xa6   : > { %p1084_p7 = pnand %p1083_p3, %p1077_p13 }
  0xa8   : > { %1087 = shalt.err (!%p1084_p7)
}
  0xa9   : > { %s1088_s0 = scalar_lea.vmem %s1455_s16, 1024  ;;  %s1194_s14 = smov [#allocation5]  }
  0xaa   : > { %p1089_p9 = scmp.ne.s32.totalorder %s1455_s16, %s1088_s0  ;;  %s1093_s13 = sshll.u32 %s1194_s14, 4  ;;  %s1094_s13 = int_to_ptr.vmem [resolvable:$false] %s1093_s13 }
  0xab   : > { %s1095_s26 = scalar_lea.vmem %s1094_s13, 2048  ;;  %p1096_p11 = scmp.lt.s32.totalorder %s1455_s16, %s1094_s13 }
  0xac   : > { %p1091_p12 = pnand %p1089_p9, %p1045_p0  ;;  %p1097_p2 = scmp.lt.s32.totalorder %s1095_s26, %s1088_s0 }
  0xae   : > { %p1092_p5 = pneg %p1091_p12  ;;  %p1098_p4 = por %p1097_p2, %p1096_p11 }
  0xb0   : > { %p1099_p6 = pnand %p1098_p4, %p1092_p5 }
  0xb2   : > { %1102 = shalt.err (!%p1099_p6)
}
  0xb3   : > { %876 = dma.hbm_to_vmem [thread:$0]  (!%p1412_p10), %s1452_s10, 1024, %s1455_s16, %s1458_s2, %s1192_s7, %s1192_s7, %s1193_s15  }
  0xb4   : > { %p1700_p0 = scmp.ne.s32.totalorder %s1691_s29, 0 }
  0xb5   : > { %s1490_s3 = sand.u32 (!%p1700_p0), 1, %s1177_s22   ;;  %p1701_p13 = scmp.ne.s32.totalorder (!%p1700_p0), %s1689_s27, 0 }
  0xb6   : > { %297 = sbr.rel (%p1700_p0) target bundleno = 257 (0x101), region = 44  ;;  %s734_s17 = sshll.u32 (!%p1700_p0), %s1490_s3, 6 }
  0xb7   : > { %s300_s8 = scalar_lea.sflag (!%p1700_p0), [#allocation3], %s1490_s3  ;;  %s1494_s12 = scalar_lea.vmem (!%p1700_p0), [#allocation2], %s734_s17 }
  0xbd   : > { %1148 = dma.done.wait (%p1701_p13), %s300_s8, 1024  }
  0xbe   : > { %1150 = vsyncadd (%p1701_p13), %s300_s8, 4294966272  ;;  %s308_s2 = sand.u32 1, %s1254_s25   ;;  %s1501_s9 = scalar_lea.vmem [#allocation5], %s734_s17 }
  0xbf   : > { %s309_s29 = scalar_lea.sflag [#allocation6], %s308_s2 }
  0xc0   : > { %1152 = dma.done.wait (%p1701_p13), %s309_s29, 1024  }
  0xc1   : > { %1154 = vsyncadd (%p1701_p13), %s309_s29, 4294966272  ;;  %p1702_p10 = scmp.eq.s32.totalorder %s1254_s25, 0 }
  0xc3   : > { %1156 = dma.done.wait (%p1702_p10), [#allocation6], 16   ;;  %p1703_p8 = pmov %p1702_p10 }
  0xc5   : > { %1158 = vsyncadd (%p1703_p8), [#allocation6], 4294967280  ;;  %p1704_p3 = pmov %p1703_p8 }
  0xc7   : > { %1160 = dma.done.wait (%p1704_p3), [#allocation9], 32   ;;  %p1705_p7 = pmov %p1704_p3 }
  0xc8   : > { %p1706_p9 = pmov %p1704_p3 }
  0xc9   : > { %1162 = vsyncadd (%p1705_p7), [#allocation9], 4294967264 }
  0xca   : > { %1164 = dma.done.wait (%p1706_p9), [#allocation12], 16   ;;  %p1707_p12 = pmov %p1704_p3 }
  0xcb   : > { %v758_v0 = vld [vmem:[%s1494_s12] sm:$0xff]   ;;  %v821_v9 = vld [vmem:[%s1494_s12 + $0x8] sm:$0xff]   ;;  %v822_v20 = vld [vmem:[%s1494_s12 + $0x10] sm:$0xff]   ;;  %s740_s27 = sshll.u32 %s1490_s3, 7  ;;  %s756_s15 = sshll.u32 %s1254_s25, 11 }
  0xcc   : > { %1166 = vsyncadd (%p1707_p12), [#allocation12], 4294967280  ;;  %v1520_v1 = vld [vmem:[#allocation7] ss:$0 sm:$0xff]  ;;  %v759_v2 = vunpack.c.l.bf16 %v758_v0  ;;  %v1523_v4 = vld [vmem:[#allocation10] ss:$0 sm:$0xff]  ;;  %v760_v5 = vunpack.c.h.bf16 %v758_v0  ;;  %v763_v14 = vunpack.c.l.bf16 %v821_v9  ;;  %v764_v18 = vunpack.c.h.bf16 %v821_v9  ;;  %s1629_s19 = scalar_lea.hbm %s1682_s6, %s756_s15 }
  0xcd   : > { %v790_v3 = vld [vmem:[%s1501_s9] sm:$0xff]   ;;  %v828_v10 = vld [vmem:[%s1501_s9 + $0x8] sm:$0xff]   ;;  %v829_v21 = vld [vmem:[%s1501_s9 + $0x10] sm:$0xff]   ;;  %v767_v32 = vunpack.c.l.bf16 %v822_v20  ;;  %v768_v41 = vunpack.c.h.bf16 %v822_v20  ;;  %s1558_s7 = scalar_lea.vmem [#allocation13], %s740_s27  ;;  %s570_s0 = scalar_lea.sflag [#allocation4], %s1490_s3 }
  0xce   : > { %v1525_v6 = vld [vmem:[#allocation8] ss:$0 sm:$0xff]  ;;  %v791_v7 = vunpack.c.l.bf16 %v790_v3  ;;  %v792_v8 = vunpack.c.h.bf16 %v790_v3  ;;  %v404_v11 = vmul.f32 %v759_v2, %v1520_v1  ;;  %v1530_v12 = vld [vmem:[#allocation11] ss:$0 sm:$0xff]  ;;  %v405_v13 = vmul.f32 %v760_v5, %v1520_v1  ;;  %v823_v42 = vld [vmem:[%s1494_s12 + $0x18] sm:$0xff]   ;;  %s584_s10 = sshll.u32 %s1558_s7, 4  ;;  %s1631_s10 = int_to_ptr.vmem [resolvable:$true] %s584_s10 }
  0xcf   : > { %v795_v15 = vunpack.c.l.bf16 %v828_v10  ;;  %v796_v19 = vunpack.c.h.bf16 %v828_v10  ;;  %v406_v24 = vmul.f32 %v763_v14, %v1520_v1  ;;  %v407_v28 = vmul.f32 %v764_v18, %v1520_v1  ;;  %v830_v43 = vld [vmem:[%s1501_s9 + $0x18] sm:$0xff]   ;;  %v824_v52 = vld [vmem:[%s1494_s12 + $0x20] sm:$0xff]   ;;  %v825_v14 = vld [vmem:[%s1494_s12 + $0x28] sm:$0xff]   ;;  %s1103_s14 = scalar_lea.vmem %s1631_s10, 2048  ;;  %s1195_s25 = smov [#allocation13]  }
  0xd0   : > { %v482_v16 = vmul.f32 %v791_v7, %v1523_v4  ;;  %v483_v17 = vmul.f32 %v792_v8, %v1523_v4  ;;  %v427_v22 = vadd.f32 %v1525_v6, %v404_v11  ;;  %v428_v23 = vadd.f32 %v1525_v6, %v405_v13  ;;  %v831_v57 = vld [vmem:[%s1501_s9 + $0x20] sm:$0xff]   ;;  %p1104_p5 = scmp.ne.s32.totalorder %s1631_s10, %s1103_s14  ;;  %s1107_s13 = sshll.u32 %s1195_s25, 4  ;;  %s1108_s13 = int_to_ptr.vmem [resolvable:$false] %s1107_s13 }
  0xd1   : > { %v484_v25 = vmul.f32 %v795_v15, %v1523_v4  ;;  %v485_v29 = vmul.f32 %v796_v19, %v1523_v4  ;;  %v429_v30 = vadd.f32 %v1525_v6, %v406_v24  ;;  %v799_v33 = vunpack.c.l.bf16 %v829_v21  ;;  %v832_v19 = vld [vmem:[%s1501_s9 + $0x28] sm:$0xff]   ;;  %s1109_s26 = scalar_lea.vmem %s1108_s13, 4096  ;;  %p1110_p4 = scmp.lt.s32.totalorder %s1631_s10, %s1108_s13 }
  0xd2   : > { %v505_v26 = vadd.f32 %v1530_v12, %v482_v16  ;;  %v506_v27 = vadd.f32 %v1530_v12, %v483_v17  ;;  %v430_v36 = vadd.f32 %v1525_v6, %v407_v28  ;;  %v408_v39 = vmul.f32 %v767_v32, %v1520_v1  ;;  %v826_v32 = vld [vmem:[%s1494_s12 + $0x30] sm:$0xff]   ;;  %p1105_p11 = pnand %p1104_p5, %p1390_p1  ;;  %p1111_p6 = scmp.lt.s32.totalorder %s1109_s26, %s1103_s14 }
  0xd3   : > { %v507_v31 = vadd.f32 %v1530_v12, %v484_v25  ;;  %v508_v37 = vadd.f32 %v1530_v12, %v485_v29  ;;  %v486_v40 = vmul.f32 %v799_v33, %v1523_v4  ;;  %v800_v47 = vunpack.c.h.bf16 %v829_v21  ;;  %v833_v33 = vld [vmem:[%s1501_s9 + $0x30] sm:$0xff]  }
  0xd4   : > { %v521_v34 = vadd.f32 %v505_v26, %v427_v22  ;;  %v522_v35 = vadd.f32 %v506_v27, %v428_v23  ;;  %v431_v49 = vadd.f32 %v1525_v6, %v408_v39  ;;  %v409_v51 = vmul.f32 %v768_v41, %v1520_v1  ;;  %p1106_p2 = pneg %p1105_p11  ;;  %p1112_p0 = por %p1111_p6, %p1110_p4 }
  0xd5   : > { %v523_v38 = vadd.f32 %v507_v31, %v429_v30  ;;  %v524_v46 = vadd.f32 %v508_v37, %v430_v36  ;;  %v509_v50 = vadd.f32 %v1530_v12, %v486_v40  ;;  %v487_v54 = vmul.f32 %v800_v47, %v1523_v4 }
  0xd6   : > { %v537_v44 = vmax.f32 %v521_v34, 0.0  ;;  %v538_v45 = vmax.f32 %v522_v35, 0.0  ;;  %v771_v55 = vunpack.c.l.bf16 %v823_v42  ;;  %v803_v56 = vunpack.c.l.bf16 %v830_v43  ;;  %p1113_p13 = pnand %p1112_p0, %p1106_p2 }
  0xd7   : > { %v539_v48 = vmax.f32 %v523_v38, 0.0  ;;  %v540_v53 = vmax.f32 %v524_v46, 0.0  ;;  %v525_v58 = vadd.f32 %v509_v50, %v431_v49  ;;  %v432_v59 = vadd.f32 %v1525_v6, %v409_v51  ;;  %v827_v46 = vld [vmem:[%s1494_s12 + $0x38] sm:$0xff]  }
  0xd8   : > { %553 = vst [vmem:[%s1558_s7] sm:$0xff] %v537_v44  ;;  %554 = vst [vmem:[%s1558_s7 + $0x8] sm:$0xff] %v538_v45  ;;  %v772_v60 = vunpack.c.h.bf16 %v823_v42  ;;  %v804_v61 = vunpack.c.h.bf16 %v830_v43  ;;  %v510_v62 = vadd.f32 %v1530_v12, %v487_v54  ;;  %v410_v63 = vmul.f32 %v771_v55, %v1520_v1  ;;  %v834_v55 = vld [vmem:[%s1501_s9 + $0x38] sm:$0xff]  }
  0xd9   : > { %555 = vst [vmem:[%s1558_s7 + $0x10] sm:$0xff] %v539_v48  ;;  %556 = vst [vmem:[%s1558_s7 + $0x18] sm:$0xff] %v540_v53  ;;  %v488_v0 = vmul.f32 %v803_v56, %v1523_v4  ;;  %v775_v2 = vunpack.c.l.bf16 %v824_v52  ;;  %v541_v3 = vmax.f32 %v525_v58, 0.0  ;;  %v807_v8 = vunpack.c.l.bf16 %v831_v57 }
  0xda   : > { %v411_v5 = vmul.f32 %v772_v60, %v1520_v1  ;;  %v489_v7 = vmul.f32 %v804_v61, %v1523_v4  ;;  %v526_v9 = vadd.f32 %v510_v62, %v432_v59  ;;  %v433_v10 = vadd.f32 %v1525_v6, %v410_v63 }
  0xdb   : > { %v511_v11 = vadd.f32 %v1530_v12, %v488_v0  ;;  %v412_v13 = vmul.f32 %v775_v2, %v1520_v1  ;;  %557 = vst [vmem:[%s1558_s7 + $0x20] sm:$0xff] %v541_v3  ;;  %v490_v17 = vmul.f32 %v807_v8, %v1523_v4  ;;  %v776_v18 = vunpack.c.h.bf16 %v824_v52 }
  0xdc   : > { %v434_v15 = vadd.f32 %v1525_v6, %v411_v5  ;;  %v512_v16 = vadd.f32 %v1530_v12, %v489_v7  ;;  %v542_v20 = vmax.f32 %v526_v9, 0.0  ;;  %v808_v23 = vunpack.c.h.bf16 %v831_v57 }
  0xdd   : > { %v527_v21 = vadd.f32 %v511_v11, %v433_v10  ;;  %v435_v22 = vadd.f32 %v1525_v6, %v412_v13  ;;  %v513_v25 = vadd.f32 %v1530_v12, %v490_v17  ;;  %v413_v26 = vmul.f32 %v776_v18, %v1520_v1 }
  0xde   : > { %v528_v24 = vadd.f32 %v512_v16, %v434_v15  ;;  %v779_v27 = vunpack.c.l.bf16 %v825_v14  ;;  %558 = vst [vmem:[%s1558_s7 + $0x28] sm:$0xff] %v542_v20  ;;  %v491_v29 = vmul.f32 %v808_v23, %v1523_v4  ;;  %v811_v30 = vunpack.c.l.bf16 %v832_v19 }
  0xdf   : > { %v543_v28 = vmax.f32 %v527_v21, 0.0  ;;  %v780_v31 = vunpack.c.h.bf16 %v825_v14  ;;  %v529_v35 = vadd.f32 %v513_v25, %v435_v22  ;;  %v436_v36 = vadd.f32 %v1525_v6, %v413_v26 }
  0xe0   : > { %v544_v34 = vmax.f32 %v528_v24, 0.0  ;;  %v414_v37 = vmul.f32 %v779_v27, %v1520_v1  ;;  %v514_v38 = vadd.f32 %v1530_v12, %v491_v29  ;;  %v492_v39 = vmul.f32 %v811_v30, %v1523_v4 }
  0xe1   : > { %559 = vst [vmem:[%s1558_s7 + $0x30] sm:$0xff] %v543_v28  ;;  %v415_v40 = vmul.f32 %v780_v31, %v1520_v1  ;;  %v812_v41 = vunpack.c.h.bf16 %v832_v19  ;;  %v545_v42 = vmax.f32 %v529_v35, 0.0  ;;  %v783_v44 = vunpack.c.l.bf16 %v826_v32 }
  0xe2   : > { %560 = vst [vmem:[%s1558_s7 + $0x38] sm:$0xff] %v544_v34  ;;  %v437_v43 = vadd.f32 %v1525_v6, %v414_v37  ;;  %v815_v45 = vunpack.c.l.bf16 %v833_v33  ;;  %v530_v47 = vadd.f32 %v514_v38, %v436_v36  ;;  %v515_v48 = vadd.f32 %v1530_v12, %v492_v39 }
  0xe3   : > { %v438_v49 = vadd.f32 %v1525_v6, %v415_v40  ;;  %v493_v50 = vmul.f32 %v812_v41, %v1523_v4  ;;  %561 = vst [vmem:[%s1558_s7 + $0x40] sm:$0xff] %v545_v42  ;;  %v416_v51 = vmul.f32 %v783_v44, %v1520_v1  ;;  %v784_v53 = vunpack.c.h.bf16 %v826_v32 }
  0xe4   : > { %v494_v52 = vmul.f32 %v815_v45, %v1523_v4  ;;  %v816_v54 = vunpack.c.h.bf16 %v833_v33  ;;  %v546_v56 = vmax.f32 %v530_v47, 0.0  ;;  %v531_v57 = vadd.f32 %v515_v48, %v437_v43 }
  0xe5   : > { %v516_v58 = vadd.f32 %v1530_v12, %v493_v50  ;;  %v787_v59 = vunpack.c.l.bf16 %v827_v46  ;;  %v439_v60 = vadd.f32 %v1525_v6, %v416_v51  ;;  %v417_v62 = vmul.f32 %v784_v53, %v1520_v1 }
  0xe6   : > { %v517_v61 = vadd.f32 %v1530_v12, %v494_v52  ;;  %v495_v63 = vmul.f32 %v816_v54, %v1523_v4  ;;  %562 = vst [vmem:[%s1558_s7 + $0x48] sm:$0xff] %v546_v56  ;;  %v547_v0 = vmax.f32 %v531_v57, 0.0  ;;  %v819_v5 = vunpack.c.l.bf16 %v834_v55 }
  0xe7   : > { %v532_v2 = vadd.f32 %v516_v58, %v438_v49  ;;  %v418_v3 = vmul.f32 %v787_v59, %v1520_v1  ;;  %v440_v8 = vadd.f32 %v1525_v6, %v417_v62  ;;  %v788_v10 = vunpack.c.h.bf16 %v827_v46 }
  0xe8   : > { %v533_v7 = vadd.f32 %v517_v61, %v439_v60  ;;  %v518_v9 = vadd.f32 %v1530_v12, %v495_v63  ;;  %563 = vst [vmem:[%s1558_s7 + $0x50] sm:$0xff] %v547_v0  ;;  %v496_v14 = vmul.f32 %v819_v5, %v1523_v4  ;;  %v820_v15 = vunpack.c.h.bf16 %v834_v55 }
  0xe9   : > { %v548_v11 = vmax.f32 %v532_v2, 0.0  ;;  %v441_v13 = vadd.f32 %v1525_v6, %v418_v3  ;;  %v419_v18 = vmul.f32 %v788_v10, %v1520_v1 }
  0xea   : > { %v549_v16 = vmax.f32 %v533_v7, 0.0  ;;  %v534_v17 = vadd.f32 %v518_v9, %v440_v8  ;;  %v519_v19 = vadd.f32 %v1530_v12, %v496_v14  ;;  %v497_v20 = vmul.f32 %v820_v15, %v1523_v4 }
  0xeb   : > { %564 = vst [vmem:[%s1558_s7 + $0x58] sm:$0xff] %v548_v11  ;;  %v442_v22 = vadd.f32 %v1525_v6, %v419_v18 }
  0xec   : > { %565 = vst [vmem:[%s1558_s7 + $0x60] sm:$0xff] %v549_v16  ;;  %v550_v21 = vmax.f32 %v534_v17, 0.0  ;;  %v535_v23 = vadd.f32 %v519_v19, %v441_v13  ;;  %v520_v24 = vadd.f32 %v1530_v12, %v497_v20 }
  0xee   : > { %566 = vst [vmem:[%s1558_s7 + $0x68] sm:$0xff] %v550_v21  ;;  %v551_v1 = vmax.f32 %v535_v23, 0.0  ;;  %v536_v25 = vadd.f32 %v520_v24, %v442_v22 }
  0xf0   : > { %567 = vst [vmem:[%s1558_s7 + $0x70] sm:$0xff] %v551_v1  ;;  %v552_v4 = vmax.f32 %v536_v25, 0.0 }
  0xf2   : > { %568 = vst [vmem:[%s1558_s7 + $0x78] sm:$0xff] %v552_v4 }
  0xf3   : > { %1116 = shalt.err (!%p1113_p13)
}
  0xf4   : > { %s1117_s17 = scalar_lea.hbm %s1629_s19, 2048  ;;  %s1121_s2 = scalar_lea.hbm %s1682_s6, 8192 }
  0xf5   : > { %p1118_p10 = scmp.ne.s32.totalorder %s1629_s19, %s1117_s17  ;;  %p1122_p7 = scmp.lt.u32.totalorder %s1629_s19, %s1682_s6 }
  0xf6   : > { %p1123_p9 = scmp.lt.u32.totalorder %s1121_s2, %s1117_s17  ;;  %p1125_p5 = scmp.lt.u32.totalorder %s1117_s17, %s1629_s19 }
  0xf7   : > { %p1119_p8 = pnand %p1118_p10, %p1390_p1 }
  0xf8   : > { %p1124_p12 = por %p1123_p9, %p1122_p7 }
  0xf9   : > { %p1120_p3 = pneg %p1119_p8 }
  0xfa   : > { %p1126_p11 = por %p1125_p5, %p1124_p12 }
  0xfc   : > { %p1127_p2 = pnand %p1126_p11, %p1120_p3 }
  0xfe   : > { %1130 = shalt.err (!%p1127_p2)
}
  0xff   : > { %s1196_s27 = smov 128   ;;  %s1197_s7 = smov 8  }
 0x100   : > { %855 = dma.vmem_to_hbm [thread:$0]  (%p1390_p1), %s1631_s10, 2048, %s1629_s19, %s570_s0, %s1196_s27, %s1196_s27, %s1197_s7  }
 0x101 PF: > { %p890_p4 = scmp.ge.s32.totalorder %s1185_s24, 2  ;;  %s599_s15 = sand.u32 1, %s1173_s21  }
 0x102   : > { %p1708_p6 = scmp.ne.s32.totalorder %s1690_s28, 0  ;;  %s600_s16 = scalar_lea.sflag [#allocation4], %s599_s15 }
 0x104   : > { %p878_p0 = pnand %p890_p4, %p1708_p6 }
 0x106   : > { %1168 = dma.done.wait (!%p878_p0), %s600_s16, 2048  }
 0x107   : > { %1170 = vsyncadd (!%p878_p0), %s600_s16, 4294965248  ;;  %p24_p13 = scmp.ge.s32.totalorder %s1380_s18, 6   ;;  %s1709_s21 = smov %s1177_s22 }
 0x108   : > { %s1710_s22 = smov %s1181_s23  ;;  %s1711_s23 = smov %s1396_s11 }
 0x109   : > { %s1712_s24 = smov %s1380_s18  ;;  %26 = sbr.rel (!%p24_p13) target bundleno = 13 (0xd), region = 118 }
 0x110   :  { %605 = vsyncpa [#allocation3], 1 }
 0x111   :  { %607 = vsyncpa [#allocation3 + $0x1], 1 }
 0x112   :  { %608 = vsyncpa [#allocation6], 1 }
 0x113   :  { %610 = vsyncpa [#allocation6 + $0x1], 1 }
 0x114   :  { %611 = vsyncpa [#allocation9], 1 }
 0x115   :  { %612 = vsyncpa [#allocation12], 1 }
 0x116   :  { %613 = vsyncpa [#allocation4], 1 }
 0x117   :  { %615 = vsyncpa [#allocation4 + $0x1], 1 }

// kernel: bottleneck_forward.6
= control target key start
LH: loop header
LB: loop body
LE: loop exit
PB: predicated region body
PF: predicated region fallthrough
CT: control target
= control target key end

     0   :  { %s2980_s0 = inlined_call_operand.hbm [shape: bf16[8,8,8,128], index: 0, kind: input, shape index: {}]   ;;  %s2981_s1 = inlined_call_operand.hbm [shape: bf16[128,128], index: 1, kind: input, shape index: {}]   ;;  %s2982_s2 = inlined_call_operand.hbm [shape: f32[1,128], index: 2, kind: input, shape index: {}]   ;;  %s2983_s3 = inlined_call_operand.hbm [shape: f32[1,128], index: 3, kind: input, shape index: {}]   ;;  %s2984_s4 = inlined_call_operand.hbm [shape: bf16[8,8,8,128], index: 4, kind: input, shape index: {}]   ;;  %s2985_s5 = inlined_call_operand.hbm [shape: bf16[128,128], index: 5, kind: input, shape index: {}]   ;;  %s2986_s6 = inlined_call_operand.hbm [shape: bf16[8,8,8,128], index: 6, kind: output, shape index: {0}]   ;;  %s2987_s7 = inlined_call_operand.hbm [shape: f32[4,2,128], index: 7, kind: output, shape index: {1}]   ;;  %s2988_s8 = inlined_call_operand.hbm [shape: bf16[8,8,8,128], index: 8, kind: output, shape index: {2}]   ;;  %s2989_s9 = inlined_call_operand.hbm [shape: f32[4,2,128], index: 9, kind: output, shape index: {3}]  }
   0x1   :  { %3015 = sst [smem:[#allocation32_spill]] %s2980_s0 }
   0x2   :  { %3016 = sst [smem:[#allocation33_spill]] %s2981_s1 }
   0x3   :  { %3017 = sst [smem:[#allocation34_spill]] %s2982_s2 }
   0x4   :  { %3018 = sst [smem:[#allocation35_spill]] %s2987_s7 }
   0x5   :  { %3019 = sst [smem:[#allocation36_spill]] %s2988_s8 }
   0x6   :  { %3020 = sst [smem:[#allocation37_spill]] %s2989_s9 }
   0x7   :  { %15 = vsyncpa [#allocation3], 0 }
   0x8   :  { %17 = vsyncpa [#allocation3 + $0x1], 0 }
   0x9   :  { %18 = vsyncpa [#allocation6], 0 }
   0xa   :  { %19 = vsyncpa [#allocation9], 0 }
   0xb   :  { %20 = vsyncpa [#allocation4], 0 }
   0xc   :  { %22 = vsyncpa [#allocation4 + $0x1], 0 }
   0xd   :  { %23 = vsyncpa [#allocation14], 0 }
   0xe   :  { %25 = vsyncpa [#allocation14 + $0x1], 0 }
   0xf   :  { %26 = vsyncpa [#allocation17], 0 }
  0x10   :  { %28 = vsyncpa [#allocation17 + $0x1], 0  ;;  %s2457_s30 = smov 0   ;;  %s2459_s10 = smov 0  }
  0x11   :  { %s2461_s11 = smov 0   ;;  %s2463_s12 = smov 0  }
  0x12 LB: > { %3021 = sst [smem:[#allocation26_spill]] %s2379_s30  ;;  %s2478_s13 = sadd.s32 4294967295, %s2391_s12   ;;  %s2391_s12 = sphi %s2463_s12, %s3062_s12   ;;  %s2387_s11 = sphi %s2461_s11, %s3064_s11   ;;  %s2383_s10 = sphi %s2459_s10, %s3066_s10   ;;  %s2379_s30 = sphi %s2457_s30, %s3065_s30  }
  0x13   : > { %3022 = sst [smem:[#allocation27_spill]] %s2387_s11  ;;  %s2993_s14 = sadd.s32 4294967294, %s2391_s12  }
  0x14   : > { %p54_p0 = scmp.ne.s32.totalorder %s2383_s10, %s2379_s30  ;;  %p2990_p1 = scmp.eq.s32.totalorder %s2478_s13, 0 }
  0x15   : > { %p194_p3 = scmp.eq.s32.totalorder %s2993_s14, 3  ;;  %p1544_p5 = scmp.ge.s32.totalorder %s2391_s12, 1 }
  0x16   : > { %p2489_p4 = por %p2990_p1, %p54_p0  ;;  %p279_p7 = scmp.lt.s32.totalorder %s2391_s12, 5 }
  0x17   : > { %p2494_p6 = por %p194_p3, %p54_p0  ;;  %s2393_s18 = smov [#allocation5]  }
  0x18   : > { %s3023_s15 = scalar_select %p2489_p4, 1, 0 }
  0x19   : > { %s3024_s16 = scalar_select %p2494_p6, 1, 0 }
  0x1a   : > { %p2499_p8 = pnand %p1544_p5, %p279_p7  ;;  %s291_s19 = sshll.u32 %s2393_s18, 4  ;;  %s292_s19 = int_to_ptr.vmem [resolvable:$true] %s291_s19 }
  0x1b   : > { %3025 = sst [smem:[#allocation28_spill]] %s3024_s16  ;;  %s2394_s21 = smov [#allocation7]  }
  0x1c   : > { %s3026_s17 = scalar_select %p2499_p8, 1, 0 }
  0x1d   : > { %p1938_p9 = pneg %p2499_p8  ;;  %s305_s22 = sshll.u32 %s2394_s21, 4  ;;  %s2511_s22 = int_to_ptr.vmem [resolvable:$true] %s305_s22 }
  0x1e   : > { %s3028_s1 = sld [smem:[#allocation33_spill]] }
  0x1f   : > { %p2507_p10 = pnand %p1938_p9, %p2990_p1 }
  0x21   : > { %s3027_s20 = scalar_select %p2507_p10, 1, 0 }
  0x22   : > { %p2521_p12 = pneg %p2507_p10 }
  0x24   : > { %s2045_s25 = scalar_lea.hbm %s3028_s1, 1024 }
  0x25   : > { %p2046_p11 = scmp.ne.s32.totalorder %s3028_s1, %s2045_s25  ;;  %p2052_p3 = scmp.lt.u32.totalorder %s2045_s25, %s3028_s1 }
  0x27   : > { %p2048_p13 = pnand %p2521_p12, %p2046_p11 }
  0x29   : > { %p2049_p0 = pneg %p2048_p13 }
  0x2b   : > { %p2054_p5 = pnand %p2052_p3, %p2049_p0 }
  0x2d   : > { %2057 = shalt.err (!%p2054_p5)
}
  0x2e   : > { %s2058_s21 = scalar_lea.vmem %s292_s19, 1024  ;;  %p2066_p2 = scmp.lt.s32.totalorder %s292_s19, %s292_s19 }
  0x2f   : > { %p2059_p7 = scmp.ne.s32.totalorder %s292_s19, %s2058_s21  ;;  %p2067_p6 = scmp.lt.s32.totalorder %s2058_s21, %s2058_s21 }
  0x31   : > { %p2061_p9 = pnand %p2059_p7, %p2521_p12  ;;  %p2068_p4 = por %p2067_p6, %p2066_p2 }
  0x33   : > { %p2062_p1 = pneg %p2061_p9 }
  0x35   : > { %p2069_p8 = pnand %p2068_p4, %p2062_p1 }
  0x37   : > { %2072 = shalt.err (!%p2069_p8)
}
  0x38   : > { %s2996_s23 = smov 64   ;;  %s2998_s24 = smov 4  }
  0x39   : > { %1941 = dma.hbm_to_vmem [thread:$0]  (!%p2507_p10), %s3028_s1, 1024, %s292_s19, [#allocation6], %s2996_s23, %s2996_s23, %s2998_s24  }
  0x3a   : > { %s3030_s2 = sld [smem:[#allocation34_spill]] }
  0x40   : > { %s2073_s18 = scalar_lea.hbm %s3030_s2, 16 }
  0x41   : > { %p2074_p1 = scmp.ne.s32.totalorder %s3030_s2, %s2073_s18  ;;  %p2080_p6 = scmp.lt.u32.totalorder %s2073_s18, %s3030_s2 }
  0x43   : > { %p2076_p2 = pnand %p2074_p1, %p2521_p12 }
  0x45   : > { %p2077_p4 = pneg %p2076_p2 }
  0x47   : > { %p2082_p8 = pnand %p2080_p6, %p2077_p4 }
  0x49   : > { %2085 = shalt.err (!%p2082_p8)
}
  0x4a   : > { %s2086_s19 = scalar_lea.vmem %s2511_s22, 16  ;;  %s2093_s14 = scalar_lea.vmem %s2511_s22, 32 }
  0x4b   : > { %p2087_p11 = scmp.ne.s32.totalorder %s2511_s22, %s2086_s19  ;;  %p2094_p3 = scmp.lt.s32.totalorder %s2511_s22, %s2511_s22 }
  0x4c   : > { %p2095_p5 = scmp.lt.s32.totalorder %s2093_s14, %s2086_s19 }
  0x4d   : > { %p2089_p13 = pnand %p2087_p11, %p2521_p12 }
  0x4e   : > { %p2096_p7 = por %p2095_p5, %p2094_p3 }
  0x4f   : > { %p2090_p0 = pneg %p2089_p13 }
  0x51   : > { %p2097_p9 = pnand %p2096_p7, %p2090_p0 }
  0x53   : > { %2100 = shalt.err (!%p2097_p9)
}
  0x54   : > { %1944 = dma.hbm_to_vmem [thread:$0]  (!%p2507_p10), %s3030_s2, 16, %s2511_s22, [#allocation6]  }
  0x55   : > { %s2565_s25 = sadd.s32 1, %s2391_s12   ;;  %s41_s26 = sadd.s32 1, %s2387_s11 }
  0x56   : > { %3031 = sst [smem:[#allocation29_spill]] %s2565_s25  ;;  %s38_s27 = ssub.s32 %s2391_s12, %s2565_s25 }
  0x57   : > { %p48_p1 = scmp.ne.s32.totalorder %s2387_s11, %s2383_s10  ;;  %p39_p2 = scmp.eq.s32.totalorder %s38_s27, 0 }
  0x58   : > { %p49_p4 = scmp.eq.s32.totalorder %s2391_s12, 0  ;;  %p3032_p6 = scmp.eq.s32.totalorder %s2478_s13, 3 }
  0x59   : > { %p1975_p11 = scmp.lt.s32.totalorder %s2391_s12, 4  ;;  %s340_s21 = sand.u32 1, %s2391_s12  }
  0x5a   : > { %p2575_p8 = por %p3032_p6, %p48_p1  ;;  %p50_p13 = por %p49_p4, %p48_p1 }
  0x5b   : > { %s2581_s18 = scalar_select %p39_p2, %s2387_s11, %s41_s26  }
  0x5c   : > { %s3033_s29 = scalar_select %p2575_p8, 1, 0 }
  0x5d   : > { %3035 = sst [smem:[#allocation31_spill]] %s2581_s18  ;;  %s342_s19 = sand.u32 1, %s2387_s11  }
  0x5e   : > { %3034 = sst [smem:[#allocation30_spill]] %s3033_s29  ;;  %s2585_s22 = sshll.u32 %s342_s19, 6 }
  0x5f   : > { %s3000_s14 = sshll.u32 %s2391_s12, 10  ;;  %s3036_s0 = sld [smem:[#allocation32_spill]] }
  0x60   : > { %s344_s23 = scalar_lea.vmem [#allocation2], %s2585_s22  ;;  %p2596_p0 = pnand %p1975_p11, %p50_p13 }
  0x61   : > { %s352_s26 = sshll.u32 %s344_s23, 4  ;;  %s2602_s19 = scalar_lea.sflag [#allocation3], %s340_s21  ;;  %s2600_s26 = int_to_ptr.vmem [resolvable:$true] %s352_s26 }
  0x62   : > { %s3037_s24 = scalar_select %p2596_p0, 1, 0 }
  0x63   : > { %p3012_p5 = pneg %p2596_p0 }
  0x65   : > { %s2593_s27 = scalar_lea.hbm %s3036_s0, %s3000_s14  ;;  %s2106_s16 = scalar_lea.hbm %s3036_s0, 4096 }
  0x66   : > { %s2101_s1 = scalar_lea.hbm %s2593_s27, 1024  ;;  %p2107_p1 = scmp.lt.u32.totalorder %s2593_s27, %s3036_s0 }
  0x67   : > { %p2102_p3 = scmp.ne.s32.totalorder %s2593_s27, %s2101_s1  ;;  %p2108_p2 = scmp.lt.u32.totalorder %s2106_s16, %s2101_s1 }
  0x68   : > { %p2110_p6 = scmp.lt.u32.totalorder %s2101_s1, %s2593_s27 }
  0x69   : > { %p2104_p7 = pnand %p3012_p5, %p2102_p3  ;;  %p2109_p4 = por %p2108_p2, %p2107_p1 }
  0x6b   : > { %p2105_p9 = pneg %p2104_p7  ;;  %p2111_p11 = por %p2110_p6, %p2109_p4 }
  0x6d   : > { %p2112_p13 = pnand %p2111_p11, %p2105_p9 }
  0x6f   : > { %2115 = shalt.err (!%p2112_p13)
}
  0x70   : > { %s2116_s21 = scalar_lea.vmem %s2600_s26, 1024  ;;  %s2397_s30 = smov [#allocation2]  }
  0x71   : > { %p2117_p3 = scmp.ne.s32.totalorder %s2600_s26, %s2116_s21  ;;  %s2121_s23 = sshll.u32 %s2397_s30, 4  ;;  %s2122_s23 = int_to_ptr.vmem [resolvable:$false] %s2121_s23 }
  0x72   : > { %s2123_s2 = scalar_lea.vmem %s2122_s23, 2048  ;;  %p2124_p10 = scmp.lt.s32.totalorder %s2600_s26, %s2122_s23 }
  0x73   : > { %p2119_p7 = pnand %p2117_p3, %p3012_p5  ;;  %p2125_p1 = scmp.lt.s32.totalorder %s2123_s2, %s2116_s21 }
  0x75   : > { %p2120_p8 = pneg %p2119_p7  ;;  %p2126_p2 = por %p2125_p1, %p2124_p10 }
  0x77   : > { %p2127_p4 = pnand %p2126_p2, %p2120_p8 }
  0x79   : > { %2130 = shalt.err (!%p2127_p4)
}
  0x7a   : > { %s3038_s1 = smov 4   ;;  %s3039_s14 = smov 64  }
  0x7b   : > { %1954 = dma.hbm_to_vmem [thread:$0]  (!%p2596_p0), %s2593_s27, 1024, %s2600_s26, %s2602_s19, %s3039_s14, %s3039_s14, %s3038_s1  }
  0x7c   : > { %s3040_s16 = sshll.u32 %s2391_s12, 10  ;;  %s366_s23 = scalar_lea.vmem [#allocation10], %s2585_s22 }
  0x7d   : > { %s2638_s21 = scalar_lea.hbm %s2984_s4, %s3040_s16  ;;  %s374_s2 = sshll.u32 %s366_s23, 4  ;;  %s2659_s2 = int_to_ptr.vmem [resolvable:$true] %s374_s2 }
  0x7e   : > { %s2398_s18 = smov [#allocation8]   ;;  %s2131_s8 = scalar_lea.hbm %s2983_s3, 16 }
  0x7f   : > { %s316_s11 = sshll.u32 %s2398_s18, 4  ;;  %p2132_p10 = scmp.ne.s32.totalorder %s2983_s3, %s2131_s8  ;;  %s317_s11 = int_to_ptr.vmem [resolvable:$true] %s316_s11 }
  0x80   : > { %p2138_p6 = scmp.lt.u32.totalorder %s2131_s8, %s2983_s3 }
  0x81   : > { %p2134_p8 = pnand %p2132_p10, %p2521_p12 }
  0x83   : > { %p2135_p9 = pneg %p2134_p8 }
  0x85   : > { %p2140_p11 = pnand %p2138_p6, %p2135_p9 }
  0x87   : > { %2143 = shalt.err (!%p2140_p11)
}
  0x88   : > { %s2144_s22 = scalar_lea.vmem %s317_s11, 16  ;;  %s2151_s9 = scalar_lea.vmem %s317_s11, 32 }
  0x89   : > { %p2145_p13 = scmp.ne.s32.totalorder %s317_s11, %s2144_s22  ;;  %p2152_p1 = scmp.lt.s32.totalorder %s317_s11, %s317_s11 }
  0x8a   : > { %p2153_p2 = scmp.lt.s32.totalorder %s2151_s9, %s2144_s22 }
  0x8b   : > { %p2147_p3 = pnand %p2145_p13, %p2521_p12 }
  0x8c   : > { %p2154_p4 = por %p2153_p2, %p2152_p1 }
  0x8d   : > { %p2148_p7 = pneg %p2147_p3 }
  0x8f   : > { %p2155_p5 = pnand %p2154_p4, %p2148_p7 }
  0x91   : > { %2158 = shalt.err (!%p2155_p5)
}
  0x92   : > { %p3041_p10 = scmp.ne.s32.totalorder %s3027_s20, 0  ;;  %s2399_s8 = smov [#allocation11]  }
  0x93   : > { %s326_s29 = sshll.u32 %s2399_s8, 4  ;;  %s2159_s16 = scalar_lea.hbm %s2985_s5, 1024  ;;  %s327_s29 = int_to_ptr.vmem [resolvable:$true] %s326_s29 }
  0x94   : > { %1947 = dma.hbm_to_vmem [thread:$0]  (!%p3041_p10), %s2983_s3, 16, %s317_s11, [#allocation9]  }
  0x95   : > { %p2160_p5 = scmp.ne.s32.totalorder %s2985_s5, %s2159_s16  ;;  %p2166_p6 = scmp.lt.u32.totalorder %s2159_s16, %s2985_s5 }
  0x97   : > { %p2162_p8 = pnand %p2160_p5, %p2521_p12 }
  0x99   : > { %p2163_p9 = pneg %p2162_p8 }
  0x9b   : > { %p2168_p11 = pnand %p2166_p6, %p2163_p9 }
  0x9d   : > { %2171 = shalt.err (!%p2168_p11)
}
  0x9e   : > { %s2172_s11 = scalar_lea.vmem %s327_s29, 1024  ;;  %p2180_p1 = scmp.lt.s32.totalorder %s327_s29, %s327_s29 }
  0x9f   : > { %p2173_p13 = scmp.ne.s32.totalorder %s327_s29, %s2172_s11  ;;  %p2181_p2 = scmp.lt.s32.totalorder %s2172_s11, %s2172_s11 }
  0xa1   : > { %p2175_p3 = pnand %p2173_p13, %p2521_p12  ;;  %p2182_p4 = por %p2181_p2, %p2180_p1 }
  0xa3   : > { %p2176_p7 = pneg %p2175_p3 }
  0xa5   : > { %p2183_p0 = pnand %p2182_p4, %p2176_p7 }
  0xa7   : > { %2186 = shalt.err (!%p2183_p0)
}
  0xa8   : > { %1950 = dma.hbm_to_vmem [thread:$0]  (!%p3041_p10), %s2985_s5, 1024, %s327_s29, [#allocation6], %s3039_s14, %s3039_s14, %s3038_s1  }
  0xa9   : > { %s2187_s28 = scalar_lea.hbm %s2638_s21, 1024  ;;  %p3042_p5 = scmp.ne.s32.totalorder %s3037_s24, 0 }
  0xaa   : > { %p2188_p12 = scmp.ne.s32.totalorder %s2638_s21, %s2187_s28  ;;  %s2192_s25 = scalar_lea.hbm %s2984_s4, 4096 }
  0xab   : > { %p3043_p8 = pneg %p3042_p5  ;;  %p2193_p6 = scmp.lt.u32.totalorder %s2638_s21, %s2984_s4 }
  0xac   : > { %p2194_p11 = scmp.lt.u32.totalorder %s2192_s25, %s2187_s28  ;;  %p2196_p3 = scmp.lt.u32.totalorder %s2187_s28, %s2638_s21 }
  0xad   : > { %p2190_p9 = pnand %p2188_p12, %p3043_p8 }
  0xae   : > { %p2195_p13 = por %p2194_p11, %p2193_p6 }
  0xaf   : > { %p2191_p0 = pneg %p2190_p9 }
  0xb0   : > { %p2197_p7 = por %p2196_p3, %p2195_p13 }
  0xb2   : > { %p2198_p1 = pnand %p2197_p7, %p2191_p0 }
  0xb4   : > { %2201 = shalt.err (!%p2198_p1)
}
  0xb5   : > { %s2202_s29 = scalar_lea.vmem %s2659_s2, 1024  ;;  %p3044_p2 = pmov %p3043_p8 }
  0xb6   : > { %p2203_p10 = scmp.ne.s32.totalorder %s2659_s2, %s2202_s29  ;;  %s2400_s26 = smov [#allocation10]  }
  0xb7   : > { %s2207_s16 = sshll.u32 %s2400_s26, 4  ;;  %s2208_s16 = int_to_ptr.vmem [resolvable:$false] %s2207_s16 }
  0xb8   : > { %p2205_p4 = pnand %p2203_p10, %p3044_p2  ;;  %s2209_s30 = scalar_lea.vmem %s2208_s16, 2048 }
  0xb9   : > { %p2210_p8 = scmp.lt.s32.totalorder %s2659_s2, %s2208_s16  ;;  %p2211_p9 = scmp.lt.s32.totalorder %s2209_s30, %s2202_s29 }
  0xba   : > { %p2206_p12 = pneg %p2205_p4 }
  0xbb   : > { %p2212_p6 = por %p2211_p9, %p2210_p8 }
  0xbd   : > { %p2213_p11 = pnand %p2212_p6, %p2206_p12 }
  0xbf   : > { %2216 = shalt.err (!%p2213_p11)
}
  0xc0   : > { %1957 = dma.hbm_to_vmem [thread:$0]  (!%p3042_p5), %s2638_s21, 1024, %s2659_s2, %s2602_s19, %s3039_s14, %s3039_s14, %s3038_s1  }
  0xc1   : > { %p3045_p0 = scmp.ne.s32.totalorder %s3026_s17, 0 }
  0xc2   : > { %s388_s23 = sand.u32 (!%p3045_p0), 1, %s2478_s13   ;;  %s2713_s27 = sand.u32 (!%p3045_p0), 1, %s2383_s10  }
  0xc3   : > { %386 = sbr.rel (%p3045_p0) target bundleno = 585 (0x249), region = 44  ;;  %s2716_s0 = sshll.u32 (!%p3045_p0), %s2713_s27, 6 }
  0xc4   : > { %s389_s24 = scalar_lea.sflag (!%p3045_p0), [#allocation3], %s388_s23  ;;  %s2721_s11 = scalar_lea.vmem (!%p3045_p0), [#allocation2], %s2716_s0 }
  0xc5   : > { %p3046_p13 = scmp.ne.s32.totalorder (!%p3045_p0), %s3023_s15, 0 }
  0xca   : > { %2346 = dma.done.wait (%p3046_p13), %s389_s24, 1024  }
  0xcb   : > { %2348 = vsyncadd (%p3046_p13), %s389_s24, 4294966272  ;;  %p3047_p5 = scmp.eq.s32.totalorder %s2478_s13, 0 }
  0xcd   : > { %2350 = dma.done.wait (%p3047_p5), [#allocation6], 1040   ;;  %p3048_p3 = pmov %p3047_p5 }
  0xcf   : > { %2352 = vsyncadd (%p3048_p3), [#allocation6], 4294966256  ;;  %p3049_p7 = pmov %p3048_p3 }
  0xd0   : > { %p3050_p1 = pmov %p3048_p3 }
  0xd1   : > { %2354 = dma.done.wait (%p3049_p7), [#allocation9], 16  }
  0xd2   : > { %2356 = vsyncadd (%p3050_p1), [#allocation9], 4294967280  ;;  %s2736_s17 = scalar_lea.vmem [#allocation10], %s2716_s0 }
  0xd3   : > { %2358 = dma.done.wait (%p3046_p13), %s389_s24, 1024  }
  0xd4   : > { %2360 = vsyncadd (%p3046_p13), %s389_s24, 4294966272  ;;  %p3051_p10 = pmov %p3050_p1 }
  0xd5   : > { %p3052_p2 = pmov %p3050_p1 }
  0xd6   : > { %2362 = dma.done.wait (%p3051_p10), [#allocation6], 1024  }
  0xd7   : > { %2364 = vsyncadd (%p3052_p2), [#allocation6], 4294966272  ;;  %v2021_v0 = vld [vmem:[#allocation5] sm:$0xff]   ;;  %v2023_v2 = vld [vmem:[#allocation5 + $0x8] sm:$0xff]   ;;  %s2799_s15 = scalar_lea.vmem [#allocation12], %s2716_s0  ;;  %s2803_s19 = scalar_lea.vmem [#allocation15], %s2716_s0 }
  0xd8   : > { %v2022_v1 = vld [vmem:[#allocation11] sm:$0xff]   ;;  %1846 = vmatprep.subr.bf16.mxu0 %v2021_v0  ;;  %v2024_v3 = vld [vmem:[#allocation11 + $0x8] sm:$0xff]   ;;  %v2026_v5 = vld [vmem:[#allocation11 + $0x10] sm:$0xff]   ;;  %s1276_s1 = sshll.u32 %s2799_s15, 4  ;;  %s1678_s14 = sshll.u32 %s2478_s13, 10  ;;  %s2825_s1 = int_to_ptr.vmem [resolvable:$true] %s1276_s1 }
  0xd9   : > { %1878 = vmatprep.subr.bf16.mxu1 %v2022_v1  ;;  %1847 = vmatpush3.bf16.msra.mxu0 %v2021_v0  ;;  %v2025_v4 = vld [vmem:[#allocation5 + $0x10] sm:$0xff]   ;;  %v2027_v6 = vld [vmem:[#allocation5 + $0x18] sm:$0xff]   ;;  %v2029_v8 = vld [vmem:[#allocation5 + $0x20] sm:$0xff]   ;;  %s2823_s22 = scalar_lea.hbm %s2986_s6, %s1678_s14  ;;  %s3053_s9 = sld [smem:[#allocation30_spill]] }
  0xda   : > { %1879 = vmatpush3.bf16.msra.mxu1 %v2022_v1  ;;  %1848 = vmatprep.subr.bf16.mxu0 %v2023_v2  ;;  %v2028_v7 = vld [vmem:[#allocation11 + $0x18] sm:$0xff]   ;;  %v2030_v9 = vld [vmem:[#allocation11 + $0x20] sm:$0xff]   ;;  %v2032_v11 = vld [vmem:[#allocation11 + $0x28] sm:$0xff]   ;;  %s1247_s28 = scalar_lea.sflag [#allocation4], %s2713_s27  ;;  %s2217_s7 = scalar_lea.vmem %s2825_s1, 1024 }
  0xdb   : > { %1880 = vmatprep.subr.bf16.mxu1 %v2024_v3  ;;  %v2031_v10 = vld [vmem:[#allocation5 + $0x28] sm:$0xff]   ;;  %v1682_v12 = vld [vmem:[%s2721_s11] sm:$0xff]   ;;  %v1794_v23 = vld [vmem:[%s2721_s11 + $0x10] sm:$0xff]   ;;  %p2218_p4 = scmp.ne.s32.totalorder %s2825_s1, %s2217_s7  ;;  %s2401_s20 = smov [#allocation12]  }
  0xdc   : > { %v2747_v13 = vld [vmem:[#allocation7] ss:$0 sm:$0xff]  ;;  %v2749_v14 = vld [vmem:[#allocation8] ss:$0 sm:$0xff]  ;;  %v1683_v15 = vunpack.c.l.bf16 %v1682_v12  ;;  %v1684_v16 = vunpack.c.h.bf16 %v1682_v12  ;;  %v2037_v17 = vld [vmem:[%s2736_s17] sm:$0xff]   ;;  %v1691_v25 = vunpack.c.l.bf16 %v1794_v23  ;;  %v1692_v26 = vunpack.c.h.bf16 %v1794_v23  ;;  %s2221_s25 = sshll.u32 %s2401_s20, 4  ;;  %s2222_s25 = int_to_ptr.vmem [resolvable:$false] %s2221_s25 }
  0xdd   : > { %1849 = vmatpush3.bf16.msra.mxu0 %v2023_v2  ;;  %v1793_v18 = vld [vmem:[%s2721_s11 + $0x8] sm:$0xff]   ;;  %1894 = vmatprep.mubr.bf16.mxu1 %v2037_v17  ;;  %v2033_v24 = vld [vmem:[#allocation5 + $0x30] sm:$0xff]   ;;  %v1795_v27 = vld [vmem:[%s2721_s11 + $0x18] sm:$0xff]   ;;  %s2223_s8 = scalar_lea.vmem %s2222_s25, 2048  ;;  %p2224_p6 = scmp.lt.s32.totalorder %s2825_s1, %s2222_s25 }
  0xde   : > { %1881 = vmatpush3.bf16.msra.mxu1 %v2024_v3  ;;  %1850 = vmatprep.subr.bf16.mxu0 %v2025_v4  ;;  %v516_v19 = vmul.f32 %v1683_v15, %v2747_v13  ;;  %v517_v20 = vmul.f32 %v1684_v16, %v2747_v13  ;;  %v1687_v21 = vunpack.c.l.bf16 %v1793_v18  ;;  %v1688_v22 = vunpack.c.h.bf16 %v1793_v18  ;;  %v2034_v28 = vld [vmem:[#allocation11 + $0x30] sm:$0xff]   ;;  %v1796_v37 = vld [vmem:[%s2721_s11 + $0x20] sm:$0xff]   ;;  %v1797_v56 = vld [vmem:[%s2721_s11 + $0x28] sm:$0xff]   ;;  %p2225_p11 = scmp.lt.s32.totalorder %s2223_s8, %s2217_s7 }
  0xdf   : > { %1882 = vmatprep.subr.bf16.mxu1 %v2026_v5  ;;  %v520_v33 = vmul.f32 %v1691_v25, %v2747_v13  ;;  %v521_v34 = vmul.f32 %v1692_v26, %v2747_v13  ;;  %v1695_v35 = vunpack.c.l.bf16 %v1795_v27  ;;  %v1696_v36 = vunpack.c.h.bf16 %v1795_v27  ;;  %v2035_v42 = vld [vmem:[#allocation5 + $0x38] sm:$0xff]   ;;  %v1798_v58 = vld [vmem:[%s2721_s11 + $0x30] sm:$0xff]   ;;  %v2041_v27 = vld [vmem:[%s2736_s17 + $0x20] sm:$0xff]   ;;  %p3054_p12 = scmp.ne.s32.totalorder %s3053_s9, 0 }
  0xe0   : > { %v539_v29 = vadd.f32 %v2749_v14, %v516_v19  ;;  %v540_v30 = vadd.f32 %v2749_v14, %v517_v20  ;;  %v518_v31 = vmul.f32 %v1687_v21, %v2747_v13  ;;  %v519_v32 = vmul.f32 %v1688_v22, %v2747_v13  ;;  %v2036_v43 = vld [vmem:[#allocation11 + $0x38] sm:$0xff]   ;;  %v2038_v1 = vld [vmem:[%s2736_s17 + $0x8] sm:$0xff]   ;;  %p2226_p0 = por %p2225_p11, %p2224_p6 }
  0xe1   : > { %1851 = vmatpush3.bf16.msra.mxu0 %v2025_v4  ;;  %v543_v44 = vadd.f32 %v2749_v14, %v520_v33  ;;  %v544_v45 = vadd.f32 %v2749_v14, %v521_v34  ;;  %v1699_v46 = vunpack.c.l.bf16 %v1796_v37  ;;  %v522_v50 = vmul.f32 %v1695_v35, %v2747_v13  ;;  %v2040_v23 = vld [vmem:[%s2736_s17 + $0x18] sm:$0xff]   ;;  %p2219_p8 = pnand %p2218_p4, %p3054_p12 }
  0xe2   : > { %1883 = vmatpush3.bf16.msra.mxu1 %v2026_v5  ;;  %1852 = vmatprep.subr.bf16.mxu0 %v2027_v6  ;;  %v555_v38 = vmax.f32 %v539_v29, 0.0  ;;  %v556_v39 = vmax.f32 %v540_v30, 0.0  ;;  %v541_v40 = vadd.f32 %v2749_v14, %v518_v31  ;;  %v542_v41 = vadd.f32 %v2749_v14, %v519_v32 }
  0xe3   : > { %1884 = vmatprep.subr.bf16.mxu1 %v2028_v7  ;;  %v559_v51 = vmax.f32 %v543_v44, 0.0  ;;  %v560_v52 = vmax.f32 %v544_v45, 0.0  ;;  %v523_v53 = vmul.f32 %v1696_v36, %v2747_v13  ;;  %v1700_v54 = vunpack.c.h.bf16 %v1796_v37  ;;  %v2042_v37 = vld [vmem:[%s2736_s17 + $0x28] sm:$0xff]   ;;  %p2220_p9 = pneg %p2219_p8 }
  0xe4   : > { %v571_v47 = vpack.c.bf16 %v556_v39, %v555_v38  ;;  %v557_v48 = vmax.f32 %v541_v40, 0.0  ;;  %v558_v49 = vmax.f32 %v542_v41, 0.0  ;;  %v524_v55 = vmul.f32 %v1699_v46, %v2747_v13  ;;  %v2043_v39 = vld [vmem:[%s2736_s17 + $0x30] sm:$0xff]  }
  0xe5   : > { %1853 = vmatpush3.bf16.msra.mxu0 %v2027_v6  ;;  %v525_v57 = vmul.f32 %v1700_v54, %v2747_v13  ;;  %v545_v60 = vadd.f32 %v2749_v14, %v522_v50  ;;  %v573_v61 = vpack.c.bf16 %v560_v52, %v559_v51  ;;  %v546_v62 = vadd.f32 %v2749_v14, %v523_v53  ;;  %v2039_v6 = vld [vmem:[%s2736_s17 + $0x10] sm:$0xff]   ;;  %p2227_p13 = pnand %p2226_p0, %p2220_p9 }
  0xe6   : > { %1885 = vmatpush3.bf16.msra.mxu1 %v2028_v7  ;;  %1854 = vmatprep.subr.bf16.mxu0 %v2029_v8  ;;  %v572_v59 = vpack.c.bf16 %v558_v49, %v557_v48  ;;  %v1703_v63 = vunpack.c.l.bf16 %v1797_v56  ;;  %v1704_v0 = vunpack.c.h.bf16 %v1797_v56  ;;  %v547_v2 = vadd.f32 %v2749_v14, %v524_v55 }
  0xe7   : > { %1886 = vmatprep.subr.bf16.mxu1 %v2030_v9  ;;  %1862 = vmatprep.mubr.bf16.mxu0 %v571_v47  ;;  %v548_v3 = vadd.f32 %v2749_v14, %v525_v57  ;;  %v1707_v4 = vunpack.c.l.bf16 %v1798_v58  ;;  %v1708_v5 = vunpack.c.h.bf16 %v1798_v58  ;;  %v561_v7 = vmax.f32 %v545_v60, 0.0 }
  0xe8   : > { %v563_v12 = vmax.f32 %v547_v2, 0.0 }
  0xe9   : > { %1855 = vmatpush3.bf16.msra.mxu0 %v2029_v8  ;;  %v562_v8 = vmax.f32 %v546_v62, 0.0  ;;  %v564_v15 = vmax.f32 %v548_v3, 0.0  ;;  %v528_v16 = vmul.f32 %v1707_v4, %v2747_v13  ;;  %v529_v17 = vmul.f32 %v1708_v5, %v2747_v13 }
  0xea   : > { %1887 = vmatpush3.bf16.msra.mxu1 %v2030_v9  ;;  %1856 = vmatprep.subr.bf16.mxu0 %v2031_v10  ;;  %v526_v9 = vmul.f32 %v1703_v63, %v2747_v13 }
  0xeb   : > { %1888 = vmatprep.subr.bf16.mxu1 %v2032_v11  ;;  %v574_v19 = vpack.c.bf16 %v562_v8, %v561_v7  ;;  %v551_v25 = vadd.f32 %v2749_v14, %v528_v16  ;;  %v552_v26 = vadd.f32 %v2749_v14, %v529_v17 }
  0xec   : > { %v549_v20 = vadd.f32 %v2749_v14, %v526_v9 }
  0xed   : > { %1857 = vmatpush3.bf16.msra.mxu0 %v2031_v10  ;;  %v527_v10 = vmul.f32 %v1704_v0, %v2747_v13  ;;  %v567_v32 = vmax.f32 %v551_v25, 0.0  ;;  %v568_v33 = vmax.f32 %v552_v26, 0.0 }
  0xee   : > { %1889 = vmatpush3.bf16.msra.mxu1 %v2032_v11  ;;  %1858 = vmatprep.subr.bf16.mxu0 %v2033_v24  ;;  %v1799_v11 = vld [vmem:[%s2721_s11 + $0x38] sm:$0xff]  }
  0xef   : > { %1890 = vmatprep.subr.bf16.mxu1 %v2034_v28  ;;  %v1711_v18 = vunpack.c.l.bf16 %v1799_v11  ;;  %v550_v21 = vadd.f32 %v2749_v14, %v527_v10  ;;  %v1712_v22 = vunpack.c.h.bf16 %v1799_v11  ;;  %v577_v38 = vpack.c.bf16 %v568_v33, %v567_v32 }
  0xf1   : > { %1859 = vmatpush3.bf16.msra.mxu0 %v2033_v24  ;;  %v575_v24 = vpack.c.bf16 %v564_v15, %v563_v12  ;;  %v566_v29 = vmax.f32 %v550_v21, 0.0  ;;  %v530_v30 = vmul.f32 %v1711_v18, %v2747_v13  ;;  %v531_v31 = vmul.f32 %v1712_v22, %v2747_v13 }
  0xf2   : > { %1891 = vmatpush3.bf16.msra.mxu1 %v2034_v28  ;;  %1860 = vmatprep.subr.bf16.mxu0 %v2035_v42  ;;  %v565_v28 = vmax.f32 %v549_v20, 0.0 }
  0xf3   : > { %1892 = vmatprep.subr.bf16.mxu1 %v2036_v43  ;;  %v553_v35 = vadd.f32 %v2749_v14, %v530_v30  ;;  %v554_v36 = vadd.f32 %v2749_v14, %v531_v31 }
  0xf4   : > { %v576_v34 = vpack.c.bf16 %v566_v29, %v565_v28 }
  0xf5   : > { %1861 = vmatpush3.bf16.msra.mxu0 %v2035_v42  ;;  %v569_v40 = vmax.f32 %v553_v35, 0.0  ;;  %v570_v41 = vmax.f32 %v554_v36, 0.0  ;;  %v2044_v42 = vld [vmem:[%s2736_s17 + $0x38] sm:$0xff]  }
  0xf6   : > { %1893 = vmatpush3.bf16.msra.mxu1 %v2036_v43 }
  0xf7   : > { %v578_v13 = vpack.c.bf16 %v570_v41, %v569_v40 }
  0xf8   : > { %1863 = vmatmul.mubr.bf16.vlgmr.msra.gmra.mrb[0].mxu0 %v572_v59 }
  0xf9   : > { %1895 = vmatmul.mubr.bf16.vlgmr.msra.gmra.mrb[0].mxu1 %v2038_v1  ;;  %1866 = vmatprep.mubr.bf16.mxu0 %v573_v61 }
  0xfa   : > { %1898 = vmatprep.mubr.bf16.mxu1 %v2039_v6 }
 0x100   : > { %1867 = vmatmul.mubr.bf16.gmra.mrb[4].mxu0 %v574_v19 }
 0x101   : > { %1899 = vmatmul.mubr.bf16.gmra.mrb[4].mxu1 %v2040_v23  ;;  %1870 = vmatprep.mubr.bf16.mxu0 %v575_v24 }
 0x102   : > { %1902 = vmatprep.mubr.bf16.mxu1 %v2041_v27 }
 0x108   : > { %1871 = vmatmul.mubr.bf16.gmra.mrb[8].mxu0 %v576_v34 }
 0x109   : > { %1903 = vmatmul.mubr.bf16.gmra.mrb[8].mxu1 %v2042_v37  ;;  %1874 = vmatprep.mubr.bf16.mxu0 %v577_v38 }
 0x10a   : > { %1906 = vmatprep.mubr.bf16.mxu1 %v2043_v39 }
 0x110   : > { %1875 = vmatmul.mubr.bf16.gmra.mrb[12].mxu0 %v578_v13 }
 0x111   : > { %1907 = vmatmul.mubr.bf16.gmra.mrb[12].mxu1 %v2044_v42 }
 0x1cb   : > { %v1864_v43 = vpop.f32.mrb[0].mxu0 }
 0x1cc   : > { %v1896_v44 = vpop.f32.mrb[0].mxu1  ;;  %v677_v45 = vpop.f32.mrb[1].mxu0  ;;  %v763_v60 = vmul.f32 %v1864_v43, %v1864_v43 }
 0x1cd   : > { %v1043_v46 = vpop.f32.mrb[1].mxu1  ;;  %v1865_v47 = vpop.f32.mrb[2].mxu0  ;;  %v761_v14 = vmul.f32 %v677_v45, %v677_v45  ;;  %v1129_v63 = vmul.f32 %v1896_v44, %v1896_v44 }
 0x1ce   : > { %v1721_v48 = vpack.c.bf16 %v1865_v47, %v1864_v43  ;;  %v1897_v49 = vpop.f32.mrb[2].mxu1  ;;  %v680_v50 = vpop.f32.mrb[3].mxu0  ;;  %v1127_v51 = vmul.f32 %v1043_v46, %v1043_v46  ;;  %v764_v2 = vmul.f32 %v1865_v47, %v1865_v47 }
 0x1cf   : > { %v1761_v52 = vpack.c.bf16 %v1897_v49, %v1896_v44  ;;  %v740_v53 = vadd.f32 %v680_v50, %v677_v45  ;;  %v762_v54 = vmul.f32 %v680_v50, %v680_v50  ;;  %v1046_v55 = vpop.f32.mrb[3].mxu1  ;;  %v1716_v56 = vpack.c.bf16 %v680_v50, %v677_v45 }
 0x1d0   : > { %1800 = vst [vmem:[%s2799_s15 + $0x8] sm:$0xff] %v1721_v48   ;;  %v1106_v57 = vadd.f32 %v1046_v55, %v1043_v46  ;;  %v1128_v58 = vmul.f32 %v1046_v55, %v1046_v55  ;;  %v1756_v59 = vpack.c.bf16 %v1046_v55, %v1043_v46  ;;  %v1130_v6 = vmul.f32 %v1897_v49, %v1897_v49 }
 0x1d1   : > { %1807 = vst [vmem:[%s2803_s19 + $0x8] sm:$0xff] %v1761_v52   ;;  %v741_v61 = vadd.f32 %v1864_v43, %v740_v53  ;;  %v777_v62 = vadd.f32 %v762_v54, %v761_v14  ;;  %1717 = vst [vmem:[%s2799_s15] sm:$0xff] %v1716_v56  }
 0x1d2   : > { %v1107_v0 = vadd.f32 %v1896_v44, %v1106_v57  ;;  %v1143_v1 = vadd.f32 %v1128_v58, %v1127_v51  ;;  %1757 = vst [vmem:[%s2803_s19] sm:$0xff] %v1756_v59  }
 0x1d3   : > { %v778_v3 = vadd.f32 %v777_v62, %v763_v60  ;;  %v1868_v4 = vpop.f32.mrb[4].mxu0  ;;  %v742_v5 = vadd.f32 %v1865_v47, %v741_v61 }
 0x1d4   : > { %v1144_v7 = vadd.f32 %v1143_v1, %v1129_v63  ;;  %v1900_v8 = vpop.f32.mrb[4].mxu1  ;;  %v693_v9 = vpop.f32.mrb[5].mxu0  ;;  %v1108_v10 = vadd.f32 %v1897_v49, %v1107_v0  ;;  %v767_v34 = vmul.f32 %v1868_v4, %v1868_v4 }
 0x1d5   : > { %v743_v11 = vadd.f32 %v742_v5, %v693_v9  ;;  %v765_v12 = vmul.f32 %v693_v9, %v693_v9  ;;  %v779_v15 = vadd.f32 %v778_v3, %v764_v2  ;;  %v1059_v16 = vpop.f32.mrb[5].mxu1  ;;  %v1869_v17 = vpop.f32.mrb[6].mxu0  ;;  %v1133_v37 = vmul.f32 %v1900_v8, %v1900_v8 }
 0x1d6   : > { %v1109_v18 = vadd.f32 %v1108_v10, %v1059_v16  ;;  %v1131_v19 = vmul.f32 %v1059_v16, %v1059_v16  ;;  %v1145_v20 = vadd.f32 %v1144_v7, %v1130_v6  ;;  %v1901_v21 = vpop.f32.mrb[6].mxu1  ;;  %v696_v22 = vpop.f32.mrb[7].mxu0  ;;  %v1731_v24 = vpack.c.bf16 %v1869_v17, %v1868_v4 }
 0x1d7   : > { %v780_v23 = vadd.f32 %v779_v15, %v765_v12  ;;  %v1771_v25 = vpack.c.bf16 %v1901_v21, %v1900_v8  ;;  %v1062_v26 = vpop.f32.mrb[7].mxu1  ;;  %v744_v28 = vadd.f32 %v743_v11, %v696_v22  ;;  %v766_v29 = vmul.f32 %v696_v22, %v696_v22 }
 0x1d8   : > { %v1146_v27 = vadd.f32 %v1145_v20, %v1131_v19  ;;  %v1726_v30 = vpack.c.bf16 %v696_v22, %v693_v9  ;;  %1802 = vst [vmem:[%s2799_s15 + $0x18] sm:$0xff] %v1731_v24   ;;  %v1110_v31 = vadd.f32 %v1109_v18, %v1062_v26  ;;  %v1132_v32 = vmul.f32 %v1062_v26, %v1062_v26 }
 0x1d9   : > { %1809 = vst [vmem:[%s2803_s19 + $0x18] sm:$0xff] %v1771_v25   ;;  %v1766_v33 = vpack.c.bf16 %v1062_v26, %v1059_v16  ;;  %v745_v35 = vadd.f32 %v1868_v4, %v744_v28  ;;  %v781_v36 = vadd.f32 %v780_v23, %v766_v29  ;;  %v768_v41 = vmul.f32 %v1869_v17, %v1869_v17 }
 0x1da   : > { %1801 = vst [vmem:[%s2799_s15 + $0x10] sm:$0xff] %v1726_v30   ;;  %v1111_v38 = vadd.f32 %v1900_v8, %v1110_v31  ;;  %v1147_v39 = vadd.f32 %v1146_v27, %v1132_v32  ;;  %v1134_v45 = vmul.f32 %v1901_v21, %v1901_v21 }
 0x1db   : > { %1808 = vst [vmem:[%s2803_s19 + $0x10] sm:$0xff] %v1766_v33   ;;  %v1872_v40 = vpop.f32.mrb[8].mxu0  ;;  %v782_v13 = vadd.f32 %v781_v36, %v767_v34  ;;  %v746_v44 = vadd.f32 %v1869_v17, %v745_v35 }
 0x1dc   : > { %v1904_v42 = vpop.f32.mrb[8].mxu1  ;;  %v709_v43 = vpop.f32.mrb[9].mxu0  ;;  %v1148_v46 = vadd.f32 %v1147_v39, %v1133_v37  ;;  %v1112_v48 = vadd.f32 %v1901_v21, %v1111_v38  ;;  %v771_v3 = vmul.f32 %v1872_v40, %v1872_v40 }
 0x1dd   : > { %v769_v47 = vmul.f32 %v709_v43, %v709_v43  ;;  %v1075_v14 = vpop.f32.mrb[9].mxu1  ;;  %v1873_v49 = vpop.f32.mrb[10].mxu0  ;;  %v747_v50 = vadd.f32 %v746_v44, %v709_v43  ;;  %v783_v51 = vadd.f32 %v782_v13, %v768_v41  ;;  %v1137_v7 = vmul.f32 %v1904_v42, %v1904_v42 }
 0x1de   : > { %v1135_v52 = vmul.f32 %v1075_v14, %v1075_v14  ;;  %v1905_v53 = vpop.f32.mrb[10].mxu1  ;;  %v712_v54 = vpop.f32.mrb[11].mxu0  ;;  %v1113_v55 = vadd.f32 %v1112_v48, %v1075_v14  ;;  %v1149_v56 = vadd.f32 %v1148_v46, %v1134_v45  ;;  %v1741_v57 = vpack.c.bf16 %v1873_v49, %v1872_v40 }
 0x1df   : > { %v1078_v58 = vpop.f32.mrb[11].mxu1  ;;  %v784_v59 = vadd.f32 %v783_v51, %v769_v47  ;;  %v1781_v60 = vpack.c.bf16 %v1905_v53, %v1904_v42  ;;  %v748_v61 = vadd.f32 %v747_v50, %v712_v54  ;;  %v770_v62 = vmul.f32 %v712_v54, %v712_v54 }
 0x1e0   : > { %v1150_v63 = vadd.f32 %v1149_v56, %v1135_v52  ;;  %1804 = vst [vmem:[%s2799_s15 + $0x28] sm:$0xff] %v1741_v57   ;;  %v1736_v0 = vpack.c.bf16 %v712_v54, %v709_v43  ;;  %v1114_v1 = vadd.f32 %v1113_v55, %v1078_v58  ;;  %v1136_v2 = vmul.f32 %v1078_v58, %v1078_v58 }
 0x1e1   : > { %1811 = vst [vmem:[%s2803_s19 + $0x28] sm:$0xff] %v1781_v60   ;;  %v749_v4 = vadd.f32 %v1872_v40, %v748_v61  ;;  %v785_v5 = vadd.f32 %v784_v59, %v770_v62  ;;  %v1776_v6 = vpack.c.bf16 %v1078_v58, %v1075_v14  ;;  %v772_v11 = vmul.f32 %v1873_v49, %v1873_v49 }
 0x1e2   : > { %1803 = vst [vmem:[%s2799_s15 + $0x20] sm:$0xff] %v1736_v0   ;;  %v1115_v8 = vadd.f32 %v1904_v42, %v1114_v1  ;;  %v1151_v9 = vadd.f32 %v1150_v63, %v1136_v2  ;;  %v1138_v18 = vmul.f32 %v1905_v53, %v1905_v53 }
 0x1e3   : > { %v1876_v10 = vpop.f32.mrb[12].mxu0  ;;  %v786_v12 = vadd.f32 %v785_v5, %v771_v3  ;;  %1810 = vst [vmem:[%s2803_s19 + $0x20] sm:$0xff] %v1776_v6   ;;  %v750_v17 = vadd.f32 %v1873_v49, %v749_v4 }
 0x1e4   : > { %v1908_v15 = vpop.f32.mrb[12].mxu1  ;;  %v725_v16 = vpop.f32.mrb[13].mxu0  ;;  %v1152_v19 = vadd.f32 %v1151_v9, %v1137_v7  ;;  %v1116_v22 = vadd.f32 %v1905_v53, %v1115_v8  ;;  %v775_v41 = vmul.f32 %v1876_v10, %v1876_v10 }
 0x1e5   : > { %v773_v20 = vmul.f32 %v725_v16, %v725_v16  ;;  %v1091_v21 = vpop.f32.mrb[13].mxu1  ;;  %v1877_v23 = vpop.f32.mrb[14].mxu0  ;;  %v751_v24 = vadd.f32 %v750_v17, %v725_v16  ;;  %v787_v25 = vadd.f32 %v786_v12, %v772_v11  ;;  %v1141_v44 = vmul.f32 %v1908_v15, %v1908_v15 }
 0x1e6   : > { %v1139_v26 = vmul.f32 %v1091_v21, %v1091_v21  ;;  %v1909_v27 = vpop.f32.mrb[14].mxu1  ;;  %v728_v28 = vpop.f32.mrb[15].mxu0  ;;  %v1117_v29 = vadd.f32 %v1116_v22, %v1091_v21  ;;  %v1153_v30 = vadd.f32 %v1152_v19, %v1138_v18  ;;  %v1751_v31 = vpack.c.bf16 %v1877_v23, %v1876_v10 }
 0x1e7   : > { %v1094_v32 = vpop.f32.mrb[15].mxu1  ;;  %v788_v33 = vadd.f32 %v787_v25, %v773_v20  ;;  %v1791_v34 = vpack.c.bf16 %v1909_v27, %v1908_v15  ;;  %v752_v35 = vadd.f32 %v751_v24, %v728_v28  ;;  %v774_v36 = vmul.f32 %v728_v28, %v728_v28 }
 0x1e8   : > { %v1154_v37 = vadd.f32 %v1153_v30, %v1139_v26  ;;  %1806 = vst [vmem:[%s2799_s15 + $0x38] sm:$0xff] %v1751_v31   ;;  %v1746_v38 = vpack.c.bf16 %v728_v28, %v725_v16  ;;  %v1118_v39 = vadd.f32 %v1117_v29, %v1094_v32  ;;  %v1140_v40 = vmul.f32 %v1094_v32, %v1094_v32 }
 0x1e9   : > { %1813 = vst [vmem:[%s2803_s19 + $0x38] sm:$0xff] %v1791_v34   ;;  %v753_v13 = vadd.f32 %v1876_v10, %v752_v35  ;;  %v789_v42 = vadd.f32 %v788_v33, %v774_v36  ;;  %v1786_v43 = vpack.c.bf16 %v1094_v32, %v1091_v21  ;;  %v776_v47 = vmul.f32 %v1877_v23, %v1877_v23 }
 0x1ea   : > { %1805 = vst [vmem:[%s2799_s15 + $0x30] sm:$0xff] %v1746_v38   ;;  %v1119_v45 = vadd.f32 %v1908_v15, %v1118_v39  ;;  %v1155_v46 = vadd.f32 %v1154_v37, %v1140_v40 }
 0x1eb   : > { %v754_v14 = vadd.f32 %v1877_v23, %v753_v13  ;;  %v790_v48 = vadd.f32 %v789_v42, %v775_v41  ;;  %1812 = vst [vmem:[%s2803_s19 + $0x30] sm:$0xff] %v1786_v43  }
 0x1ec   : > { %2230 = shalt.err (!%p2227_p13)
}
 0x1ed   : > { %s2231_s18 = scalar_lea.hbm %s2823_s22, 1024  ;;  %s2235_s16 = scalar_lea.hbm %s2986_s6, 4096 }
 0x1ee   : > { %p2232_p5 = scmp.ne.s32.totalorder %s2823_s22, %s2231_s18  ;;  %p2236_p1 = scmp.lt.u32.totalorder %s2823_s22, %s2986_s6 }
 0x1ef   : > { %p2237_p10 = scmp.lt.u32.totalorder %s2235_s16, %s2231_s18  ;;  %p2239_p4 = scmp.lt.u32.totalorder %s2231_s18, %s2823_s22 }
 0x1f0   : > { %p2233_p3 = pnand %p2232_p5, %p3054_p12 }
 0x1f1   : > { %p2238_p2 = por %p2237_p10, %p2236_p1 }
 0x1f2   : > { %p2234_p7 = pneg %p2233_p3 }
 0x1f3   : > { %p2240_p8 = por %p2239_p4, %p2238_p2 }
 0x1f5   : > { %p2241_p9 = pnand %p2240_p8, %p2234_p7 }
 0x1f7   : > { %2244 = shalt.err (!%p2241_p9)
}
 0x1f8   : > { %s2402_s24 = smov 64   ;;  %s2403_s11 = smov 4   ;;  %v1142_v49 = vmul.f32 %v1909_v27, %v1909_v27  ;;  %v1120_v50 = vadd.f32 %v1909_v27, %v1119_v45  ;;  %v1156_v51 = vadd.f32 %v1155_v46, %v1141_v44  ;;  %v755_v52 = vrot.slane %v754_v14, 4 }
 0x1f9   : > { %1930 = dma.vmem_to_hbm [thread:$0]  (%p3054_p12), %s2825_s1, 1024, %s2823_s22, %s1247_s28, %s2402_s24, %s2402_s24, %s2403_s11   ;;  %v791_v53 = vadd.f32 %v790_v48, %v776_v47  ;;  %vm798_vm0 = vcmask 1040384  }
 0x1fa   : > { %v1121_v54 = vrot.slane %v1120_v50, 4  ;;  %v1157_v55 = vadd.f32 %v1156_v51, %v1142_v49  ;;  %v756_v56 = vadd.f32 %v755_v52, %v754_v14  ;;  %s1566_s17 = sshll.u32 %s2713_s27, 1  ;;  %s1306_s15 = sshll.u32 %s2803_s19, 4  ;;  %s2861_s15 = int_to_ptr.vmem [resolvable:$true] %s1306_s15 }
 0x1fb   : > { %v792_v57 = vrot.slane %v791_v53, 4  ;;  %s1634_s1 = sshll.u32 %s2478_s13, 5  ;;  %s457_s21 = scalar_lea.vmem [#allocation13], %s1566_s17 }
 0x1fc   : > { %v1122_v58 = vadd.f32 %v1121_v54, %v1120_v50  ;;  %v1158_v59 = vrot.slane %v1157_v55, 4  ;;  %v757_v60 = vrot.slane %v756_v56, 2  ;;  %s1292_s2 = sshll.u32 %s457_s21, 4  ;;  %s2863_s22 = scalar_lea.vmem [#allocation16], %s1566_s17  ;;  %s2871_s2 = int_to_ptr.vmem [resolvable:$true] %s1292_s2 }
 0x1fd   : > { %v793_v61 = vadd.f32 %v792_v57, %v791_v53  ;;  %s1322_s19 = sshll.u32 %s2863_s22, 4  ;;  %s3055_s20 = sld [smem:[#allocation35_spill]]  ;;  %s2885_s19 = int_to_ptr.vmem [resolvable:$true] %s1322_s19 }
 0x1fe   : > { %v1123_v62 = vrot.slane %v1122_v58, 2  ;;  %v1159_v63 = vadd.f32 %v1158_v59, %v1157_v55  ;;  %v758_v0 = vadd.f32 %v757_v60, %v756_v56  ;;  %s3056_s29 = sld [smem:[#allocation36_spill]]  ;;  %s3057_s0 = sld [smem:[#allocation37_spill]] }
 0x1ff   : > { %v794_v1 = vrot.slane %v793_v61, 2  ;;  %s2889_s28 = scalar_lea.sflag [#allocation14], %s388_s23  ;;  %s2245_s7 = scalar_lea.vmem %s2871_s2, 32 }
 0x200   : > { %v1124_v2 = vadd.f32 %v1123_v62, %v1122_v58  ;;  %v1160_v3 = vrot.slane %v1159_v63, 2  ;;  %v759_v4 = vrot.slane %v758_v0, 1  ;;  %p2246_p6 = scmp.ne.s32.totalorder %s2871_s2, %s2245_s7  ;;  %s2404_s8 = smov [#allocation13]  }
 0x201   : > { %v795_v5 = vadd.f32 %v794_v1, %v793_v61 }
 0x202   : > { %v1125_v6 = vrot.slane %v1124_v2, 1  ;;  %v1161_v7 = vadd.f32 %v1160_v3, %v1159_v63  ;;  %v760_v10 = vadd.f32 %v759_v4, %v758_v0  ;;  %p2247_p11 = pnand %p2246_p6, %p3054_p12 }
 0x203   : > { %v796_v8 = vrot.slane %v795_v5, 1  ;;  %s2869_s25 = scalar_lea.hbm %s3055_s20, %s1634_s1 }
 0x204   : > { %v1162_v9 = vrot.slane %v1161_v7, 1  ;;  %v1126_v12 = vadd.f32 %v1125_v6, %v1124_v2  ;;  %s2878_s26 = scalar_lea.hbm %s3056_s29, %s1678_s14  ;;  %s2883_s17 = scalar_lea.hbm %s3057_s0, %s1634_s1 }
 0x205   : > { %v797_v11 = vadd.f32 %v796_v8, %v795_v5  ;;  %p2248_p0 = pneg %p2247_p11  ;;  %s2249_s14 = sshll.u32 %s2404_s8, 4  ;;  %s2250_s14 = int_to_ptr.vmem [resolvable:$false] %s2249_s14 }
 0x206   : > { %v1163_v15 = vadd.f32 %v1162_v9, %v1161_v7  ;;  %p2252_p13 = scmp.lt.s32.totalorder %s2871_s2, %s2250_s14 }
 0x207   : > { %v799_v16 = vsel %vm798_vm0, %v760_v10, %v797_v11 }
 0x208   : > { %800 = vst [vmem:[%s457_s21] sm:$0x3] %v799_v16  ;;  %v1164_v17 = vsel %vm798_vm0, %v1126_v12, %v1163_v15  ;;  %s2251_s21 = scalar_lea.vmem %s2250_s14, 64 }
 0x209   : > { %p2253_p5 = scmp.lt.s32.totalorder %s2251_s21, %s2245_s7 }
 0x20b   : > { %p2254_p3 = por %p2253_p5, %p2252_p13 }
 0x20d   : > { %p2255_p7 = pnand %p2254_p3, %p2248_p0 }
 0x20f   : > { %2258 = shalt.err (!%p2255_p7)
}
 0x210   : > { %s2259_s13 = scalar_lea.hbm %s2869_s25, 32  ;;  %s2263_s18 = scalar_lea.hbm %s3055_s20, 128 }
 0x211   : > { %p2260_p1 = scmp.ne.s32.totalorder %s2869_s25, %s2259_s13  ;;  %p2264_p4 = scmp.lt.u32.totalorder %s2869_s25, %s3055_s20 }
 0x212   : > { %p2265_p8 = scmp.lt.u32.totalorder %s2263_s18, %s2259_s13  ;;  %p2267_p6 = scmp.lt.u32.totalorder %s2259_s13, %s2869_s25 }
 0x213   : > { %p2261_p10 = pnand %p2260_p1, %p3054_p12 }
 0x214   : > { %p2266_p9 = por %p2265_p8, %p2264_p4 }
 0x215   : > { %p2262_p2 = pneg %p2261_p10 }
 0x216   : > { %p2268_p11 = por %p2267_p6, %p2266_p9 }
 0x218   : > { %p2269_p0 = pnand %p2268_p11, %p2262_p2 }
 0x21a   : > { %2272 = shalt.err (!%p2269_p0)
}
 0x21b   : > { %1931 = dma.vmem_to_hbm [thread:$0]  (%p3054_p12), %s2871_s2, 32, %s2869_s25, %s2889_s28   ;;  %1165 = vst [vmem:[%s2863_s22] sm:$0x3] %v1164_v17 }
 0x21c   : > { %s2273_s7 = scalar_lea.vmem %s2861_s15, 1024  ;;  %s2405_s8 = smov [#allocation15]  }
 0x21d   : > { %p2274_p13 = scmp.ne.s32.totalorder %s2861_s15, %s2273_s7  ;;  %s2277_s14 = sshll.u32 %s2405_s8, 4  ;;  %s2278_s14 = int_to_ptr.vmem [resolvable:$false] %s2277_s14 }
 0x21e   : > { %s2279_s21 = scalar_lea.vmem %s2278_s14, 2048  ;;  %p2280_p7 = scmp.lt.s32.totalorder %s2861_s15, %s2278_s14 }
 0x21f   : > { %p2275_p5 = pnand %p2274_p13, %p3054_p12  ;;  %p2281_p1 = scmp.lt.s32.totalorder %s2279_s21, %s2273_s7 }
 0x221   : > { %p2276_p3 = pneg %p2275_p5  ;;  %p2282_p10 = por %p2281_p1, %p2280_p7 }
 0x223   : > { %p2283_p2 = pnand %p2282_p10, %p2276_p3 }
 0x225   : > { %2286 = shalt.err (!%p2283_p2)
}
 0x226   : > { %s2287_s2 = scalar_lea.hbm %s2878_s26, 1024  ;;  %s2291_s13 = scalar_lea.hbm %s3056_s29, 4096 }
 0x227   : > { %p2288_p4 = scmp.ne.s32.totalorder %s2878_s26, %s2287_s2  ;;  %p2292_p6 = scmp.lt.u32.totalorder %s2878_s26, %s3056_s29 }
 0x228   : > { %p2293_p11 = scmp.lt.u32.totalorder %s2291_s13, %s2287_s2  ;;  %p2295_p13 = scmp.lt.u32.totalorder %s2287_s2, %s2878_s26 }
 0x229   : > { %p2289_p8 = pnand %p2288_p4, %p3054_p12 }
 0x22a   : > { %p2294_p0 = por %p2293_p11, %p2292_p6 }
 0x22b   : > { %p2290_p9 = pneg %p2289_p8 }
 0x22c   : > { %p2296_p5 = por %p2295_p13, %p2294_p0 }
 0x22e   : > { %p2297_p3 = pnand %p2296_p5, %p2290_p9 }
 0x230   : > { %2300 = shalt.err (!%p2297_p3)
}
 0x231   : > { %1932 = dma.vmem_to_hbm [thread:$0]  (%p3054_p12), %s2861_s15, 1024, %s2878_s26, %s2889_s28, %s2402_s24, %s2402_s24, %s2403_s11  }
 0x232   : > { %s1262_s18 = scalar_lea.sflag [#allocation17], %s2713_s27  ;;  %s2301_s16 = scalar_lea.vmem %s2885_s19, 32 }
 0x233   : > { %p2302_p7 = scmp.ne.s32.totalorder %s2885_s19, %s2301_s16  ;;  %s2406_s30 = smov [#allocation16]  }
 0x234   : > { %s2305_s7 = sshll.u32 %s2406_s30, 4  ;;  %s2306_s7 = int_to_ptr.vmem [resolvable:$false] %s2305_s7 }
 0x235   : > { %p2303_p1 = pnand %p2302_p7, %p3054_p12  ;;  %s2307_s8 = scalar_lea.vmem %s2306_s7, 64 }
 0x236   : > { %p2308_p2 = scmp.lt.s32.totalorder %s2885_s19, %s2306_s7  ;;  %p2309_p4 = scmp.lt.s32.totalorder %s2307_s8, %s2301_s16 }
 0x237   : > { %p2304_p10 = pneg %p2303_p1 }
 0x238   : > { %p2310_p8 = por %p2309_p4, %p2308_p2 }
 0x23a   : > { %p2311_p9 = pnand %p2310_p8, %p2304_p10 }
 0x23c   : > { %2314 = shalt.err (!%p2311_p9)
}
 0x23d   : > { %s2315_s27 = scalar_lea.hbm %s2883_s17, 32  ;;  %s2319_s15 = scalar_lea.hbm %s3057_s0, 128 }
 0x23e   : > { %p2316_p6 = scmp.ne.s32.totalorder %s2883_s17, %s2315_s27  ;;  %p2320_p13 = scmp.lt.u32.totalorder %s2883_s17, %s3057_s0 }
 0x23f   : > { %p2321_p5 = scmp.lt.u32.totalorder %s2319_s15, %s2315_s27  ;;  %p2323_p7 = scmp.lt.u32.totalorder %s2315_s27, %s2883_s17 }
 0x240   : > { %p2317_p11 = pnand %p2316_p6, %p3054_p12 }
 0x241   : > { %p2322_p3 = por %p2321_p5, %p2320_p13 }
 0x242   : > { %p2318_p0 = pneg %p2317_p11 }
 0x243   : > { %p2324_p1 = por %p2323_p7, %p2322_p3 }
 0x245   : > { %p2325_p10 = pnand %p2324_p1, %p2318_p0 }
 0x247   : > { %2328 = shalt.err (!%p2325_p10)
}
 0x248   : > { %1933 = dma.vmem_to_hbm [thread:$0]  (%p3054_p12), %s2885_s19, 32, %s2883_s17, %s1262_s18  }
 0x249 PF: > { %s3058_s14 = sld [smem:[#allocation26_spill]]  ;;  %s3059_s21 = sld [smem:[#allocation28_spill]] }
 0x24a   : > { %p1980_p2 = scmp.ge.s32.totalorder %s2391_s12, 2 }
 0x24f   : > { %s1334_s2 = sand.u32 1, %s3058_s14   ;;  %p3060_p4 = scmp.ne.s32.totalorder %s3059_s21, 0 }
 0x250   : > { %s1335_s22 = scalar_lea.sflag [#allocation4], %s1334_s2 }
 0x251   : > { %p1959_p8 = pnand %p1980_p2, %p3060_p4 }
 0x253   : > { %2366 = dma.done.wait (!%p1959_p8), %s1335_s22, 1024  }
 0x254   : > { %2368 = vsyncadd (!%p1959_p8), %s1335_s22, 4294966272  ;;  %s3061_s25 = sadd.s32 4294967294, %s2391_s12  }
 0x255   : > { %s1343_s13 = sand.u32 1, %s3061_s25  }
 0x256   : > { %s1344_s23 = scalar_lea.sflag [#allocation14], %s1343_s13 }
 0x257   : > { %2370 = dma.done.wait (!%p1959_p8), %s1344_s23, 1056  }
 0x258   : > { %2372 = vsyncadd (!%p1959_p8), %s1344_s23, 4294966240  ;;  %s1362_s9 = scalar_lea.sflag [#allocation17], %s1334_s2 }
 0x259   : > { %2374 = dma.done.wait (!%p1959_p8), %s1362_s9, 32  }
 0x25a   : > { %2376 = vsyncadd (!%p1959_p8), %s1362_s9, 4294967264  ;;  %s3062_s12 = sld [smem:[#allocation29_spill]]  ;;  %s3063_s19 = sld [smem:[#allocation27_spill]] }
 0x25b   : > { %s3064_s11 = sld [smem:[#allocation31_spill]]  ;;  %s3065_s30 = smov %s2383_s10 }
 0x260   : > { %p31_p12 = scmp.ge.s32.totalorder %s3062_s12, 6   ;;  %s3066_s10 = smov %s3063_s19 }
 0x262   :  { %33 = sbr.rel (!%p31_p12) target bundleno = 18 (0x12), region = 165 }
 0x269   :  { %1367 = vsyncpa [#allocation3], 1 }
 0x26a   :  { %1369 = vsyncpa [#allocation3 + $0x1], 1 }
 0x26b   :  { %1370 = vsyncpa [#allocation6], 1 }
 0x26c   :  { %1371 = vsyncpa [#allocation9], 1 }
 0x26d   :  { %1372 = vsyncpa [#allocation4], 1 }
 0x26e   :  { %1374 = vsyncpa [#allocation4 + $0x1], 1 }
 0x26f   :  { %1375 = vsyncpa [#allocation14], 1 }
 0x270   :  { %1377 = vsyncpa [#allocation14 + $0x1], 1 }
 0x271   :  { %1378 = vsyncpa [#allocation17], 1 }
 0x272   :  { %1380 = vsyncpa [#allocation17 + $0x1], 1 }

// kernel: bottleneck_forward.5
= control target key start
LH: loop header
LB: loop body
LE: loop exit
PB: predicated region body
PF: predicated region fallthrough
CT: control target
= control target key end

     0   :  { %11 = vsyncpa [#allocation4], 0  ;;  %s4770_s0 = inlined_call_operand.hbm [shape: bf16[8,8,8,128], index: 0, kind: input, shape index: {}]   ;;  %s4771_s1 = inlined_call_operand.hbm [shape: bf16[1152,128], index: 1, kind: input, shape index: {}]   ;;  %s4772_s2 = inlined_call_operand.hbm [shape: f32[1,128], index: 2, kind: input, shape index: {}]   ;;  %s4773_s3 = inlined_call_operand.hbm [shape: f32[1,128], index: 3, kind: input, shape index: {}]   ;;  %s4774_s4 = inlined_call_operand.hbm [shape: bf16[8,8,8,128], index: 4, kind: output, shape index: {0}]   ;;  %s4775_s5 = inlined_call_operand.hbm [shape: f32[4,2,128], index: 5, kind: output, shape index: {1}]  }
   0x1   :  { %13 = vsyncpa [#allocation4 + $0x1], 0 }
   0x2   :  { %14 = vsyncpa [#allocation7], 0 }
   0x3   :  { %15 = vsyncpa [#allocation10], 0 }
   0x4   :  { %16 = vsyncpa [#allocation5], 0 }
   0x5   :  { %18 = vsyncpa [#allocation5 + $0x1], 0 }
   0x6   :  { %19 = vsyncpa [#allocation13], 0 }
   0x7   :  { %21 = vsyncpa [#allocation13 + $0x1], 0  ;;  %s3750_s18 = smov 0   ;;  %s3752_s19 = smov 0  }
   0x8   :  { %s3754_s20 = smov 0   ;;  %s3756_s21 = smov 0  }
   0x9 LB: > { %s3771_s22 = sadd.s32 4294967295, %s3707_s21   ;;  %s2651_s23 = sadd.s32 4294967294, %s3707_s21   ;;  %s3707_s21 = sphi %s3756_s21, %s4814_s21   ;;  %s3703_s20 = sphi %s3754_s20, %s4813_s20   ;;  %s3699_s19 = sphi %s3752_s19, %s4812_s19   ;;  %s3695_s18 = sphi %s3750_s18, %s4811_s18  }
   0xa   : > { %p47_p0 = scmp.ne.s32.totalorder %s3699_s19, %s3695_s18  ;;  %p4776_p1 = scmp.eq.s32.totalorder %s3771_s22, 0 }
   0xb   : > { %p140_p3 = scmp.eq.s32.totalorder %s2651_s23, 3  ;;  %p2652_p5 = scmp.ge.s32.totalorder %s3707_s21, 1 }
   0xc   : > { %p3780_p4 = por %p4776_p1, %p47_p0  ;;  %p173_p7 = scmp.lt.s32.totalorder %s3707_s21, 5 }
   0xd   : > { %p3785_p6 = por %p140_p3, %p47_p0  ;;  %s3709_s27 = smov [#allocation6]  }
   0xe   : > { %s4783_s24 = scalar_select %p3780_p4, 1, 0 }
   0xf   : > { %s4784_s25 = scalar_select %p3785_p6, 1, 0 }
  0x10   : > { %p3790_p8 = pnand %p2652_p5, %p173_p7  ;;  %s185_s28 = sshll.u32 %s3709_s27, 4  ;;  %s3794_s28 = int_to_ptr.vmem [resolvable:$true] %s185_s28 }
  0x11   : > { %s3710_s30 = smov [#allocation8]   ;;  %s3711_s7 = smov [#allocation9]  }
  0x12   : > { %s4785_s26 = scalar_select %p3790_p8, 1, 0 }
  0x13   : > { %p3316_p9 = pneg %p3790_p8  ;;  %s199_s6 = sshll.u32 %s3710_s30, 4  ;;  %s3804_s6 = int_to_ptr.vmem [resolvable:$true] %s199_s6 }
  0x14   : > { %s3806_s8 = sshll.u32 %s3711_s7, 4  ;;  %s3487_s11 = scalar_lea.hbm %s4771_s1, 9216  ;;  %s211_s8 = int_to_ptr.vmem [resolvable:$true] %s3806_s8 }
  0x15   : > { %p3800_p10 = pnand %p3316_p9, %p4776_p1  ;;  %p3488_p11 = scmp.ne.s32.totalorder %s4771_s1, %s3487_s11 }
  0x16   : > { %p3494_p3 = scmp.lt.u32.totalorder %s3487_s11, %s4771_s1 }
  0x17   : > { %p3816_p12 = pneg %p3800_p10 }
  0x19   : > { %p3490_p13 = pnand %p3816_p12, %p3488_p11 }
  0x1b   : > { %p3491_p0 = pneg %p3490_p13 }
  0x1d   : > { %p3496_p5 = pnand %p3494_p3, %p3491_p0 }
  0x1f   : > { %3499 = shalt.err (!%p3496_p5)
}
  0x20   : > { %s3500_s17 = scalar_lea.vmem %s3794_s28, 9216  ;;  %p3508_p2 = scmp.lt.s32.totalorder %s3794_s28, %s3794_s28 }
  0x21   : > { %p3501_p7 = scmp.ne.s32.totalorder %s3794_s28, %s3500_s17  ;;  %p3509_p6 = scmp.lt.s32.totalorder %s3500_s17, %s3500_s17 }
  0x23   : > { %p3503_p9 = pnand %p3501_p7, %p3816_p12  ;;  %p3510_p11 = por %p3509_p6, %p3508_p2 }
  0x25   : > { %p3504_p1 = pneg %p3503_p9 }
  0x27   : > { %p3511_p13 = pnand %p3510_p11, %p3504_p1 }
  0x29   : > { %3514 = shalt.err (!%p3511_p13)
}
  0x2a   : > { %s3712_s23 = smov 64   ;;  %s3713_s27 = smov 4  }
  0x2b   : > { %3319 = dma.hbm_to_vmem [thread:$0]  (!%p3800_p10), %s4771_s1, 9216, %s3794_s28, [#allocation7], %s3712_s23, %s3712_s23, %s3713_s27  }
  0x2c   : > { %s3515_s11 = scalar_lea.hbm %s4772_s2, 16 }
  0x2d   : > { %p3516_p1 = scmp.ne.s32.totalorder %s4772_s2, %s3515_s11  ;;  %p3522_p0 = scmp.lt.u32.totalorder %s3515_s11, %s4772_s2 }
  0x2f   : > { %p3518_p2 = pnand %p3516_p1, %p3816_p12 }
  0x31   : > { %p3519_p6 = pneg %p3518_p2 }
  0x33   : > { %p3524_p3 = pnand %p3522_p0, %p3519_p6 }
  0x35   : > { %3527 = shalt.err (!%p3524_p3)
}
  0x36   : > { %s3528_s28 = scalar_lea.vmem %s3804_s6, 16  ;;  %s3535_s17 = scalar_lea.vmem %s3804_s6, 32 }
  0x37   : > { %p3529_p5 = scmp.ne.s32.totalorder %s3804_s6, %s3528_s28  ;;  %p3536_p11 = scmp.lt.s32.totalorder %s3804_s6, %s3804_s6 }
  0x38   : > { %p3537_p13 = scmp.lt.s32.totalorder %s3535_s17, %s3528_s28 }
  0x39   : > { %p3531_p7 = pnand %p3529_p5, %p3816_p12 }
  0x3a   : > { %p3538_p1 = por %p3537_p13, %p3536_p11 }
  0x3b   : > { %p3532_p9 = pneg %p3531_p7 }
  0x3d   : > { %p3539_p2 = pnand %p3538_p1, %p3532_p9 }
  0x3f   : > { %3542 = shalt.err (!%p3539_p2)
}
  0x40   : > { %3322 = dma.hbm_to_vmem [thread:$0]  (!%p3800_p10), %s4772_s2, 16, %s3804_s6, [#allocation7]  }
  0x41   : > { %s3543_s11 = scalar_lea.hbm %s4773_s3, 16 }
  0x42   : > { %p3544_p6 = scmp.ne.s32.totalorder %s4773_s3, %s3543_s11  ;;  %p3550_p5 = scmp.lt.u32.totalorder %s3543_s11, %s4773_s3 }
  0x44   : > { %p3546_p0 = pnand %p3544_p6, %p3816_p12 }
  0x46   : > { %p3547_p3 = pneg %p3546_p0 }
  0x48   : > { %p3552_p7 = pnand %p3550_p5, %p3547_p3 }
  0x4a   : > { %3555 = shalt.err (!%p3552_p7)
}
  0x4b   : > { %s3556_s28 = scalar_lea.vmem %s211_s8, 16  ;;  %s3563_s6 = scalar_lea.vmem %s211_s8, 32 }
  0x4c   : > { %p3557_p9 = scmp.ne.s32.totalorder %s211_s8, %s3556_s28  ;;  %p3564_p1 = scmp.lt.s32.totalorder %s211_s8, %s211_s8 }
  0x4d   : > { %p3565_p2 = scmp.lt.s32.totalorder %s3563_s6, %s3556_s28 }
  0x4e   : > { %p3559_p11 = pnand %p3557_p9, %p3816_p12 }
  0x4f   : > { %p3566_p4 = por %p3565_p2, %p3564_p1 }
  0x50   : > { %p3560_p13 = pneg %p3559_p11 }
  0x52   : > { %p3567_p8 = pnand %p3566_p4, %p3560_p13 }
  0x54   : > { %3570 = shalt.err (!%p3567_p8)
}
  0x55   : > { %3325 = dma.hbm_to_vmem [thread:$0]  (!%p3800_p10), %s4773_s3, 16, %s211_s8, [#allocation10]  }
  0x56   : > { %s3884_s14 = sadd.s32 1, %s3707_s21   ;;  %s34_s29 = sadd.s32 1, %s3703_s20 }
  0x57   : > { %s31_s7 = ssub.s32 %s3707_s21, %s3884_s14  ;;  %p41_p8 = scmp.ne.s32.totalorder %s3703_s20, %s3699_s19 }
  0x58   : > { %p32_p4 = scmp.eq.s32.totalorder %s31_s7, 0  ;;  %p42_p12 = scmp.eq.s32.totalorder %s3707_s21, 0 }
  0x59   : > { %p3340_p6 = scmp.lt.s32.totalorder %s3707_s21, 4  ;;  %p4788_p3 = scmp.eq.s32.totalorder %s3771_s22, 3 }
  0x5a   : > { %s3894_s9 = scalar_select %p32_p4, %s3703_s20, %s34_s29  }
  0x5b   : > { %p43_p0 = por %p42_p12, %p41_p8  ;;  %p3898_p5 = por %p4788_p3, %p41_p8 }
  0x5c   : > { %s221_s11 = sand.u32 1, %s3703_s20   ;;  %s2857_s12 = sshll.u32 %s3707_s21, 10 }
  0x5d   : > { %s2657_s8 = sshll.u32 %s221_s11, 6  ;;  %s3907_s16 = scalar_lea.hbm %s4770_s0, %s2857_s12 }
  0x5e   : > { %s225_s28 = scalar_lea.vmem [#allocation3], %s2657_s8  ;;  %p3909_p10 = pnand %p3340_p6, %p43_p0 }
  0x5f   : > { %s233_s6 = sshll.u32 %s225_s28, 4  ;;  %s3915_s30 = scalar_lea.sflag [#allocation4], %s221_s11  ;;  %s3913_s6 = int_to_ptr.vmem [resolvable:$true] %s233_s6 }
  0x60   : > { %s3571_s7 = scalar_lea.hbm %s3907_s16, 1024  ;;  %p3573_p9 = pneg %p3909_p10 }
  0x61   : > { %p3572_p7 = scmp.ne.s32.totalorder %s3907_s16, %s3571_s7  ;;  %s3576_s8 = scalar_lea.hbm %s4770_s0, 4096 }
  0x62   : > { %p3577_p1 = scmp.lt.u32.totalorder %s3907_s16, %s4770_s0  ;;  %p3578_p2 = scmp.lt.u32.totalorder %s3576_s8, %s3571_s7 }
  0x63   : > { %p3574_p11 = pnand %p3573_p9, %p3572_p7  ;;  %p3580_p8 = scmp.lt.u32.totalorder %s3571_s7, %s3907_s16 }
  0x64   : > { %p3579_p4 = por %p3578_p2, %p3577_p1 }
  0x65   : > { %p3575_p13 = pneg %p3574_p11 }
  0x66   : > { %p3581_p12 = por %p3580_p8, %p3579_p4 }
  0x68   : > { %p3582_p6 = pnand %p3581_p12, %p3575_p13 }
  0x6a   : > { %3585 = shalt.err (!%p3582_p6)
}
  0x6b   : > { %s3586_s11 = scalar_lea.vmem %s3913_s6, 1024  ;;  %s3714_s28 = smov [#allocation3]  }
  0x6c   : > { %p3587_p0 = scmp.ne.s32.totalorder %s3913_s6, %s3586_s11  ;;  %s3591_s29 = sshll.u32 %s3714_s28, 4  ;;  %s3592_s29 = int_to_ptr.vmem [resolvable:$false] %s3591_s29 }
  0x6d   : > { %s3593_s12 = scalar_lea.vmem %s3592_s29, 2048  ;;  %p3594_p11 = scmp.lt.s32.totalorder %s3913_s6, %s3592_s29 }
  0x6e   : > { %p3589_p3 = pnand %p3587_p0, %p3573_p9  ;;  %p3595_p1 = scmp.lt.s32.totalorder %s3593_s12, %s3586_s11 }
  0x70   : > { %p3590_p7 = pneg %p3589_p3  ;;  %p3596_p2 = por %p3595_p1, %p3594_p11 }
  0x72   : > { %p3597_p4 = pnand %p3596_p2, %p3590_p7 }
  0x74   : > { %3600 = shalt.err (!%p3597_p4)
}
  0x75   : > { %3329 = dma.hbm_to_vmem [thread:$0]  (!%p3909_p10), %s3907_s16, 1024, %s3913_s6, %s3915_s30, %s3712_s23, %s3712_s23, %s3713_s27  }
  0x76   : > { %p4791_p9 = scmp.ne.s32.totalorder %s4785_s26, 0 }
  0x77   : > { %s3949_s7 = sand.u32 (!%p4791_p9), 1, %s3699_s19   ;;  %p4792_p13 = scmp.ne.s32.totalorder (!%p4791_p9), %s4783_s24, 0 }
  0x78   : > { %245 = sbr.rel (%p4791_p9) target bundleno = 625 (0x271), region = 36  ;;  %s2662_s8 = sshll.u32 (!%p4791_p9), %s3949_s7, 6 }
  0x79   : > { %s248_s13 = scalar_lea.sflag (!%p4791_p9), [#allocation4], %s3949_s7  ;;  %s3955_s17 = scalar_lea.vmem (!%p4791_p9), [#allocation3], %s2662_s8 }
  0x7f   : > { %3674 = dma.done.wait (%p4792_p13), %s248_s13, 1024  }
  0x80   : > { %3676 = vsyncadd (%p4792_p13), %s248_s13, 4294966272  ;;  %p4793_p10 = scmp.eq.s32.totalorder %s3771_s22, 0 }
  0x82   : > { %3678 = dma.done.wait (%p4793_p10), [#allocation7], 9232   ;;  %p4794_p8 = pmov %p4793_p10 }
  0x84   : > { %3680 = vsyncadd (%p4794_p8), [#allocation7], 4294958064  ;;  %p4795_p12 = pmov %p4794_p8 }
  0x85   : > { %p4796_p6 = pmov %p4794_p8 }
  0x86   : > { %3682 = dma.done.wait (%p4795_p12), [#allocation10], 16  }
  0x87   : > { %3684 = vsyncadd (%p4796_p6), [#allocation10], 4294967280  ;;  %v3715_v0 = vmov 0   ;;  %v3385_v1 = vld [vmem:[#allocation6 + $0xc0] sm:$0xff]   ;;  %v3389_v5 = vld [vmem:[#allocation6 + $0xc8] sm:$0xff]   ;;  %vm449_vm2 = vcmask 1040384  }
  0x88   : > { %440 = vst [vmem:[#allocation2] sm:$0xf] %v3715_v0  ;;  %441 = vst [vmem:[#allocation2 + $0x4] sm:$0x1] %v3715_v0  ;;  %v3386_v2 = vld [vmem:[#allocation6 + $0x40] sm:$0xff]   ;;  %3042 = vmatprep.subr.bf16.mxu1 %v3385_v1  ;;  %v3390_v6 = vld [vmem:[#allocation6 + $0x48] sm:$0xff]  }
  0x89   : > { %442 = vst [vmem:[#allocation2 + $0x50] sm:$0xf] %v3715_v0  ;;  %443 = vst [vmem:[#allocation2 + $0x54] sm:$0x1] %v3715_v0  ;;  %v3387_v3 = vld [vmem:[#allocation6 + $0x80] sm:$0xff]   ;;  %2978 = vmatprep.subr.bf16.mxu0 %v3386_v2  ;;  %v3391_v7 = vld [vmem:[#allocation6 + $0x88] sm:$0xff]  }
  0x8a   : > { %445 = vst [vmem:[#allocation2 + $0x48] sm:$0xf] %v3715_v0  ;;  %446 = vst [vmem:[#allocation2 + $0x4c] sm:$0x1] %v3715_v0  ;;  %v3388_v4 = vld [vmem:[#allocation6] sm:$0xff]   ;;  %3043 = vmatpush3.bf16.msra.mxu1 %v3387_v3  ;;  %v3392_v8 = vld [vmem:[#allocation6 + $0x8] sm:$0xff]  }
  0x8b   : > { %447 = vst [vmem:[#allocation2 + $0x98] sm:$0xf] %v3715_v0  ;;  %448 = vst [vmem:[#allocation2 + $0x9c] sm:$0x1] %v3715_v0  ;;  %2979 = vmatpush3.bf16.msra.mxu0 %v3388_v4  ;;  %3044 = vmatprep.subr.bf16.mxu1 %v3389_v5  ;;  %v3393_v9 = vld [vmem:[#allocation6 + $0xd0] sm:$0xff]   ;;  %v3397_v13 = vld [vmem:[#allocation6 + $0xd8] sm:$0xff]  }
  0x8c   : > { %2980 = vmatprep.subr.bf16.mxu0 %v3390_v6  ;;  %v3394_v10 = vld [vmem:[#allocation6 + $0x50] sm:$0xff]   ;;  %vm450_vm0 = vsmask.f32 256  ;;  %vm512_vm1 = vsmask.f32 7938  ;;  %v3398_v14 = vld [vmem:[#allocation6 + $0x58] sm:$0xff]  }
  0x8d   : > { %v3395_v11 = vld [vmem:[#allocation6 + $0x90] sm:$0xff]   ;;  %v3399_v15 = vld [vmem:[#allocation6 + $0x98] sm:$0xff]   ;;  %v3401_v17 = vld [vmem:[#allocation6 + $0xe0] sm:$0xff]   ;;  %vm735_vm5 = vcmask 1043456   ;;  %s4635_s24 = scalar_lea.vmem [#allocation11], %s2662_s8  ;;  %s2891_s26 = sshll.u32 %s3771_s22, 10 }
  0x8e   : > { %3045 = vmatpush3.bf16.msra.mxu1 %v3391_v7  ;;  %v3396_v12 = vld [vmem:[#allocation6 + $0x10] sm:$0xff]   ;;  %v3400_v16 = vld [vmem:[#allocation6 + $0x18] sm:$0xff]   ;;  %v3402_v18 = vld [vmem:[#allocation6 + $0x60] sm:$0xff]   ;;  %s2504_s23 = sshll.u32 %s4635_s24, 4  ;;  %s4667_s6 = scalar_lea.hbm %s4774_s4, %s2891_s26  ;;  %s4669_s23 = int_to_ptr.vmem [resolvable:$true] %s2504_s23 }
  0x8f   : > { %2981 = vmatpush3.bf16.msra.mxu0 %v3392_v8  ;;  %3046 = vmatprep.subr.bf16.mxu1 %v3393_v9  ;;  %v3403_v19 = vld [vmem:[#allocation6 + $0xa0] sm:$0xff]   ;;  %v3405_v21 = vld [vmem:[#allocation6 + $0xe8] sm:$0xff]   ;;  %vm3971_vm3 = vmand %vm449_vm2, %vm450_vm0  ;;  %s2485_s30 = scalar_lea.sflag [#allocation5], %s3949_s7  ;;  %s3601_s15 = scalar_lea.vmem %s4669_s23, 1024 }
  0x90   : > { %2982 = vmatprep.subr.bf16.mxu0 %v3394_v10  ;;  %v3404_v20 = vld [vmem:[#allocation6 + $0x20] sm:$0xff]   ;;  %v3406_v22 = vld [vmem:[#allocation6 + $0x68] sm:$0xff]   ;;  %vm3977_vm4 = vmand %vm449_vm2, %vm512_vm1  ;;  %p3602_p0 = scmp.ne.s32.totalorder %s4669_s23, %s3601_s15  ;;  %s3716_s11 = smov [#allocation11]  }
  0x91   : > { %v3407_v23 = vld [vmem:[#allocation6 + $0xa8] sm:$0xff]   ;;  %v3409_v27 = vld [vmem:[#allocation6 + $0xf0] sm:$0xff]   ;;  %v3413_v31 = vld [vmem:[#allocation6 + $0xf8] sm:$0xff]   ;;  %s3605_s28 = sshll.u32 %s3716_s11, 4  ;;  %s3606_s28 = int_to_ptr.vmem [resolvable:$false] %s3605_s28 }
  0x92   : > { %3047 = vmatpush3.bf16.msra.mxu1 %v3395_v11  ;;  %v3408_v24 = vld [vmem:[#allocation6 + $0x28] sm:$0xff]   ;;  %v3410_v28 = vld [vmem:[#allocation6 + $0x70] sm:$0xff]   ;;  %v3414_v32 = vld [vmem:[#allocation6 + $0x78] sm:$0xff]   ;;  %p3603_p3 = pnand %p3602_p0, %p3898_p5  ;;  %s3607_s29 = scalar_lea.vmem %s3606_s28, 2048 }
  0x93   : > { %2983 = vmatpush3.bf16.msra.mxu0 %v3396_v12  ;;  %3048 = vmatprep.subr.bf16.mxu1 %v3397_v13  ;;  %v3411_v29 = vld [vmem:[#allocation6 + $0xb0] sm:$0xff]   ;;  %v3415_v33 = vld [vmem:[#allocation6 + $0xb8] sm:$0xff]   ;;  %v2893_v35 = vld [vmem:[%s3955_s17] sm:$0xff]   ;;  %p3608_p11 = scmp.lt.s32.totalorder %s4669_s23, %s3606_s28  ;;  %p3609_p1 = scmp.lt.s32.totalorder %s3607_s29, %s3601_s15 }
  0x94   : > { %2984 = vmatprep.subr.bf16.mxu0 %v3398_v14  ;;  %v3412_v30 = vld [vmem:[#allocation6 + $0x30] sm:$0xff]   ;;  %v3416_v34 = vld [vmem:[#allocation6 + $0x38] sm:$0xff]   ;;  %v3982_v36 = vld [vmem:[#allocation8] ss:$0 sm:$0xff]  ;;  %v2894_v38 = vunpack.c.l.bf16 %v2893_v35  ;;  %v2895_v39 = vunpack.c.h.bf16 %v2893_v35  ;;  %p3604_p7 = pneg %p3603_p3 }
  0x95   : > { %v3984_v37 = vld [vmem:[#allocation9] ss:$0 sm:$0xff]  ;;  %v455_v40 = vld [vmem:[#allocation2 + $0x8] sm:$0x1]  ;;  %v458_v41 = vld [vmem:[#allocation2 + $0x10] sm:$0x1]  ;;  %p3610_p2 = por %p3609_p1, %p3608_p11 }
  0x96   : > { %3049 = vmatpush3.bf16.msra.mxu1 %v3399_v15  ;;  %v517_v42 = vld [vmem:[#allocation2 + $0xc] sm:$0x1]  ;;  %v456_v43 = vsel %vm3971_vm3, 0, %v455_v40  ;;  %v459_v44 = vsel %vm3971_vm3, 0, %v458_v41  ;;  %v520_v46 = vld [vmem:[#allocation2 + $0x14] sm:$0x1]  ;;  %v337_v48 = vmul.f32 %v2894_v38, %v3982_v36  ;;  %v338_v49 = vmul.f32 %v2895_v39, %v3982_v36  ;;  %vm4018_vm6 = vmand %vm735_vm5, %vm512_vm1 }
  0x97   : > { %2985 = vmatpush3.bf16.msra.mxu0 %v3400_v16  ;;  %3050 = vmatprep.subr.bf16.mxu1 %v3401_v17  ;;  %v518_v45 = vsel %vm3977_vm4, 0, %v517_v42  ;;  %v3421_v47 = vld [vmem:[#allocation6 + $0x140] sm:$0xff]   ;;  %457 = vst [vmem:[#allocation2 + $0x8] sm:$0x1] %v456_v43  ;;  %460 = vst [vmem:[#allocation2 + $0x10] sm:$0x1] %v459_v44  ;;  %p3611_p4 = pnand %p3610_p2, %p3604_p7 }
  0x98   : > { %2986 = vmatprep.subr.bf16.mxu0 %v3402_v18  ;;  %519 = vst [vmem:[#allocation2 + $0xc] sm:$0x1] %v518_v45  ;;  %v521_v50 = vsel %vm3977_vm4, 0, %v520_v46  ;;  %v452_v51 = vld [vmem:[#allocation2] sm:$0x1]  ;;  %v360_v55 = vadd.f32 %v3984_v37, %v337_v48  ;;  %v361_v56 = vadd.f32 %v3984_v37, %v338_v49  ;;  %v2964_v57 = vld [vmem:[%s3955_s17 + $0x8] sm:$0xff]  }
  0x99   : > { %v514_v52 = vld [vmem:[#allocation2 + $0x4] sm:$0x1]  ;;  %522 = vst [vmem:[#allocation2 + $0x14] sm:$0x1] %v521_v50  ;;  %v453_v53 = vsel %vm3971_vm3, 0, %v452_v51  ;;  %v2898_v58 = vunpack.c.l.bf16 %v2964_v57  ;;  %v2899_v59 = vunpack.c.h.bf16 %v2964_v57 }
  0x9a   : > { %3051 = vmatpush3.bf16.msra.mxu1 %v3403_v19  ;;  %v515_v54 = vsel %vm3977_vm4, 0, %v514_v52  ;;  %454 = vst [vmem:[#allocation2] sm:$0x1] %v453_v53  ;;  %v461_v60 = vld [vmem:[#allocation2 + $0x18] sm:$0x1]  ;;  %v376_v63 = vmax.f32 %v360_v55, 0.0 }
  0x9b   : > { %2987 = vmatpush3.bf16.msra.mxu0 %v3404_v20  ;;  %3052 = vmatprep.subr.bf16.mxu1 %v3405_v21  ;;  %516 = vst [vmem:[#allocation2 + $0x4] sm:$0x1] %v515_v54  ;;  %v464_v61 = vld [vmem:[#allocation2 + $0x20] sm:$0x1]  ;;  %v523_v62 = vld [vmem:[#allocation2 + $0x1c] sm:$0x1]  ;;  %v339_v4 = vmul.f32 %v2898_v58, %v3982_v36  ;;  %v340_v5 = vmul.f32 %v2899_v59, %v3982_v36 }
  0x9c   : > { %2988 = vmatprep.subr.bf16.mxu0 %v3406_v22  ;;  %v377_v0 = vmax.f32 %v361_v56, 0.0  ;;  %v462_v1 = vsel %vm3971_vm3, 0, %v461_v60  ;;  %v465_v2 = vsel %vm3971_vm3, 0, %v464_v61  ;;  %v526_v3 = vld [vmem:[#allocation2 + $0x24] sm:$0x1]  ;;  %v524_v6 = vsel %vm3977_vm4, 0, %v523_v62 }
  0x9d   : > { %463 = vst [vmem:[#allocation2 + $0x18] sm:$0x1] %v462_v1  ;;  %466 = vst [vmem:[#allocation2 + $0x20] sm:$0x1] %v465_v2  ;;  %v527_v7 = vsel %vm3977_vm4, 0, %v526_v3  ;;  %v2858_v8 = vpack.c.bf16 %v376_v63, %v376_v63  ;;  %v362_v10 = vadd.f32 %v3984_v37, %v339_v4  ;;  %v363_v11 = vadd.f32 %v3984_v37, %v340_v5  ;;  %v3432_v58 = vld [vmem:[#allocation6 + $0x1c0] sm:$0xff]  }
  0x9e   : > { %3053 = vmatpush3.bf16.msra.mxu1 %v3407_v23  ;;  %v2859_v9 = vpack.c.bf16 %v377_v0, %v377_v0  ;;  %525 = vst [vmem:[#allocation2 + $0x1c] sm:$0x1] %v524_v6  ;;  %528 = vst [vmem:[#allocation2 + $0x24] sm:$0x1] %v527_v7  ;;  %v737_v23 = vld [vmem:[#allocation2 + $0x8] sm:$0xf] }
  0x9f   : > { %2989 = vmatpush3.bf16.msra.mxu0 %v3408_v24  ;;  %3054 = vmatprep.subr.bf16.mxu1 %v3409_v27  ;;  %v575_v12 = vshrl.u32 %v2858_v8, 16  ;;  %v578_v13 = vshll.u32 %v2858_v8, 16  ;;  %v378_v18 = vmax.f32 %v362_v10, 0.0  ;;  %v379_v19 = vmax.f32 %v363_v11, 0.0  ;;  %v2965_v27 = vld [vmem:[%s3955_s17 + $0x10] sm:$0xff]  }
  0xa0   : > { %2990 = vmatprep.subr.bf16.mxu0 %v3410_v28  ;;  %v583_v14 = vshrl.u32 %v2859_v9, 16  ;;  %v586_v15 = vshll.u32 %v2859_v9, 16  ;;  %v740_v28 = vld [vmem:[#allocation2 + $0xc] sm:$0x1]  ;;  %v467_v41 = vld [vmem:[#allocation2 + $0x28] sm:$0x1] }
  0xa1   : > { %v4015_v16 = vld [vmem:[#allocation2] sm:$0xf]  ;;  %v577_v20 = vrot.slane %v575_v12, 7  ;;  %v470_v45 = vld [vmem:[#allocation2 + $0x30] sm:$0x1]  ;;  %v468_v63 = vsel %vm3971_vm3, 0, %v467_v41 }
  0xa2   : > { %3055 = vmatpush3.bf16.msra.mxu1 %v3411_v29  ;;  %v978_v17 = vld [vmem:[#allocation2 + $0x4] sm:$0x1]  ;;  %v585_v21 = vrot.slane %v583_v14, 7  ;;  %v743_v29 = vld [vmem:[#allocation2 + $0x10] sm:$0xf]  ;;  %v471_v6 = vsel %vm3971_vm3, 0, %v470_v45 }
  0xa3   : > { %2991 = vmatpush3.bf16.msra.mxu0 %v3412_v30  ;;  %3056 = vmatprep.subr.bf16.mxu1 %v3413_v31  ;;  %v4023_v24 = vcombine.low %v4015_v16, %v978_v17  ;;  %v746_v30 = vld [vmem:[#allocation2 + $0x14] sm:$0x1]  ;;  %v2860_v31 = vpack.c.bf16 %v378_v18, %v378_v18  ;;  %v580_v35 = vor.u32 %v578_v13, %v577_v20  ;;  %v581_v38 = vrot.slane %v577_v20, 4  ;;  %v529_v46 = vld [vmem:[#allocation2 + $0x2c] sm:$0x1]  ;;  %v2966_v12 = vld [vmem:[%s3955_s17 + $0x18] sm:$0xff]  }
  0xa4   : > { %2992 = vmatprep.subr.bf16.mxu0 %v3414_v32  ;;  %v2861_v32 = vpack.c.bf16 %v379_v19, %v379_v19  ;;  %v588_v39 = vor.u32 %v586_v15, %v585_v21  ;;  %v589_v40 = vrot.slane %v585_v21, 4  ;;  %v749_v51 = vld [vmem:[#allocation2 + $0x18] sm:$0xf]  ;;  %v532_v57 = vld [vmem:[#allocation2 + $0x34] sm:$0x1]  ;;  %v530_v7 = vsel %vm3977_vm4, 0, %v529_v46 }
  0xa5   : > { %v1098_v42 = vshrl.u32 %v4023_v24, 16  ;;  %v1100_v43 = vshll.u32 %v4023_v24, 16  ;;  %v591_v44 = vshrl.u32 %v2860_v31, 16  ;;  %v741_v48 = vsel %vm3971_vm3, %v581_v38, %v740_v28  ;;  %v752_v52 = vld [vmem:[#allocation2 + $0x1c] sm:$0x1] }
  0xa6   : > { %3057 = vmatpush3.bf16.msra.mxu1 %v3415_v33  ;;  %v2902_v33 = vunpack.c.l.bf16 %v2965_v27  ;;  %v744_v49 = vsel %vm4018_vm6, %v588_v39, %v743_v29  ;;  %v747_v50 = vsel %vm3971_vm3, %v589_v40, %v746_v30  ;;  %742 = vst [vmem:[#allocation2 + $0xc] sm:$0x1] %v741_v48  ;;  %v594_v55 = vshll.u32 %v2860_v31, 16  ;;  %v755_v60 = vld [vmem:[#allocation2 + $0x20] sm:$0xf] }
  0xa7   : > { %2993 = vmatpush3.bf16.msra.mxu0 %v3416_v34  ;;  %v2903_v34 = vunpack.c.h.bf16 %v2965_v27  ;;  %745 = vst [vmem:[#allocation2 + $0x10] sm:$0xf] %v744_v49  ;;  %748 = vst [vmem:[#allocation2 + $0x14] sm:$0x1] %v747_v50  ;;  %v1102_v53 = vrot.slane %v1100_v43, 1  ;;  %v593_v54 = vrot.slane %v591_v44, 7  ;;  %3170 = vmatprep.subr.bf16.mxu1 %v3432_v58  ;;  %v2906_v18 = vunpack.c.l.bf16 %v2966_v12 }
  0xa8   : > { %3106 = vmatprep.subr.bf16.mxu0 %v3421_v47  ;;  %v738_v47 = vsel %vm4018_vm6, %v580_v35, %v737_v23  ;;  %v599_v56 = vshrl.u32 %v2861_v32, 16  ;;  %v602_v59 = vshll.u32 %v2861_v32, 16  ;;  %v341_v61 = vmul.f32 %v2902_v33, %v3982_v36  ;;  %469 = vst [vmem:[#allocation2 + $0x28] sm:$0x1] %v468_v63  ;;  %v758_v3 = vld [vmem:[#allocation2 + $0x24] sm:$0x1] }
  0xa9   : > { %739 = vst [vmem:[#allocation2 + $0x8] sm:$0xf] %v738_v47  ;;  %v342_v62 = vmul.f32 %v2903_v34, %v3982_v36  ;;  %v596_v0 = vor.u32 %v594_v55, %v593_v54  ;;  %v597_v1 = vrot.slane %v593_v54, 4  ;;  %472 = vst [vmem:[#allocation2 + $0x30] sm:$0x1] %v471_v6  ;;  %v533_v17 = vsel %vm3977_vm4, 0, %v532_v57 }
  0xaa   : > { %v601_v2 = vrot.slane %v599_v56, 7  ;;  %v364_v4 = vadd.f32 %v3984_v37, %v341_v61  ;;  %531 = vst [vmem:[#allocation2 + $0x2c] sm:$0x1] %v530_v7  ;;  %v473_v13 = vld [vmem:[#allocation2 + $0x38] sm:$0x1]  ;;  %v1209_v19 = vrot.slane %v4023_v24, 1  ;;  %v4064_v30 = vor.u32 %v1102_v53, %v1098_v42 }
  0xab   : > { %v365_v5 = vadd.f32 %v3984_v37, %v342_v62  ;;  %v750_v10 = vsel %vm4018_vm6, %v596_v0, %v749_v51  ;;  %v753_v11 = vsel %vm3971_vm3, %v597_v1, %v752_v52  ;;  %534 = vst [vmem:[#allocation2 + $0x34] sm:$0x1] %v533_v17  ;;  %v474_v23 = vsel %vm3971_vm3, 0, %v473_v13  ;;  %v3434_v44 = vld [vmem:[#allocation6 + $0x180] sm:$0xff]   ;;  %v3439_v49 = vld [vmem:[#allocation6 + $0x1c8] sm:$0xff]  }
  0xac   : > { %v604_v8 = vor.u32 %v602_v59, %v601_v2  ;;  %v605_v9 = vrot.slane %v601_v2, 4  ;;  %751 = vst [vmem:[#allocation2 + $0x18] sm:$0xf] %v750_v10  ;;  %754 = vst [vmem:[#allocation2 + $0x1c] sm:$0x1] %v753_v11  ;;  %v380_v14 = vmax.f32 %v364_v4, 0.0  ;;  %v2907_v32 = vunpack.c.h.bf16 %v2966_v12 }
  0xad   : > { %v381_v15 = vmax.f32 %v365_v5, 0.0  ;;  %v980_v28 = vld [vmem:[#allocation2 + $0xc] sm:$0x1]  ;;  %475 = vst [vmem:[#allocation2 + $0x38] sm:$0x1] %v474_v23  ;;  %v343_v39 = vmul.f32 %v2906_v18, %v3982_v36  ;;  %v3422_v4 = vld [vmem:[#allocation6 + $0x100] sm:$0xff]  }
  0xae   : > { %v756_v20 = vsel %vm4018_vm6, %v604_v8, %v755_v60  ;;  %v759_v21 = vsel %vm3971_vm3, %v605_v9, %v758_v3  ;;  %v4062_v29 = vld [vmem:[#allocation2 + $0x10] sm:$0xf]  ;;  %v2862_v24 = vpack.c.bf16 %v380_v14, %v380_v14  ;;  %v982_v33 = vld [vmem:[#allocation2 + $0x14] sm:$0x1]  ;;  %v344_v60 = vmul.f32 %v2907_v32, %v3982_v36  ;;  %v476_v10 = vld [vmem:[#allocation2 + $0x40] sm:$0x1] }
  0xaf   : > { %757 = vst [vmem:[#allocation2 + $0x20] sm:$0xf] %v756_v20  ;;  %760 = vst [vmem:[#allocation2 + $0x24] sm:$0x1] %v759_v21  ;;  %v2863_v31 = vpack.c.bf16 %v381_v15, %v381_v15  ;;  %v4075_v40 = vcombine.low %v4062_v29, %v982_v33  ;;  %v761_v54 = vld [vmem:[#allocation2 + $0x28] sm:$0xf]  ;;  %v366_v2 = vadd.f32 %v3984_v37, %v343_v39 }
  0xb0   : > { %v4060_v27 = vld [vmem:[#allocation2 + $0x8] sm:$0xf]  ;;  %v607_v41 = vshrl.u32 %v2862_v24, 16  ;;  %v610_v42 = vshll.u32 %v2862_v24, 16  ;;  %v767_v1 = vld [vmem:[#allocation2 + $0x30] sm:$0xf] }
  0xb1   : > { %v4067_v34 = vcombine.low %v4060_v27, %v980_v28  ;;  %v2709_v35 = vcombine.low %v4060_v27, %v4062_v29  ;;  %v2706_v38 = vcombine.low %v4015_v16, %v4060_v27  ;;  %v615_v43 = vshrl.u32 %v2863_v31, 16  ;;  %v764_v0 = vld [vmem:[#allocation2 + $0x2c] sm:$0x1]  ;;  %v535_v18 = vld [vmem:[#allocation2 + $0x3c] sm:$0x1] }
  0xb2   : > { %v618_v48 = vshll.u32 %v2863_v31, 16  ;;  %v1112_v50 = vshrl.u32 %v4075_v40, 16  ;;  %v1114_v51 = vshll.u32 %v4075_v40, 16  ;;  %v1211_v52 = vrot.slane %v4075_v40, 1  ;;  %v3426_v15 = vld [vmem:[#allocation6 + $0x148] sm:$0xff]  }
  0xb3   : > { %1986 = vmatprep.mubr.bf16.mxu1 %v2709_v35  ;;  %v1210_v45 = vrot.slane %v4067_v34, 1  ;;  %v1105_v46 = vshrl.u32 %v4067_v34, 16  ;;  %v1107_v47 = vshll.u32 %v4067_v34, 16  ;;  %v609_v53 = vrot.slane %v607_v41, 7  ;;  %v4085_v57 = vld [vmem:[#allocation2 + $0x18] sm:$0xf] }
  0xb4   : > { %v984_v58 = vld [vmem:[#allocation2 + $0x1c] sm:$0x1]  ;;  %v617_v59 = vrot.slane %v615_v43, 7  ;;  %v1116_v61 = vrot.slane %v1114_v51, 1  ;;  %v770_v17 = vld [vmem:[#allocation2 + $0x34] sm:$0x1] }
  0xb5   : > { %v2708_v55 = vcombine.low %v1209_v19, %v1210_v45  ;;  %v1109_v56 = vrot.slane %v1107_v47, 1  ;;  %v4089_v62 = vcombine.low %v4085_v57, %v984_v58  ;;  %v612_v63 = vor.u32 %v610_v42, %v609_v53  ;;  %v538_v19 = vld [vmem:[#allocation2 + $0x44] sm:$0x1]  ;;  %v3441_v20 = vld [vmem:[#allocation6 + $0x188] sm:$0xff]   ;;  %v3447_v51 = vld [vmem:[#allocation6 + $0x1d0] sm:$0xff]  }
  0xb6   : > { %v4094_v5 = vld [vmem:[#allocation2 + $0x20] sm:$0xf]  ;;  %v986_v6 = vld [vmem:[#allocation2 + $0x24] sm:$0x1]  ;;  %v613_v7 = vrot.slane %v609_v53, 4  ;;  %v620_v8 = vor.u32 %v618_v48, %v617_v59  ;;  %v621_v9 = vrot.slane %v617_v59, 4  ;;  %v4096_v11 = vor.u32 %v1116_v61, %v1112_v50 }
  0xb7   : > { %1987 = vmatmul.mubr.bf16.vlgmr.msra.gmra.mrb[0].mxu1 %v2708_v55  ;;  %v4092_v3 = vor.u32 %v1109_v56, %v1105_v46  ;;  %v4099_v12 = vcombine.low %v4094_v5, %v986_v6  ;;  %v2715_v13 = vcombine.low %v4085_v57, %v4094_v5  ;;  %v1212_v14 = vrot.slane %v4089_v62, 1  ;;  %v2967_v35 = vld [vmem:[%s3955_s17 + $0x20] sm:$0xff]   ;;  %v3431_v55 = vld [vmem:[#allocation6 + $0x150] sm:$0xff]   ;;  %v547_v56 = vld [vmem:[#allocation2 + $0x5c] sm:$0x1] }
  0xb8   : > { %3171 = vmatpush3.bf16.msra.mxu1 %v3434_v44  ;;  %v1119_v23 = vshrl.u32 %v4089_v62, 16  ;;  %v1121_v28 = vshll.u32 %v4089_v62, 16  ;;  %v762_v24 = vsel %vm4018_vm6, %v612_v63, %v761_v54  ;;  %v768_v33 = vsel %vm4018_vm6, %v620_v8, %v767_v1  ;;  %v485_v44 = vld [vmem:[#allocation2 + $0x58] sm:$0x1]  ;;  %v488_v50 = vld [vmem:[#allocation2 + $0x60] sm:$0x1] }
  0xb9   : > { %v2707_v21 = vcombine.low %v4064_v30, %v4092_v3  ;;  %3172 = vmatprep.subr.bf16.mxu1 %v3439_v49  ;;  %v2710_v31 = vcombine.low %v4092_v3, %v4096_v11  ;;  %1994 = vmatprep.mubr.bf16.mxu1 %v2715_v13  ;;  %v4116_v32 = vcombine.low %v1211_v52, %v1212_v14  ;;  %v1213_v42 = vrot.slane %v4099_v12, 1  ;;  %v3427_v54 = vld [vmem:[#allocation6 + $0x108] sm:$0xff]   ;;  %v550_v63 = vld [vmem:[#allocation2 + $0x64] sm:$0x1]  ;;  %v3433_v1 = vld [vmem:[#allocation6 + $0x110] sm:$0xff]  }
  0xba   : > { %763 = vst [vmem:[#allocation2 + $0x28] sm:$0xf] %v762_v24  ;;  %v765_v30 = vsel %vm3971_vm3, %v613_v7, %v764_v0  ;;  %v1123_v39 = vrot.slane %v1121_v28, 1  ;;  %769 = vst [vmem:[#allocation2 + $0x30] sm:$0xf] %v768_v33  ;;  %v771_v41 = vsel %vm3971_vm3, %v621_v9, %v770_v17  ;;  %v1126_v43 = vshrl.u32 %v4099_v12, 16 }
  0xbb   : > { %1889 = vmatprep.mubr.bf16.mxu0 %v2707_v21  ;;  %766 = vst [vmem:[#allocation2 + $0x2c] sm:$0x1] %v765_v30  ;;  %772 = vst [vmem:[#allocation2 + $0x34] sm:$0x1] %v771_v41  ;;  %v1128_v46 = vshll.u32 %v4099_v12, 16  ;;  %v367_v47 = vadd.f32 %v3984_v37, %v344_v60  ;;  %v382_v48 = vmax.f32 %v366_v2, 0.0  ;;  %v2911_v61 = vunpack.c.h.bf16 %v2967_v35 }
  0xbc   : > { %1890 = vmatmul.mubr.bf16.vlgmr.msra.gmra.mrb[0].mxu0 %v2706_v38  ;;  %v477_v49 = vsel %vm3971_vm3, 0, %v476_v10  ;;  %3173 = vmatpush3.bf16.msra.mxu1 %v3441_v20  ;;  %v4134_v53 = vor.u32 %v1123_v39, %v1119_v23  ;;  %v536_v16 = vsel %vm3977_vm4, 0, %v535_v18  ;;  %v539_v27 = vsel %vm3977_vm4, 0, %v538_v19  ;;  %v3438_v13 = vld [vmem:[#allocation6 + $0x158] sm:$0xff]   ;;  %v2969_v12 = vld [vmem:[%s3955_s17 + $0x30] sm:$0xff]   ;;  %v3480_v3 = vld [vmem:[#allocation6 + $0x220] sm:$0xff]  }
  0xbd   : > { %3107 = vmatpush3.bf16.msra.mxu0 %v3422_v4  ;;  %478 = vst [vmem:[#allocation2 + $0x40] sm:$0x1] %v477_v49  ;;  %v2910_v38 = vunpack.c.l.bf16 %v2967_v35  ;;  %v1130_v58 = vrot.slane %v1128_v46, 1  ;;  %v383_v59 = vmax.f32 %v367_v47, 0.0  ;;  %v2864_v60 = vpack.c.bf16 %v382_v48, %v382_v48  ;;  %537 = vst [vmem:[#allocation2 + $0x3c] sm:$0x1] %v536_v16  ;;  %3174 = vmatprep.subr.bf16.mxu1 %v3447_v51 }
  0xbe   : > { %3108 = vmatprep.subr.bf16.mxu0 %v3426_v15  ;;  %540 = vst [vmem:[#allocation2 + $0x44] sm:$0x1] %v539_v27  ;;  %v4143_v0 = vcombine.low %v4096_v11, %v4134_v53  ;;  %v486_v4 = vsel %vm3971_vm3, 0, %v485_v44  ;;  %v489_v6 = vsel %vm3971_vm3, 0, %v488_v50  ;;  %v4152_v7 = vcombine.low %v4062_v29, %v4085_v57  ;;  %v773_v17 = vld [vmem:[#allocation2 + $0x38] sm:$0xf] }
  0xbf   : > { %1995 = vmatmul.mubr.bf16.gmra.mrb[4].mxu1 %v4116_v32  ;;  %v345_v2 = vmul.f32 %v2910_v38, %v3982_v36  ;;  %v2865_v8 = vpack.c.bf16 %v383_v59, %v383_v59  ;;  %v623_v9 = vshrl.u32 %v2864_v60, 16  ;;  %v626_v10 = vshll.u32 %v2864_v60, 16  ;;  %487 = vst [vmem:[#allocation2 + $0x58] sm:$0x1] %v486_v4  ;;  %490 = vst [vmem:[#allocation2 + $0x60] sm:$0x1] %v489_v6 }
  0xc0   : > { %1897 = vmatprep.mubr.bf16.mxu0 %v4143_v0  ;;  %v346_v18 = vmul.f32 %v2911_v61, %v3982_v36  ;;  %v548_v20 = vsel %vm3977_vm4, 0, %v547_v56  ;;  %v551_v29 = vsel %vm3977_vm4, 0, %v550_v63  ;;  %v4163_v23 = vor.u32 %v1130_v58, %v1126_v43  ;;  %v3440_v44 = vld [vmem:[#allocation6 + $0x118] sm:$0xff]   ;;  %v544_v59 = vld [vmem:[#allocation2 + $0x54] sm:$0x1]  ;;  %v2968_v4 = vld [vmem:[%s3955_s17 + $0x28] sm:$0xff]  }
  0xc1   : > { %3109 = vmatpush3.bf16.msra.mxu0 %v3427_v54  ;;  %v987_v15 = vld [vmem:[#allocation2 + $0x28] sm:$0xf]  ;;  %v368_v19 = vadd.f32 %v3984_v37, %v345_v2  ;;  %v4161_v21 = vld [vmem:[#allocation2 + $0x30] sm:$0xf]  ;;  %v625_v28 = vrot.slane %v623_v9, 7  ;;  %v631_v24 = vshrl.u32 %v2865_v8, 16  ;;  %v4169_v30 = vcombine.low %v1210_v45, %v1211_v52 }
  0xc2   : > { %v988_v57 = vld [vmem:[#allocation2 + $0x2c] sm:$0x1]  ;;  %3110 = vmatprep.subr.bf16.mxu0 %v3431_v55  ;;  %549 = vst [vmem:[#allocation2 + $0x5c] sm:$0x1] %v548_v20  ;;  %552 = vst [vmem:[#allocation2 + $0x64] sm:$0x1] %v551_v29  ;;  %v2721_v39 = vcombine.low %v987_v15, %v4161_v21  ;;  %v369_v43 = vadd.f32 %v3984_v37, %v346_v18  ;;  %v4803_v11 = vcombine.low %v4134_v53, %v4163_v23 }
  0xc3   : > { %v990_v33 = vld [vmem:[#allocation2 + $0x34] sm:$0x1]  ;;  %v4171_v35 = vcombine.low %v987_v15, %v988_v57  ;;  %v634_v41 = vshll.u32 %v2865_v8, 16  ;;  %v628_v47 = vor.u32 %v626_v10, %v625_v28  ;;  %v629_v40 = vrot.slane %v625_v28, 4  ;;  %v482_v45 = vld [vmem:[#allocation2 + $0x50] sm:$0x1] }
  0xc4   : > { %1898 = vmatmul.mubr.bf16.gmra.mrb[4].mxu0 %v4152_v7  ;;  %v4177_v46 = vcombine.low %v4161_v21, %v990_v33  ;;  %v633_v48 = vrot.slane %v631_v24, 7  ;;  %v779_v34 = vld [vmem:[#allocation2 + $0x40] sm:$0xf]  ;;  %2002 = vmatprep.mubr.bf16.mxu1 %v2721_v39  ;;  %v776_v54 = vld [vmem:[#allocation2 + $0x3c] sm:$0x1]  ;;  %v384_v55 = vmax.f32 %v368_v19, 0.0  ;;  %v2914_v28 = vunpack.c.l.bf16 %v2968_v4 }
  0xc5   : > { %v3446_v52 = vld [vmem:[#allocation6 + $0x160] sm:$0xff]   ;;  %v1214_v49 = vrot.slane %v4171_v35, 1  ;;  %v1133_v50 = vshrl.u32 %v4171_v35, 16  ;;  %v1135_v51 = vshll.u32 %v4171_v35, 16  ;;  %3111 = vmatpush3.bf16.msra.mxu0 %v3433_v1  ;;  %v774_v38 = vsel %vm4018_vm6, %v628_v47, %v773_v17  ;;  %v3449_v60 = vld [vmem:[#allocation6 + $0x190] sm:$0xff]   ;;  %v3453_v20 = vld [vmem:[#allocation6 + $0x168] sm:$0xff]  }
  0xc6   : > { %v636_v16 = vor.u32 %v634_v41, %v633_v48  ;;  %v637_v27 = vrot.slane %v633_v48, 4  ;;  %v777_v56 = vsel %vm3971_vm3, %v629_v40, %v776_v54  ;;  %v782_v58 = vld [vmem:[#allocation2 + $0x44] sm:$0x1]  ;;  %3112 = vmatprep.subr.bf16.mxu0 %v3438_v13  ;;  %v4193_v1 = vcombine.low %v4094_v5, %v987_v15  ;;  %775 = vst [vmem:[#allocation2 + $0x38] sm:$0xf] %v774_v38  ;;  %v3454_v41 = vld [vmem:[#allocation6 + $0x1d8] sm:$0xff]  }
  0xc7   : > { %v4190_v61 = vcombine.low %v1213_v42, %v1214_v49  ;;  %v1137_v63 = vrot.slane %v1135_v51, 1  ;;  %778 = vst [vmem:[#allocation2 + $0x3c] sm:$0x1] %v777_v56  ;;  %v1140_v2 = vshrl.u32 %v4177_v46, 16  ;;  %v1142_v9 = vshll.u32 %v4177_v46, 16  ;;  %3175 = vmatpush3.bf16.msra.mxu1 %v3449_v60  ;;  %v3448_v19 = vld [vmem:[#allocation6 + $0x120] sm:$0xff]  }
  0xc8   : > { %v780_v6 = vsel %vm4018_vm6, %v636_v16, %v779_v34  ;;  %v783_v8 = vsel %vm3971_vm3, %v637_v27, %v782_v58  ;;  %v385_v10 = vmax.f32 %v369_v43, 0.0  ;;  %v491_v13 = vld [vmem:[#allocation2 + $0x68] sm:$0x1]  ;;  %v2866_v15 = vpack.c.bf16 %v384_v55, %v384_v55  ;;  %v494_v33 = vld [vmem:[#allocation2 + $0x70] sm:$0x1]  ;;  %3176 = vmatprep.subr.bf16.mxu1 %v3454_v41  ;;  %v3456_v58 = vld [vmem:[#allocation6 + $0x198] sm:$0xff]  }
  0xc9   : > { %2003 = vmatmul.mubr.bf16.gmra.mrb[8].mxu1 %v4190_v61  ;;  %v4203_v5 = vor.u32 %v1137_v63, %v1133_v50  ;;  %781 = vst [vmem:[#allocation2 + $0x40] sm:$0xf] %v780_v6  ;;  %784 = vst [vmem:[#allocation2 + $0x44] sm:$0x1] %v783_v8  ;;  %3113 = vmatpush3.bf16.msra.mxu0 %v3440_v44  ;;  %v483_v17 = vsel %vm3971_vm3, 0, %v482_v45  ;;  %v545_v18 = vsel %vm3977_vm4, 0, %v544_v59  ;;  %v2915_v24 = vunpack.c.h.bf16 %v2968_v4 }
  0xca   : > { %v1144_v29 = vrot.slane %v1142_v9, 1  ;;  %v2867_v57 = vpack.c.bf16 %v385_v10, %v385_v10  ;;  %484 = vst [vmem:[#allocation2 + $0x50] sm:$0x1] %v483_v17  ;;  %546 = vst [vmem:[#allocation2 + $0x54] sm:$0x1] %v545_v18  ;;  %3114 = vmatprep.subr.bf16.mxu0 %v3446_v52  ;;  %v639_v43 = vshrl.u32 %v2866_v15, 16  ;;  %v347_v52 = vmul.f32 %v2914_v28, %v3982_v36 }
  0xcb   : > { %v553_v39 = vld [vmem:[#allocation2 + $0x6c] sm:$0x1]  ;;  %v4211_v44 = vcombine.low %v4163_v23, %v4203_v5  ;;  %v642_v47 = vshll.u32 %v2866_v15, 16  ;;  %v492_v40 = vsel %vm3971_vm3, 0, %v491_v13  ;;  %v556_v48 = vld [vmem:[#allocation2 + $0x74] sm:$0x1]  ;;  %v348_v27 = vmul.f32 %v2915_v24, %v3982_v36  ;;  %3177 = vmatpush3.bf16.msra.mxu1 %v3456_v58 }
  0xcc   : > { %v3455_v34 = vld [vmem:[#allocation6 + $0x128] sm:$0xff]   ;;  %v647_v45 = vshrl.u32 %v2867_v57, 16  ;;  %v650_v50 = vshll.u32 %v2867_v57, 16  ;;  %493 = vst [vmem:[#allocation2 + $0x68] sm:$0x1] %v492_v40  ;;  %v641_v51 = vrot.slane %v639_v43, 7  ;;  %v370_v6 = vadd.f32 %v3984_v37, %v347_v52 }
  0xcd   : > { %1905 = vmatprep.mubr.bf16.mxu0 %v4211_v44  ;;  %v785_v54 = vld [vmem:[#allocation2 + $0x58] sm:$0xf]  ;;  %v788_v55 = vld [vmem:[#allocation2 + $0x5c] sm:$0x1]  ;;  %v791_v16 = vld [vmem:[#allocation2 + $0x60] sm:$0xf]  ;;  %3115 = vmatpush3.bf16.msra.mxu0 %v3448_v19  ;;  %v4230_v9 = vcombine.low %v1212_v14, %v1213_v42  ;;  %v4243_v42 = vor.u32 %v1144_v29, %v1140_v2 }
  0xce   : > { %v495_v38 = vsel %vm3971_vm3, 0, %v494_v33  ;;  %v554_v56 = vsel %vm3977_vm4, 0, %v553_v39  ;;  %1906 = vmatmul.mubr.bf16.gmra.mrb[8].mxu0 %v4193_v1  ;;  %v991_v59 = vld [vmem:[#allocation2 + $0x38] sm:$0xf]  ;;  %v992_v60 = vld [vmem:[#allocation2 + $0x3c] sm:$0x1]  ;;  %3116 = vmatprep.subr.bf16.mxu0 %v3453_v20  ;;  %v644_v15 = vor.u32 %v642_v47, %v641_v51  ;;  %v371_v20 = vadd.f32 %v3984_v37, %v348_v27 }
  0xcf   : > { %v649_v63 = vrot.slane %v647_v45, 7  ;;  %v794_v4 = vld [vmem:[#allocation2 + $0x64] sm:$0x1]  ;;  %496 = vst [vmem:[#allocation2 + $0x70] sm:$0x1] %v495_v38  ;;  %v557_v8 = vsel %vm3977_vm4, 0, %v556_v48  ;;  %v4232_v10 = vcombine.low %v991_v59, %v992_v60  ;;  %v4268_v27 = vcombine.low %v4161_v21, %v991_v59 }
  0xd0   : > { %555 = vst [vmem:[#allocation2 + $0x6c] sm:$0x1] %v554_v56  ;;  %v1215_v13 = vrot.slane %v4177_v46, 1  ;;  %v645_v17 = vrot.slane %v641_v51, 4  ;;  %558 = vst [vmem:[#allocation2 + $0x74] sm:$0x1] %v557_v8  ;;  %v786_v43 = vsel %vm4018_vm6, %v644_v15, %v785_v54  ;;  %v2918_v54 = vunpack.c.l.bf16 %v2969_v12 }
  0xd1   : > { %v4235_v18 = vld [vmem:[#allocation2 + $0x40] sm:$0xf]  ;;  %v652_v19 = vor.u32 %v650_v50, %v649_v63  ;;  %v653_v57 = vrot.slane %v649_v63, 4  ;;  %v386_v28 = vmax.f32 %v370_v6, 0.0  ;;  %v1216_v14 = vrot.slane %v4232_v10, 1  ;;  %3117 = vmatpush3.bf16.msra.mxu0 %v3455_v34  ;;  %v3461_v50 = vld [vmem:[#allocation6 + $0x170] sm:$0xff]  }
  0xd2   : > { %v2727_v62 = vcombine.low %v991_v59, %v4235_v18  ;;  %v1147_v24 = vshrl.u32 %v4232_v10, 16  ;;  %v4246_v33 = vld [vmem:[#allocation2 + $0x50] sm:$0xf]  ;;  %v998_v39 = vld [vmem:[#allocation2 + $0x54] sm:$0x1]  ;;  %v1149_v41 = vshll.u32 %v4232_v10, 16  ;;  %v789_v47 = vsel %vm3971_vm3, %v645_v17, %v788_v55  ;;  %3118 = vmatprep.subr.bf16.mxu0 %v3461_v50 }
  0xd3   : > { %v792_v40 = vsel %vm4018_vm6, %v652_v19, %v791_v16  ;;  %v3460_v48 = vld [vmem:[#allocation6 + $0x1e0] sm:$0xff]   ;;  %v4259_v2 = vcombine.low %v1215_v13, %v1216_v14  ;;  %787 = vst [vmem:[#allocation2 + $0x58] sm:$0xf] %v786_v43  ;;  %790 = vst [vmem:[#allocation2 + $0x5c] sm:$0x1] %v789_v47  ;;  %v795_v29 = vsel %vm3971_vm3, %v653_v57, %v794_v4  ;;  %v387_v45 = vmax.f32 %v371_v20, 0.0 }
  0xd4   : > { %2010 = vmatprep.mubr.bf16.mxu1 %v2727_v62  ;;  %793 = vst [vmem:[#allocation2 + $0x60] sm:$0xf] %v792_v40  ;;  %v4264_v34 = vcombine.low %v4246_v33, %v998_v39  ;;  %v1151_v52 = vrot.slane %v1149_v41, 1  ;;  %796 = vst [vmem:[#allocation2 + $0x64] sm:$0x1] %v795_v29  ;;  %v2868_v51 = vpack.c.bf16 %v386_v28, %v386_v28  ;;  %v2919_v55 = vunpack.c.h.bf16 %v2969_v12  ;;  %v3462_v16 = vld [vmem:[#allocation6 + $0x1a0] sm:$0xff]  }
  0xd5   : > { %3178 = vmatprep.subr.bf16.mxu1 %v3460_v48  ;;  %2011 = vmatmul.mubr.bf16.gmra.mrb[12].mxu1 %v4259_v2  ;;  %v2869_v58 = vpack.c.bf16 %v387_v45, %v387_v45  ;;  %v497_v60 = vld [vmem:[#allocation2 + $0x78] sm:$0x1]  ;;  %v3463_v63 = vld [vmem:[#allocation6 + $0x130] sm:$0xff]   ;;  %v349_v15 = vmul.f32 %v2918_v54, %v3982_v36  ;;  %v500_v17 = vld [vmem:[#allocation2 + $0x80] sm:$0x1]  ;;  %v4297_v54 = vcombine.low %v1214_v49, %v1215_v13 }
  0xd6   : > { %v1217_v38 = vrot.slane %v4264_v34, 1  ;;  %v1156_v56 = vshll.u32 %v4264_v34, 16  ;;  %v4272_v4 = vor.u32 %v1151_v52, %v1147_v24  ;;  %v655_v6 = vshrl.u32 %v2868_v51, 16  ;;  %3179 = vmatpush3.bf16.msra.mxu1 %v3462_v16  ;;  %v797_v57 = vld [vmem:[#allocation2 + $0x68] sm:$0xf]  ;;  %3119 = vmatpush3.bf16.msra.mxu0 %v3463_v63 }
  0xd7   : > { %v658_v8 = vshll.u32 %v2868_v51, 16  ;;  %v1154_v19 = vshrl.u32 %v4264_v34, 16  ;;  %v663_v59 = vshrl.u32 %v2869_v58, 16  ;;  %v350_v20 = vmul.f32 %v2919_v55, %v3982_v36  ;;  %v3464_v28 = vld [vmem:[#allocation6 + $0x1e8] sm:$0xff]   ;;  %v803_v47 = vld [vmem:[#allocation2 + $0x70] sm:$0xf] }
  0xd8   : > { %v1158_v21 = vrot.slane %v1156_v56, 1  ;;  %v4279_v12 = vcombine.low %v4243_v42, %v4272_v4  ;;  %v657_v62 = vrot.slane %v655_v6, 7  ;;  %v666_v24 = vshll.u32 %v2869_v58, 16  ;;  %v800_v39 = vld [vmem:[#allocation2 + $0x6c] sm:$0x1]  ;;  %3180 = vmatprep.subr.bf16.mxu1 %v3464_v28 }
  0xd9   : > { %v498_v41 = vsel %vm3971_vm3, 0, %v497_v60  ;;  %v665_v43 = vrot.slane %v663_v59, 7  ;;  %v806_v40 = vld [vmem:[#allocation2 + $0x74] sm:$0x1]  ;;  %v372_v48 = vadd.f32 %v3984_v37, %v349_v15  ;;  %v501_v36 = vsel %vm3971_vm3, 0, %v500_v17  ;;  %v3465_v6 = vld [vmem:[#allocation6 + $0x1a8] sm:$0xff]  }
  0xda   : > { %499 = vst [vmem:[#allocation2 + $0x78] sm:$0x1] %v498_v41  ;;  %1913 = vmatprep.mubr.bf16.mxu0 %v4279_v12  ;;  %v4287_v29 = vld [vmem:[#allocation2 + $0x58] sm:$0xf]  ;;  %v1000_v45 = vld [vmem:[#allocation2 + $0x5c] sm:$0x1]  ;;  %v660_v52 = vor.u32 %v658_v8, %v657_v62  ;;  %v373_v46 = vadd.f32 %v3984_v37, %v350_v20  ;;  %3181 = vmatpush3.bf16.msra.mxu1 %v3465_v6 }
  0xdb   : > { %v4289_v50 = vld [vmem:[#allocation2 + $0x60] sm:$0xf]  ;;  %502 = vst [vmem:[#allocation2 + $0x80] sm:$0x1] %v501_v36  ;;  %1914 = vmatmul.mubr.bf16.gmra.mrb[12].mxu0 %v4268_v27  ;;  %v1002_v16 = vld [vmem:[#allocation2 + $0x64] sm:$0x1]  ;;  %v4303_v56 = vcombine.low %v4287_v29, %v1000_v45  ;;  %v668_v13 = vor.u32 %v666_v24, %v665_v43  ;;  %v1159_v41 = vor.u32 %v1158_v21, %v1154_v19 }
  0xdc   : > { %v2736_v58 = vcombine.low %v4287_v29, %v4289_v50  ;;  %v661_v60 = vrot.slane %v657_v62, 4  ;;  %v559_v63 = vld [vmem:[#allocation2 + $0x7c] sm:$0x1]  ;;  %v562_v35 = vld [vmem:[#allocation2 + $0x84] sm:$0x1]  ;;  %v4309_v49 = vcombine.low %v4289_v50, %v1002_v16  ;;  %v669_v8 = vrot.slane %v665_v43, 4 }
  0xdd   : > { %v798_v15 = vsel %vm4018_vm6, %v660_v52, %v797_v57  ;;  %v2970_v17 = vld [vmem:[%s3955_s17 + $0x38] sm:$0xff]   ;;  %v4780_v59 = vrot.slane %v4303_v56, 1  ;;  %v1161_v28 = vshrl.u32 %v4303_v56, 16  ;;  %v1163_v62 = vshll.u32 %v4303_v56, 16  ;;  %v3469_v20 = vld [vmem:[#allocation6 + $0x1f0] sm:$0xff]  }
  0xde   : > { %2018 = vmatprep.mubr.bf16.mxu1 %v2736_v58  ;;  %799 = vst [vmem:[#allocation2 + $0x68] sm:$0xf] %v798_v15  ;;  %v801_v37 = vsel %vm3971_vm3, %v661_v60, %v800_v39  ;;  %v804_v24 = vsel %vm4018_vm6, %v668_v13, %v803_v47  ;;  %v807_v57 = vsel %vm3971_vm3, %v669_v8, %v806_v40  ;;  %v1168_v43 = vshrl.u32 %v4309_v49, 16  ;;  %v3470_v21 = vld [vmem:[#allocation6 + $0x178] sm:$0xff]   ;;  %v3471_v58 = vld [vmem:[#allocation6 + $0x1b0] sm:$0xff]  }
  0xdf   : > { %802 = vst [vmem:[#allocation2 + $0x6c] sm:$0x1] %v801_v37  ;;  %v2735_v36 = vcombine.low %v1217_v38, %v4780_v59  ;;  %v1165_v45 = vrot.slane %v1163_v62, 1  ;;  %805 = vst [vmem:[#allocation2 + $0x70] sm:$0xf] %v804_v24  ;;  %v1170_v39 = vshll.u32 %v4309_v49, 16  ;;  %3182 = vmatprep.subr.bf16.mxu1 %v3469_v20  ;;  %v2922_v16 = vunpack.c.l.bf16 %v2970_v17  ;;  %3120 = vmatprep.subr.bf16.mxu0 %v3470_v21 }
  0xe0   : > { %808 = vst [vmem:[#allocation2 + $0x74] sm:$0x1] %v807_v57  ;;  %v388_v19 = vmax.f32 %v372_v48, 0.0  ;;  %v389_v52 = vmax.f32 %v373_v46, 0.0  ;;  %v560_v47 = vsel %vm3977_vm4, 0, %v559_v63  ;;  %v563_v40 = vsel %vm3977_vm4, 0, %v562_v35  ;;  %3183 = vmatpush3.bf16.msra.mxu1 %v3471_v58 }
  0xe1   : > { %2019 = vmatmul.mubr.bf16.gmra.mrb[16].mxu1 %v2735_v36  ;;  %v4333_v34 = vor.u32 %v1165_v45, %v1161_v28  ;;  %v1172_v38 = vrot.slane %v1170_v39, 1  ;;  %561 = vst [vmem:[#allocation2 + $0x7c] sm:$0x1] %v560_v47  ;;  %564 = vst [vmem:[#allocation2 + $0x84] sm:$0x1] %v563_v40  ;;  %v2923_v6 = vunpack.c.h.bf16 %v2970_v17  ;;  %v3472_v48 = vld [vmem:[#allocation6 + $0x138] sm:$0xff]   ;;  %v2733_v46 = vcombine.low %v4246_v33, %v4287_v29 }
  0xe2   : > { %v2870_v60 = vpack.c.bf16 %v388_v19, %v388_v19  ;;  %v2871_v13 = vpack.c.bf16 %v389_v52, %v389_v52  ;;  %v3485_v63 = vld [vmem:[#allocation8] ss:$0 sm:$0xff]  ;;  %v503_v15 = vld [vmem:[#allocation2 + $0x88] sm:$0x1]  ;;  %v506_v35 = vld [vmem:[#allocation2 + $0x90] sm:$0x1]  ;;  %3121 = vmatpush3.bf16.msra.mxu0 %v3472_v48  ;;  %v4804_v23 = vcombine.low %v4203_v5, %v4243_v42 }
  0xe3   : > { %v351_v8 = vmul.f32 %v3485_v63, %v2922_v16  ;;  %v2734_v62 = vcombine.low %v1159_v41, %v4333_v34  ;;  %v4781_v28 = vrot.slane %v4309_v49, 1  ;;  %v809_v36 = vld [vmem:[#allocation2 + $0x78] sm:$0xf]  ;;  %v352_v45 = vmul.f32 %v3485_v63, %v2923_v6  ;;  %v3486_v39 = vld [vmem:[#allocation9] ss:$0 sm:$0xff] }
  0xe4   : > { %v671_v37 = vshrl.u32 %v2870_v60, 16  ;;  %v674_v20 = vshll.u32 %v2870_v60, 16  ;;  %v679_v17 = vshrl.u32 %v2871_v13, 16  ;;  %v682_v57 = vshll.u32 %v2871_v13, 16  ;;  %v815_v52 = vld [vmem:[#allocation2 + $0x80] sm:$0xf] }
  0xe5   : > { %v1003_v24 = vld [vmem:[#allocation2 + $0x68] sm:$0xf]  ;;  %v374_v33 = vadd.f32 %v3486_v39, %v351_v8  ;;  %1921 = vmatprep.mubr.bf16.mxu0 %v2734_v62  ;;  %v4339_v19 = vor.u32 %v1172_v38, %v1168_v43  ;;  %v504_v41 = vsel %vm3971_vm3, 0, %v503_v15  ;;  %v507_v47 = vsel %vm3971_vm3, 0, %v506_v35  ;;  %v3473_v40 = vld [vmem:[#allocation6 + $0x1f8] sm:$0xff]  }
  0xe6   : > { %v1004_v29 = vld [vmem:[#allocation2 + $0x6c] sm:$0x1]  ;;  %v673_v21 = vrot.slane %v671_v37, 7  ;;  %1922 = vmatmul.mubr.bf16.gmra.mrb[16].mxu0 %v2733_v46  ;;  %v4345_v16 = vld [vmem:[#allocation2 + $0x70] sm:$0xf]  ;;  %v681_v6 = vrot.slane %v679_v17, 7  ;;  %v375_v48 = vadd.f32 %v3486_v39, %v352_v45  ;;  %3184 = vmatprep.subr.bf16.mxu1 %v3473_v40 }
  0xe7   : > { %v1006_v58 = vld [vmem:[#allocation2 + $0x74] sm:$0x1]  ;;  %v4347_v60 = vcombine.low %v1003_v24, %v1004_v29  ;;  %v390_v13 = vmax.f32 %v374_v33, 0.0  ;;  %505 = vst [vmem:[#allocation2 + $0x88] sm:$0x1] %v504_v41  ;;  %v2742_v38 = vcombine.low %v1003_v24, %v4345_v16  ;;  %v3474_v46 = vld [vmem:[#allocation6 + $0x1b8] sm:$0xff]   ;;  %v4359_v29 = vcombine.low %v4289_v50, %v1003_v24 }
  0xe8   : > { %508 = vst [vmem:[#allocation2 + $0x90] sm:$0x1] %v507_v47  ;;  %v4350_v43 = vcombine.low %v4345_v16, %v1006_v58  ;;  %v676_v63 = vor.u32 %v674_v20, %v673_v21  ;;  %v677_v8 = vrot.slane %v673_v21, 4  ;;  %v565_v15 = vld [vmem:[#allocation2 + $0x8c] sm:$0x1]  ;;  %v684_v45 = vor.u32 %v682_v57, %v681_v6  ;;  %v4356_v33 = vld [vmem:[#allocation6 + $0x200] sm:$0xff]   ;;  %3185 = vmatpush3.bf16.msra.mxu1 %v3474_v46 }
  0xe9   : > { %v568_v35 = vld [vmem:[#allocation2 + $0x94] sm:$0x1]  ;;  %v4779_v62 = vrot.slane %v4347_v60, 1  ;;  %v1175_v37 = vshrl.u32 %v4347_v60, 16  ;;  %v1177_v17 = vshll.u32 %v4347_v60, 16  ;;  %2026 = vmatprep.mubr.bf16.mxu1 %v2742_v38  ;;  %v685_v20 = vrot.slane %v681_v6, 4  ;;  %3250 = vmatprep.subr.bf16.mxu0 %v4356_v33 }
  0xea   : > { %v812_v39 = vld [vmem:[#allocation2 + $0x7c] sm:$0x1]  ;;  %v810_v21 = vsel %vm4018_vm6, %v676_v63, %v809_v36  ;;  %v818_v47 = vld [vmem:[#allocation2 + $0x84] sm:$0x1]  ;;  %v816_v50 = vsel %vm4018_vm6, %v684_v45, %v815_v52  ;;  %v1221_v24 = vrot.slane %v4350_v43, 1  ;;  %3282 = vmatprep.subr.bf16.mxu1 %v4356_v33  ;;  %v1184_v58 = vshll.u32 %v4350_v43, 16 }
  0xeb   : > { %v813_v41 = vsel %vm3971_vm3, %v677_v8, %v812_v39  ;;  %v4369_v57 = vcombine.low %v4781_v28, %v4779_v62  ;;  %v1179_v40 = vrot.slane %v1177_v17, 1  ;;  %811 = vst [vmem:[#allocation2 + $0x78] sm:$0xf] %v810_v21  ;;  %817 = vst [vmem:[#allocation2 + $0x80] sm:$0xf] %v816_v50  ;;  %v819_v36 = vsel %vm3971_vm3, %v685_v20, %v818_v47 }
  0xec   : > { %814 = vst [vmem:[#allocation2 + $0x7c] sm:$0x1] %v813_v41  ;;  %v391_v6 = vmax.f32 %v375_v48, 0.0  ;;  %v2872_v38 = vpack.c.bf16 %v390_v13, %v390_v13  ;;  %820 = vst [vmem:[#allocation2 + $0x84] sm:$0x1] %v819_v36  ;;  %v566_v52 = vsel %vm3977_vm4, 0, %v565_v15 }
  0xed   : > { %2027 = vmatmul.mubr.bf16.gmra.mrb[20].mxu1 %v4369_v57  ;;  %v4380_v63 = vor.u32 %v1179_v40, %v1175_v37  ;;  %v569_v8 = vsel %vm3977_vm4, 0, %v568_v35  ;;  %v994_v17 = vld [vmem:[#allocation2 + $0x44] sm:$0x1]  ;;  %v1182_v45 = vshrl.u32 %v4350_v43, 16  ;;  %567 = vst [vmem:[#allocation2 + $0x8c] sm:$0x1] %v566_v52 }
  0xee   : > { %v2873_v39 = vpack.c.bf16 %v391_v6, %v391_v6  ;;  %570 = vst [vmem:[#allocation2 + $0x94] sm:$0x1] %v569_v8  ;;  %v687_v48 = vshrl.u32 %v2872_v38, 16  ;;  %v690_v13 = vshll.u32 %v2872_v38, 16  ;;  %v821_v20 = vld [vmem:[#allocation2 + $0x88] sm:$0xf]  ;;  %v4396_v38 = vcombine.low %v4235_v18, %v994_v17 }
  0xef   : > { %v4391_v37 = vcombine.low %v4339_v19, %v4380_v63  ;;  %v1186_v15 = vrot.slane %v1184_v58, 1  ;;  %v827_v47 = vld [vmem:[#allocation2 + $0x90] sm:$0xf]  ;;  %v479_v28 = vld [vmem:[#allocation2 + $0x48] sm:$0x1] }
  0xf0   : > { %v689_v21 = vrot.slane %v687_v48, 7  ;;  %v695_v41 = vshrl.u32 %v2873_v39, 16  ;;  %v698_v35 = vshll.u32 %v2873_v39, 16 }
  0xf1   : > { %1929 = vmatprep.mubr.bf16.mxu0 %v4391_v37 }
  0xf2   : > { %1930 = vmatmul.mubr.bf16.gmra.mrb[20].mxu0 %v4359_v29  ;;  %v1007_v40 = vld [vmem:[#allocation2 + $0x78] sm:$0xf]  ;;  %v692_v36 = vor.u32 %v690_v13, %v689_v21  ;;  %v693_v6 = vrot.slane %v689_v21, 4  ;;  %v697_v52 = vrot.slane %v695_v41, 7  ;;  %v4398_v8 = vld [vmem:[#allocation2 + $0x80] sm:$0xf] }
  0xf3   : > { %v1008_v50 = vld [vmem:[#allocation2 + $0x7c] sm:$0x1]  ;;  %v1010_v58 = vld [vmem:[#allocation2 + $0x84] sm:$0x1]  ;;  %v2748_v39 = vcombine.low %v1007_v40, %v4398_v8 }
  0xf4   : > { %v4400_v46 = vcombine.low %v1007_v40, %v1008_v50  ;;  %v700_v48 = vor.u32 %v698_v35, %v697_v52  ;;  %v701_v62 = vrot.slane %v697_v52, 4  ;;  %v822_v59 = vsel %vm4018_vm6, %v692_v36, %v821_v20  ;;  %v824_v41 = vld [vmem:[#allocation2 + $0x8c] sm:$0x1] }
  0xf5   : > { %823 = vst [vmem:[#allocation2 + $0x88] sm:$0xf] %v822_v59  ;;  %2034 = vmatprep.mubr.bf16.mxu1 %v2748_v39  ;;  %v4408_v50 = vor.u32 %v1186_v15, %v1182_v45  ;;  %v825_v55 = vsel %vm3971_vm3, %v693_v6, %v824_v41  ;;  %v830_v52 = vld [vmem:[#allocation2 + $0x94] sm:$0x1]  ;;  %v480_v20 = vsel %vm3971_vm3, 0, %v479_v28  ;;  %v4417_v51 = vcombine.low %v4398_v8, %v1010_v58 }
  0xf6   : > { %v4782_v13 = vrot.slane %v4400_v46, 1  ;;  %v1189_v21 = vshrl.u32 %v4400_v46, 16  ;;  %v1191_v17 = vshll.u32 %v4400_v46, 16  ;;  %v828_v35 = vsel %vm4018_vm6, %v700_v48, %v827_v47  ;;  %v541_v36 = vld [vmem:[#allocation2 + $0x4c] sm:$0x1] }
  0xf7   : > { %826 = vst [vmem:[#allocation2 + $0x8c] sm:$0x1] %v825_v55  ;;  %829 = vst [vmem:[#allocation2 + $0x90] sm:$0xf] %v828_v35  ;;  %v831_v22 = vsel %vm3971_vm3, %v701_v62, %v830_v52  ;;  %v542_v28 = vsel %vm3977_vm4, 0, %v541_v36  ;;  %v1236_v15 = vshrl.u32 %v4396_v38, 16  ;;  %v4436_v58 = vcombine.low %v4345_v16, %v1007_v40 }
  0xf8   : > { %v4423_v59 = vcombine.low %v1221_v24, %v4782_v13  ;;  %v1193_v45 = vrot.slane %v1191_v17, 1  ;;  %481 = vst [vmem:[#allocation2 + $0x48] sm:$0x1] %v480_v20  ;;  %832 = vst [vmem:[#allocation2 + $0x94] sm:$0x1] %v831_v22  ;;  %v1238_v47 = vshll.u32 %v4396_v38, 16 }
  0xf9   : > { %543 = vst [vmem:[#allocation2 + $0x4c] sm:$0x1] %v542_v28  ;;  %v1249_v55 = vrot.slane %v4396_v38, 1  ;;  %v1198_v48 = vshll.u32 %v4417_v51, 16  ;;  %v509_v41 = vld [vmem:[#allocation2 + $0x98] sm:$0x1] }
  0xfa   : > { %2035 = vmatmul.mubr.bf16.gmra.mrb[24].mxu1 %v4423_v59  ;;  %v4432_v6 = vor.u32 %v1193_v45, %v1189_v21  ;;  %v1240_v62 = vrot.slane %v1238_v47, 1  ;;  %v510_v38 = vsel %vm3971_vm3, 0, %v509_v41  ;;  %v571_v16 = vld [vmem:[#allocation2 + $0x9c] sm:$0x1]  ;;  %v1196_v45 = vshrl.u32 %v4417_v51, 16 }
  0xfb   : > { %v4445_v17 = vcombine.low %v1216_v14, %v1249_v55  ;;  %511 = vst [vmem:[#allocation2 + $0x98] sm:$0x1] %v510_v38  ;;  %v572_v40 = vsel %vm3977_vm4, 0, %v571_v16  ;;  %v1223_v14 = vrot.slane %v4417_v51, 1  ;;  %v1200_v22 = vrot.slane %v1198_v48, 1 }
  0xfc   : > { %v4440_v39 = vcombine.low %v4408_v50, %v4432_v6  ;;  %v1011_v21 = vld [vmem:[#allocation2 + $0x88] sm:$0xf]  ;;  %v4447_v35 = vor.u32 %v1240_v62, %v1236_v15  ;;  %573 = vst [vmem:[#allocation2 + $0x9c] sm:$0x1] %v572_v40 }
  0xfd   : > { %v4476_v16 = vor.u32 %v1200_v22, %v1196_v45  ;;  %v3476_v45 = vld [vmem:[#allocation6 + $0x208] sm:$0xff]  }
  0xfe   : > { %1937 = vmatprep.mubr.bf16.mxu0 %v4440_v39  ;;  %v1012_v52 = vld [vmem:[#allocation2 + $0x8c] sm:$0x1]  ;;  %v4455_v10 = vld [vmem:[#allocation2 + $0x90] sm:$0xf]  ;;  %v2728_v20 = vcombine.low %v4272_v4, %v4447_v35  ;;  %v4808_v4 = vcombine.low %v4333_v34, %v4339_v19 }
  0xff   : > { %1938 = vmatmul.mubr.bf16.gmra.mrb[24].mxu0 %v4436_v58  ;;  %v4460_v25 = vcombine.low %v1011_v21, %v1012_v52  ;;  %v2754_v36 = vcombine.low %v1011_v21, %v4455_v10  ;;  %v4464_v26 = vld [vmem:[#allocation2 + $0x48] sm:$0xf] }
 0x100   : > { %v996_v28 = vld [vmem:[#allocation2 + $0x4c] sm:$0x1]  ;;  %v2730_v53 = vcombine.low %v4235_v18, %v4464_v26  ;;  %v4806_v18 = vrot.slane %v4303_v56, 1 }
 0x101   : > { %2042 = vmatprep.mubr.bf16.mxu1 %v2754_v36  ;;  %v1224_v15 = vrot.slane %v4460_v25, 1  ;;  %v1203_v47 = vshrl.u32 %v4460_v25, 16  ;;  %v1205_v62 = vshll.u32 %v4460_v25, 16  ;;  %v2704_v41 = vcombine.low %v4464_v26, %v996_v28 }
 0x102   : > { %v4482_v36 = vcombine.low %v4398_v8, %v1011_v21  ;;  %v3477_v8 = vld [vmem:[#allocation6 + $0x210] sm:$0xff]   ;;  %v1015_v5 = vld [vmem:[#allocation2 + $0x98] sm:$0xf] }
 0x103   : > { %v4474_v38 = vcombine.low %v1223_v14, %v1224_v15  ;;  %v1207_v48 = vrot.slane %v1205_v62, 1  ;;  %v1275_v40 = vrot.slane %v2704_v41, 1  ;;  %v1016_v42 = vld [vmem:[#allocation2 + $0x9c] sm:$0x1] }
 0x105   : > { %2043 = vmatmul.mubr.bf16.gmra.mrb[28].mxu1 %v4474_v38  ;;  %v4479_v52 = vor.u32 %v1207_v48, %v1203_v47  ;;  %v4485_v28 = vcombine.low %v1249_v55, %v1275_v40  ;;  %v1262_v55 = vshrl.u32 %v2704_v41, 16 }
 0x106   : > { %2180 = vmatprep.mubr.bf16.mxu1 %v4143_v0  ;;  %v1264_v0 = vshll.u32 %v2704_v41, 16 }
 0x107   : > { %v4489_v13 = vcombine.low %v4476_v16, %v4479_v52 }
 0x108   : > { %v1266_v21 = vrot.slane %v1264_v0, 1 }
 0x109   : > { %1945 = vmatprep.mubr.bf16.mxu0 %v4489_v13 }
 0x10a   : > { %1946 = vmatmul.mubr.bf16.gmra.mrb[28].mxu0 %v4482_v36 }
 0x10b   : > { %2083 = vmatprep.mubr.bf16.mxu0 %v4169_v30  ;;  %v3479_v30 = vld [vmem:[#allocation6 + $0x218] sm:$0xff]  }
 0x10d   : > { %2181 = vmatmul.mubr.bf16.vlgmr.msra.gmra.mrb[32].mxu1 %v4152_v7  ;;  %v1267_v7 = vor.u32 %v1266_v21, %v1262_v55 }
 0x10e   : > { %2188 = vmatprep.mubr.bf16.mxu1 %v4211_v44  ;;  %3290 = vmatpush3.bf16.msra.mxu1 %v4356_v33  ;;  %v3481_v44 = vld [vmem:[#allocation6 + $0x228] sm:$0xff]  }
 0x10f   : > { %3283 = vmatprep.subr.bf16.mxu1 %v3476_v45 }
 0x112   : > { %2084 = vmatmul.mubr.bf16.vlgmr.msra.gmra.mrb[32].mxu0 %v2710_v31  ;;  %3291 = vmatpush3.bf16.msra.mxu1 %v3476_v45  ;;  %v2731_v31 = vcombine.low %v4447_v35, %v1267_v7 }
 0x113   : > { %3251 = vmatpush3.bf16.msra.mxu0 %v4356_v33  ;;  %2091 = vmatprep.mubr.bf16.mxu0 %v4230_v9  ;;  %v3484_v9 = vld [vmem:[#allocation6 + $0x238] sm:$0xff]  }
 0x114   : > { %3252 = vmatprep.subr.bf16.mxu0 %v3476_v45  ;;  %3284 = vmatprep.subr.bf16.mxu1 %v3477_v8 }
 0x115   : > { %2189 = vmatmul.mubr.bf16.gmra.mrb[36].mxu1 %v4193_v1  ;;  %v3482_v1 = vld [vmem:[#allocation6 + $0x230] sm:$0xff]  }
 0x116   : > { %2196 = vmatprep.mubr.bf16.mxu1 %v4279_v12  ;;  %3292 = vmatpush3.bf16.msra.mxu1 %v3477_v8  ;;  %v4805_v12 = vrot.slane %v4309_v49, 1 }
 0x117   : > { %3253 = vmatpush3.bf16.msra.mxu0 %v3476_v45  ;;  %3285 = vmatprep.subr.bf16.mxu1 %v3479_v30 }
 0x118   : > { %3254 = vmatprep.subr.bf16.mxu0 %v3477_v8 }
 0x11a   : > { %2092 = vmatmul.mubr.bf16.gmra.mrb[36].mxu0 %v4803_v11  ;;  %3293 = vmatpush3.bf16.msra.mxu1 %v3479_v30 }
 0x11b   : > { %2099 = vmatprep.mubr.bf16.mxu0 %v4297_v54  ;;  %3255 = vmatpush3.bf16.msra.mxu0 %v3477_v8  ;;  %v2738_v54 = vcombine.low %v4806_v18, %v4805_v12 }
 0x11c   : > { %3256 = vmatprep.subr.bf16.mxu0 %v3479_v30  ;;  %3286 = vmatprep.subr.bf16.mxu1 %v3480_v3 }
 0x11d   : > { %2197 = vmatmul.mubr.bf16.gmra.mrb[40].mxu1 %v4268_v27  ;;  %v1014_v27 = vld [vmem:[#allocation2 + $0x94] sm:$0x1] }
 0x11e   : > { %2204 = vmatprep.mubr.bf16.mxu1 %v2731_v31  ;;  %3294 = vmatpush3.bf16.msra.mxu1 %v3480_v3  ;;  %v2703_v33 = vcombine.low %v4455_v10, %v1014_v27 }
 0x11f   : > { %3257 = vmatpush3.bf16.msra.mxu0 %v3479_v30  ;;  %3287 = vmatprep.subr.bf16.mxu1 %v3481_v44 }
 0x120   : > { %3258 = vmatprep.subr.bf16.mxu0 %v3480_v3  ;;  %v1245_v56 = vshll.u32 %v2703_v33, 16  ;;  %v1243_v35 = vshrl.u32 %v2703_v33, 16 }
 0x122   : > { %2100 = vmatmul.mubr.bf16.gmra.mrb[40].mxu0 %v4804_v23  ;;  %3295 = vmatpush3.bf16.msra.mxu1 %v3481_v44 }
 0x123   : > { %2107 = vmatprep.mubr.bf16.mxu0 %v4445_v17  ;;  %3259 = vmatpush3.bf16.msra.mxu0 %v3480_v3  ;;  %v2705_v17 = vcombine.low %v1015_v5, %v1016_v42 }
 0x124   : > { %3260 = vmatprep.subr.bf16.mxu0 %v3481_v44  ;;  %3288 = vmatprep.subr.bf16.mxu1 %v3482_v1 }
 0x125   : > { %2205 = vmatmul.mubr.bf16.gmra.mrb[44].mxu1 %v2730_v53  ;;  %v1271_v49 = vshll.u32 %v2705_v17, 16  ;;  %v1269_v26 = vshrl.u32 %v2705_v17, 16 }
 0x126   : > { %2212 = vmatprep.mubr.bf16.mxu1 %v4391_v37  ;;  %3296 = vmatpush3.bf16.msra.mxu1 %v3482_v1  ;;  %v4807_v37 = vrot.slane %v4347_v60, 1 }
 0x127   : > { %3261 = vmatpush3.bf16.msra.mxu0 %v3481_v44  ;;  %3289 = vmatprep.subr.bf16.mxu1 %v3484_v9  ;;  %v1273_v47 = vrot.slane %v1271_v49, 1 }
 0x128   : > { %3262 = vmatprep.subr.bf16.mxu0 %v3482_v1  ;;  %v2744_v22 = vcombine.low %v4807_v37, %v1221_v24  ;;  %v4809_v24 = vrot.slane %v4400_v46, 1  ;;  %v1276_v46 = vrot.slane %v2705_v17, 1 }
 0x129   : > { %v1274_v60 = vor.u32 %v1273_v47, %v1269_v26 }
 0x12a   : > { %2108 = vmatmul.mubr.bf16.gmra.mrb[44].mxu0 %v2728_v20  ;;  %3297 = vmatpush3.bf16.msra.mxu1 %v3484_v9  ;;  %v1247_v20 = vrot.slane %v1245_v56, 1  ;;  %v2750_v34 = vcombine.low %v4809_v24, %v1223_v14 }
 0x12b   : > { %2115 = vmatprep.mubr.bf16.mxu0 %v2738_v54  ;;  %3263 = vmatpush3.bf16.msra.mxu0 %v3482_v1 }
 0x12c   : > { %3264 = vmatprep.subr.bf16.mxu0 %v3484_v9  ;;  %v1248_v43 = vor.u32 %v1247_v20, %v1243_v35 }
 0x12d   : > { %2213 = vmatmul.mubr.bf16.gmra.mrb[48].mxu1 %v4359_v29  ;;  %v2743_v29 = vcombine.low %v4380_v63, %v4408_v50 }
 0x12e   : > { %2220 = vmatprep.mubr.bf16.mxu1 %v4440_v39  ;;  %v2758_v19 = vcombine.low %v1248_v43, %v1274_v60  ;;  %v1250_v39 = vrot.slane %v2703_v33, 1  ;;  %v2755_v51 = vcombine.low %v4479_v52, %v1248_v43 }
 0x12f   : > { %3265 = vmatpush3.bf16.msra.mxu0 %v3484_v9 }
 0x130   : > { %v2756_v63 = vcombine.low %v1224_v15, %v1250_v39  ;;  %v2759_v50 = vcombine.low %v1250_v39, %v1276_v46 }
 0x132   : > { %2116 = vmatmul.mubr.bf16.gmra.mrb[48].mxu0 %v4808_v4 }
 0x133   : > { %2123 = vmatprep.mubr.bf16.mxu0 %v2744_v22 }
 0x135   : > { %2221 = vmatmul.mubr.bf16.gmra.mrb[52].mxu1 %v4436_v58  ;;  %v2749_v58 = vcombine.low %v4432_v6, %v4476_v16 }
 0x136   : > { %2228 = vmatprep.mubr.bf16.mxu1 %v4489_v13  ;;  %v2757_v13 = vcombine.low %v4455_v10, %v1015_v5 }
 0x13a   : > { %2124 = vmatmul.mubr.bf16.gmra.mrb[52].mxu0 %v2743_v29 }
 0x13b   : > { %2131 = vmatprep.mubr.bf16.mxu0 %v2750_v34 }
 0x13d   : > { %2229 = vmatmul.mubr.bf16.gmra.mrb[56].mxu1 %v4482_v36 }
 0x13e   : > { %2236 = vmatprep.mubr.bf16.mxu1 %v2758_v19 }
 0x142   : > { %2132 = vmatmul.mubr.bf16.gmra.mrb[56].mxu0 %v2749_v58 }
 0x143   : > { %2139 = vmatprep.mubr.bf16.mxu0 %v2756_v63 }
 0x145   : > { %2237 = vmatmul.mubr.bf16.gmra.mrb[60].mxu1 %v2757_v13 }
 0x146   : > { %3274 = vmatprep.mubr.bf16.mxu1 %v4369_v57 }
 0x14a   : > { %2140 = vmatmul.mubr.bf16.gmra.mrb[60].mxu0 %v2755_v51 }
 0x14b   : > { %3266 = vmatprep.mubr.bf16.mxu0 %v4116_v32 }
 0x14d   : > { %3275 = vmatmul.mubr.bf16.vlgmr.msra.gmra.mrb[64].mxu1 %v4423_v59 }
 0x14e   : > { %3278 = vmatprep.mubr.bf16.mxu1 %v4474_v38 }
 0x152   : > { %3267 = vmatmul.mubr.bf16.vlgmr.msra.gmra.mrb[64].mxu0 %v4190_v61 }
 0x153   : > { %3270 = vmatprep.mubr.bf16.mxu0 %v4259_v2 }
 0x155   : > { %3279 = vmatmul.mubr.bf16.gmra.mrb[68].mxu1 %v2759_v50 }
 0x15a   : > { %3271 = vmatmul.mubr.bf16.gmra.mrb[68].mxu0 %v4485_v28 }
 0x18a   : > { %v3058_v6 = vpop.f32.mrb[0].mxu1 }
 0x18b   : > { %v3059_v10 = vpop.f32.mrb[1].mxu1 }
 0x18c   : > { %v3060_v14 = vadd.f32 %v3059_v10, %v3058_v6  ;;  %v3061_v57 = vpop.f32.mrb[2].mxu1 }
 0x18d   : > { %v3062_v25 = vpop.f32.mrb[3].mxu1 }
 0x18e   : > { %v3063_v15 = vadd.f32 %v3062_v25, %v3061_v57 }
 0x18f   : > { %v2994_v32 = vpop.f32.mrb[0].mxu0 }
 0x190   : > { %v2995_v62 = vpop.f32.mrb[1].mxu0 }
 0x191   : > { %v2996_v59 = vadd.f32 %v2995_v62, %v2994_v32  ;;  %v2997_v41 = vpop.f32.mrb[2].mxu0 }
 0x192   : > { %v2998_v16 = vpop.f32.mrb[3].mxu0  ;;  %v3064_v38 = vpop.f32.mrb[4].mxu1 }
 0x193   : > { %v4556_v48 = vadd.f32 %v3060_v14, %v2996_v59  ;;  %v2999_v61 = vadd.f32 %v2998_v16, %v2997_v41  ;;  %v3065_v40 = vpop.f32.mrb[5].mxu1 }
 0x194   : > { %v3066_v2 = vadd.f32 %v3065_v40, %v3064_v38  ;;  %v3067_v52 = vpop.f32.mrb[6].mxu1 }
 0x195   : > { %v4558_v36 = vadd.f32 %v3063_v15, %v2999_v61  ;;  %v3068_v28 = vpop.f32.mrb[7].mxu1 }
 0x196   : > { %v3069_v45 = vadd.f32 %v3068_v28, %v3067_v52 }
 0x197   : > { %v3000_v0 = vpop.f32.mrb[4].mxu0 }
 0x198   : > { %v3001_v8 = vpop.f32.mrb[5].mxu0 }
 0x199   : > { %v3002_v55 = vadd.f32 %v3001_v8, %v3000_v0  ;;  %v3003_v21 = vpop.f32.mrb[6].mxu0 }
 0x19a   : > { %v3004_v30 = vpop.f32.mrb[7].mxu0 }
 0x19b   : > { %v4560_v7 = vadd.f32 %v3066_v2, %v3002_v55  ;;  %v3005_v3 = vadd.f32 %v3004_v30, %v3003_v21 }
 0x19c   : > { %v3070_v11 = vpop.f32.mrb[8].mxu1 }
 0x19d   : > { %v4562_v31 = vadd.f32 %v3069_v45, %v3005_v3  ;;  %v3071_v44 = vpop.f32.mrb[9].mxu1 }
 0x19e   : > { %v3072_v1 = vadd.f32 %v3071_v44, %v3070_v11  ;;  %v3073_v53 = vpop.f32.mrb[10].mxu1 }
 0x19f   : > { %v3074_v23 = vpop.f32.mrb[11].mxu1 }
 0x1a0   : > { %v3075_v9 = vadd.f32 %v3074_v23, %v3073_v53 }
 0x1a1   : > { %v3006_v27 = vpop.f32.mrb[8].mxu0 }
 0x1a2   : > { %v3007_v12 = vpop.f32.mrb[9].mxu0 }
 0x1a3   : > { %v3008_v18 = vadd.f32 %v3007_v12, %v3006_v27  ;;  %v3009_v54 = vpop.f32.mrb[10].mxu0 }
 0x1a4   : > { %v3010_v5 = vpop.f32.mrb[11].mxu0 }
 0x1a5   : > { %v4564_v42 = vadd.f32 %v3072_v1, %v3008_v18  ;;  %v3011_v33 = vadd.f32 %v3010_v5, %v3009_v54 }
 0x1a7   : > { %v4566_v17 = vadd.f32 %v3075_v9, %v3011_v33 }
 0x1a8   : > { %v3076_v56 = vpop.f32.mrb[12].mxu1 }
 0x1a9   : > { %v3077_v49 = vpop.f32.mrb[13].mxu1 }
 0x1aa   : > { %v3078_v37 = vadd.f32 %v3077_v49, %v3076_v56  ;;  %v3079_v22 = vpop.f32.mrb[14].mxu1 }
 0x1ab   : > { %v3080_v4 = vpop.f32.mrb[15].mxu1 }
 0x1ac   : > { %v3081_v35 = vadd.f32 %v3080_v4, %v3079_v22 }
 0x1ae   : > { %v3012_v20 = vpop.f32.mrb[12].mxu0 }
 0x1af   : > { %v3013_v26 = vpop.f32.mrb[13].mxu0 }
 0x1b0   : > { %v3014_v47 = vadd.f32 %v3013_v26, %v3012_v20  ;;  %v3015_v29 = vpop.f32.mrb[14].mxu0 }
 0x1b1   : > { %v3016_v43 = vpop.f32.mrb[15].mxu0 }
 0x1b2   : > { %v4568_v60 = vadd.f32 %v3078_v37, %v3014_v47  ;;  %v3017_v24 = vadd.f32 %v3016_v43, %v3015_v29 }
 0x1b4   : > { %v4570_v34 = vadd.f32 %v3081_v35, %v3017_v24  ;;  %v3082_v19 = vpop.f32.mrb[16].mxu1 }
 0x1b5   : > { %v3083_v39 = vpop.f32.mrb[17].mxu1 }
 0x1b6   : > { %v3084_v58 = vadd.f32 %v3083_v39, %v3082_v19  ;;  %v3085_v63 = vpop.f32.mrb[18].mxu1 }
 0x1b7   : > { %v3086_v13 = vpop.f32.mrb[19].mxu1 }
 0x1b8   : > { %v3087_v51 = vadd.f32 %v3086_v13, %v3085_v63 }
 0x1b9   : > { %v3018_v46 = vpop.f32.mrb[16].mxu0 }
 0x1ba   : > { %v3019_v50 = vpop.f32.mrb[17].mxu0 }
 0x1bb   : > { %v3020_v6 = vadd.f32 %v3019_v50, %v3018_v46  ;;  %v3021_v10 = vpop.f32.mrb[18].mxu0 }
 0x1bc   : > { %v3022_v14 = vpop.f32.mrb[19].mxu0 }
 0x1bd   : > { %v4572_v57 = vadd.f32 %v3084_v58, %v3020_v6  ;;  %v3023_v25 = vadd.f32 %v3022_v14, %v3021_v10 }
 0x1bf   : > { %v4574_v15 = vadd.f32 %v3087_v51, %v3023_v25 }
 0x1c0   : > { %v3088_v32 = vpop.f32.mrb[20].mxu1 }
 0x1c1   : > { %v3089_v62 = vpop.f32.mrb[21].mxu1 }
 0x1c2   : > { %v3090_v59 = vadd.f32 %v3089_v62, %v3088_v32  ;;  %v3091_v41 = vpop.f32.mrb[22].mxu1 }
 0x1c3   : > { %v3092_v16 = vpop.f32.mrb[23].mxu1 }
 0x1c4   : > { %v3093_v38 = vadd.f32 %v3092_v16, %v3091_v41 }
 0x1c5   : > { %v3024_v61 = vpop.f32.mrb[20].mxu0 }
 0x1c6   : > { %v3025_v40 = vpop.f32.mrb[21].mxu0 }
 0x1c7   : > { %v3026_v2 = vadd.f32 %v3025_v40, %v3024_v61  ;;  %v3027_v52 = vpop.f32.mrb[22].mxu0 }
 0x1c8   : > { %v3028_v28 = vpop.f32.mrb[23].mxu0 }
 0x1c9   : > { %v4576_v45 = vadd.f32 %v3090_v59, %v3026_v2  ;;  %v3029_v0 = vadd.f32 %v3028_v28, %v3027_v52 }
 0x1cb   : > { %v4578_v8 = vadd.f32 %v3093_v38, %v3029_v0 }
 0x1cd   : > { %v3094_v55 = vpop.f32.mrb[24].mxu1 }
 0x1ce   : > { %v3095_v21 = vpop.f32.mrb[25].mxu1 }
 0x1cf   : > { %v3096_v30 = vadd.f32 %v3095_v21, %v3094_v55  ;;  %v3097_v3 = vpop.f32.mrb[26].mxu1 }
 0x1d0   : > { %v3098_v11 = vpop.f32.mrb[27].mxu1 }
 0x1d1   : > { %v3099_v44 = vadd.f32 %v3098_v11, %v3097_v3 }
 0x1d2   : > { %v3030_v1 = vpop.f32.mrb[24].mxu0 }
 0x1d3   : > { %v3031_v53 = vpop.f32.mrb[25].mxu0 }
 0x1d4   : > { %v3032_v23 = vadd.f32 %v3031_v53, %v3030_v1  ;;  %v3033_v9 = vpop.f32.mrb[26].mxu0 }
 0x1d5   : > { %v3034_v27 = vpop.f32.mrb[27].mxu0 }
 0x1d6   : > { %v4580_v12 = vadd.f32 %v3096_v30, %v3032_v23  ;;  %v3035_v18 = vadd.f32 %v3034_v27, %v3033_v9 }
 0x1d8   : > { %v4582_v54 = vadd.f32 %v3099_v44, %v3035_v18  ;;  %v3100_v5 = vpop.f32.mrb[28].mxu1 }
 0x1d9   : > { %v3101_v33 = vpop.f32.mrb[29].mxu1 }
 0x1da   : > { %v3102_v56 = vadd.f32 %v3101_v33, %v3100_v5  ;;  %v3103_v49 = vpop.f32.mrb[30].mxu1 }
 0x1db   : > { %v3104_v37 = vpop.f32.mrb[31].mxu1 }
 0x1dc   : > { %v3105_v22 = vadd.f32 %v3104_v37, %v3103_v49 }
 0x1dd   : > { %v3036_v4 = vpop.f32.mrb[28].mxu0 }
 0x1de   : > { %v3037_v35 = vpop.f32.mrb[29].mxu0 }
 0x1df   : > { %v3038_v20 = vadd.f32 %v3037_v35, %v3036_v4  ;;  %v3039_v26 = vpop.f32.mrb[30].mxu0 }
 0x1e0   : > { %v3040_v47 = vpop.f32.mrb[31].mxu0  ;;  %v3186_v29 = vpop.f32.mrb[32].mxu1 }
 0x1e1   : > { %v4584_v43 = vadd.f32 %v3102_v56, %v3038_v20  ;;  %v3041_v24 = vadd.f32 %v3040_v47, %v3039_v26  ;;  %v3187_v19 = vpop.f32.mrb[33].mxu1 }
 0x1e2   : > { %v3188_v39 = vadd.f32 %v3187_v19, %v3186_v29  ;;  %v3189_v58 = vpop.f32.mrb[34].mxu1 }
 0x1e3   : > { %v4586_v63 = vadd.f32 %v3105_v22, %v3041_v24  ;;  %v3190_v13 = vpop.f32.mrb[35].mxu1 }
 0x1e4   : > { %v3191_v51 = vadd.f32 %v3190_v13, %v3189_v58 }
 0x1e5   : > { %v3122_v46 = vpop.f32.mrb[32].mxu0 }
 0x1e6   : > { %v3123_v50 = vpop.f32.mrb[33].mxu0 }
 0x1e7   : > { %v3124_v6 = vadd.f32 %v3123_v50, %v3122_v46  ;;  %v3125_v10 = vpop.f32.mrb[34].mxu0 }
 0x1e8   : > { %v3126_v14 = vpop.f32.mrb[35].mxu0  ;;  %v3192_v25 = vpop.f32.mrb[36].mxu1 }
 0x1e9   : > { %v2086_v32 = vadd.f32 %v3124_v6, %v4556_v48  ;;  %v3127_v62 = vadd.f32 %v3126_v14, %v3125_v10  ;;  %v3193_v59 = vpop.f32.mrb[37].mxu1 }
 0x1ea   : > { %v3194_v41 = vadd.f32 %v3193_v59, %v3192_v25  ;;  %v3195_v16 = vpop.f32.mrb[38].mxu1 }
 0x1eb   : > { %v2089_v38 = vadd.f32 %v3127_v62, %v4558_v36  ;;  %v3196_v61 = vpop.f32.mrb[39].mxu1  ;;  %v4590_v40 = vadd.f32 %v3188_v39, %v2086_v32 }
 0x1ec   : > { %v3197_v2 = vadd.f32 %v3196_v61, %v3195_v16 }
 0x1ed   : > { %v3128_v52 = vpop.f32.mrb[36].mxu0  ;;  %v4592_v28 = vadd.f32 %v3191_v51, %v2089_v38 }
 0x1ee   : > { %v3129_v0 = vpop.f32.mrb[37].mxu0 }
 0x1ef   : > { %v3130_v55 = vadd.f32 %v3129_v0, %v3128_v52  ;;  %v3131_v21 = vpop.f32.mrb[38].mxu0 }
 0x1f0   : > { %v3132_v30 = vpop.f32.mrb[39].mxu0  ;;  %v3198_v3 = vpop.f32.mrb[40].mxu1 }
 0x1f1   : > { %v2094_v48 = vadd.f32 %v3130_v55, %v4560_v7  ;;  %v3133_v11 = vadd.f32 %v3132_v30, %v3131_v21  ;;  %v3199_v44 = vpop.f32.mrb[41].mxu1 }
 0x1f2   : > { %v3200_v1 = vadd.f32 %v3199_v44, %v3198_v3  ;;  %v3201_v53 = vpop.f32.mrb[42].mxu1 }
 0x1f3   : > { %v2097_v36 = vadd.f32 %v3133_v11, %v4562_v31  ;;  %v3202_v23 = vpop.f32.mrb[43].mxu1  ;;  %v4596_v9 = vadd.f32 %v3194_v41, %v2094_v48 }
 0x1f4   : > { %v3203_v27 = vadd.f32 %v3202_v23, %v3201_v53 }
 0x1f5   : > { %v3134_v18 = vpop.f32.mrb[40].mxu0  ;;  %v4598_v5 = vadd.f32 %v3197_v2, %v2097_v36 }
 0x1f6   : > { %v3135_v33 = vpop.f32.mrb[41].mxu0 }
 0x1f7   : > { %v3136_v56 = vadd.f32 %v3135_v33, %v3134_v18  ;;  %v3137_v49 = vpop.f32.mrb[42].mxu0 }
 0x1f8   : > { %v3138_v37 = vpop.f32.mrb[43].mxu0  ;;  %v3204_v22 = vpop.f32.mrb[44].mxu1 }
 0x1f9   : > { %v2102_v7 = vadd.f32 %v3136_v56, %v4564_v42  ;;  %v3139_v4 = vadd.f32 %v3138_v37, %v3137_v49  ;;  %v3205_v35 = vpop.f32.mrb[45].mxu1 }
 0x1fa   : > { %v3206_v20 = vadd.f32 %v3205_v35, %v3204_v22  ;;  %v3207_v26 = vpop.f32.mrb[46].mxu1 }
 0x1fb   : > { %v2105_v31 = vadd.f32 %v3139_v4, %v4566_v17  ;;  %v3208_v47 = vpop.f32.mrb[47].mxu1  ;;  %v4602_v29 = vadd.f32 %v3200_v1, %v2102_v7 }
 0x1fc   : > { %v3209_v24 = vadd.f32 %v3208_v47, %v3207_v26 }
 0x1fd   : > { %v3140_v19 = vpop.f32.mrb[44].mxu0  ;;  %v4604_v39 = vadd.f32 %v3203_v27, %v2105_v31 }
 0x1fe   : > { %v3141_v58 = vpop.f32.mrb[45].mxu0 }
 0x1ff   : > { %v3142_v13 = vadd.f32 %v3141_v58, %v3140_v19  ;;  %v3143_v51 = vpop.f32.mrb[46].mxu0 }
 0x200   : > { %v3144_v46 = vpop.f32.mrb[47].mxu0  ;;  %v3210_v50 = vpop.f32.mrb[48].mxu1 }
 0x201   : > { %v2110_v42 = vadd.f32 %v3142_v13, %v4568_v60  ;;  %v3145_v6 = vadd.f32 %v3144_v46, %v3143_v51  ;;  %v3211_v10 = vpop.f32.mrb[49].mxu1 }
 0x202   : > { %v3212_v14 = vadd.f32 %v3211_v10, %v3210_v50  ;;  %v3213_v25 = vpop.f32.mrb[50].mxu1 }
 0x203   : > { %v2113_v17 = vadd.f32 %v3145_v6, %v4570_v34  ;;  %v3214_v32 = vpop.f32.mrb[51].mxu1  ;;  %v4608_v62 = vadd.f32 %v3206_v20, %v2110_v42 }
 0x204   : > { %v3215_v59 = vadd.f32 %v3214_v32, %v3213_v25 }
 0x205   : > { %v3146_v41 = vpop.f32.mrb[48].mxu0  ;;  %v4610_v16 = vadd.f32 %v3209_v24, %v2113_v17 }
 0x206   : > { %v3147_v38 = vpop.f32.mrb[49].mxu0 }
 0x207   : > { %v3148_v61 = vadd.f32 %v3147_v38, %v3146_v41  ;;  %v3149_v2 = vpop.f32.mrb[50].mxu0 }
 0x208   : > { %v3150_v52 = vpop.f32.mrb[51].mxu0  ;;  %v3216_v0 = vpop.f32.mrb[52].mxu1 }
 0x209   : > { %v2118_v60 = vadd.f32 %v3148_v61, %v4572_v57  ;;  %v3151_v55 = vadd.f32 %v3150_v52, %v3149_v2  ;;  %v3217_v21 = vpop.f32.mrb[53].mxu1 }
 0x20a   : > { %v3218_v30 = vadd.f32 %v3217_v21, %v3216_v0  ;;  %v3219_v3 = vpop.f32.mrb[54].mxu1 }
 0x20b   : > { %v2121_v34 = vadd.f32 %v3151_v55, %v4574_v15  ;;  %v3220_v48 = vpop.f32.mrb[55].mxu1  ;;  %v2215_v11 = vadd.f32 %v3212_v14, %v2118_v60 }
 0x20c   : > { %v3221_v44 = vadd.f32 %v3220_v48, %v3219_v3 }
 0x20d   : > { %v3152_v1 = vpop.f32.mrb[52].mxu0  ;;  %v2218_v53 = vadd.f32 %v3215_v59, %v2121_v34 }
 0x20e   : > { %v3153_v36 = vpop.f32.mrb[53].mxu0 }
 0x20f   : > { %v3154_v23 = vadd.f32 %v3153_v36, %v3152_v1  ;;  %v3155_v27 = vpop.f32.mrb[54].mxu0 }
 0x210   : > { %v3156_v18 = vpop.f32.mrb[55].mxu0  ;;  %v3222_v33 = vpop.f32.mrb[56].mxu1 }
 0x211   : > { %v2126_v56 = vadd.f32 %v3154_v23, %v4576_v45  ;;  %v3157_v49 = vadd.f32 %v3156_v18, %v3155_v27  ;;  %v3223_v57 = vpop.f32.mrb[57].mxu1 }
 0x212   : > { %v3224_v37 = vadd.f32 %v3223_v57, %v3222_v33  ;;  %v3225_v22 = vpop.f32.mrb[58].mxu1 }
 0x213   : > { %v2129_v7 = vadd.f32 %v3157_v49, %v4578_v8  ;;  %v3226_v4 = vpop.f32.mrb[59].mxu1  ;;  %v2223_v15 = vadd.f32 %v3218_v30, %v2126_v56 }
 0x214   : > { %v3227_v35 = vadd.f32 %v3226_v4, %v3225_v22 }
 0x215   : > { %v3158_v20 = vpop.f32.mrb[56].mxu0  ;;  %v2226_v26 = vadd.f32 %v3221_v44, %v2129_v7 }
 0x216   : > { %v3159_v31 = vpop.f32.mrb[57].mxu0 }
 0x217   : > { %v3160_v47 = vadd.f32 %v3159_v31, %v3158_v20  ;;  %v3161_v24 = vpop.f32.mrb[58].mxu0 }
 0x218   : > { %v3162_v19 = vpop.f32.mrb[59].mxu0  ;;  %v3228_v58 = vpop.f32.mrb[60].mxu1 }
 0x219   : > { %v2134_v13 = vadd.f32 %v3160_v47, %v4580_v12  ;;  %v3163_v51 = vadd.f32 %v3162_v19, %v3161_v24  ;;  %v3229_v45 = vpop.f32.mrb[61].mxu1 }
 0x21a   : > { %v3230_v46 = vadd.f32 %v3229_v45, %v3228_v58  ;;  %v3231_v50 = vpop.f32.mrb[62].mxu1 }
 0x21b   : > { %v2137_v42 = vadd.f32 %v3163_v51, %v4582_v54  ;;  %v3232_v6 = vpop.f32.mrb[63].mxu1  ;;  %v2231_v8 = vadd.f32 %v3224_v37, %v2134_v13 }
 0x21c   : > { %v3233_v10 = vadd.f32 %v3232_v6, %v3231_v50 }
 0x21d   : > { %v3164_v14 = vpop.f32.mrb[60].mxu0  ;;  %v2234_v25 = vadd.f32 %v3227_v35, %v2137_v42 }
 0x21e   : > { %v3165_v17 = vpop.f32.mrb[61].mxu0 }
 0x21f   : > { %v3166_v32 = vadd.f32 %v3165_v17, %v3164_v14  ;;  %v3167_v59 = vpop.f32.mrb[62].mxu0 }
 0x220   : > { %v3168_v41 = vpop.f32.mrb[63].mxu0  ;;  %v3276_v38 = vpop.f32.mrb[64].mxu1 }
 0x221   : > { %v2142_v61 = vadd.f32 %v3166_v32, %v4584_v43  ;;  %v3169_v2 = vadd.f32 %v3168_v41, %v3167_v59  ;;  %v4619_v12 = vadd.f32 %v3276_v38, %v2223_v15  ;;  %v2311_v52 = vpop.f32.mrb[65].mxu1 }
 0x222   : > { %v4621_v0 = vadd.f32 %v2311_v52, %v2215_v11  ;;  %v3277_v54 = vpop.f32.mrb[66].mxu1 }
 0x223   : > { %v2145_v60 = vadd.f32 %v3169_v2, %v4586_v63  ;;  %v4624_v55 = vadd.f32 %v3277_v54, %v2226_v26  ;;  %v2314_v21 = vpop.f32.mrb[67].mxu1  ;;  %v2239_v30 = vadd.f32 %v3230_v46, %v2142_v61 }
 0x224   : > { %v4626_v3 = vadd.f32 %v2314_v21, %v2218_v53 }
 0x225   : > { %v3268_v34 = vpop.f32.mrb[64].mxu0  ;;  %v2952_v43 = vpack.c.bf16 %v4624_v55, %v4619_v12  ;;  %v2242_v48 = vadd.f32 %v3233_v10, %v2145_v60 }
 0x226   : > { %v2288_v44 = vadd.f32 %v3268_v34, %v4596_v9  ;;  %v2279_v1 = vpop.f32.mrb[65].mxu0  ;;  %v2947_v11 = vpack.c.bf16 %v4626_v3, %v4621_v0 }
 0x227   : > { %2975 = vst [vmem:[%s4635_s24 + $0x28] sm:$0xff] %v2952_v43   ;;  %v2280_v63 = vadd.f32 %v2279_v1, %v4590_v40  ;;  %v3269_v53 = vpop.f32.mrb[66].mxu0 }
 0x228   : > { %2974 = vst [vmem:[%s4635_s24 + $0x20] sm:$0xff] %v2947_v11   ;;  %v2291_v36 = vadd.f32 %v3269_v53, %v4598_v5  ;;  %v2282_v23 = vpop.f32.mrb[67].mxu0  ;;  %v3280_v27 = vpop.f32.mrb[68].mxu1 }
 0x229   : > { %v2283_v9 = vadd.f32 %v2282_v23, %v4592_v28  ;;  %v4642_v18 = vadd.f32 %v3280_v27, %v2239_v30  ;;  %v2327_v33 = vpop.f32.mrb[69].mxu1  ;;  %v2363_v37 = vmul.f32 %v2280_v63, %v2280_v63  ;;  %v2365_v28 = vmul.f32 %v2288_v44, %v2288_v44 }
 0x22a   : > { %v2932_v56 = vpack.c.bf16 %v2291_v36, %v2288_v44  ;;  %v4644_v49 = vadd.f32 %v2327_v33, %v2231_v8  ;;  %v3281_v57 = vpop.f32.mrb[70].mxu1  ;;  %v2366_v31 = vmul.f32 %v2291_v36, %v2291_v36 }
 0x22b   : > { %v2342_v22 = vadd.f32 %v2283_v9, %v2280_v63  ;;  %v2364_v40 = vmul.f32 %v2283_v9, %v2283_v9  ;;  %v2927_v7 = vpack.c.bf16 %v2283_v9, %v2280_v63  ;;  %v2330_v4 = vpop.f32.mrb[71].mxu1  ;;  %v4647_v15 = vadd.f32 %v3281_v57, %v2242_v48 }
 0x22c   : > { %2971 = vst [vmem:[%s4635_s24 + $0x8] sm:$0xff] %v2932_v56   ;;  %v4649_v5 = vadd.f32 %v2330_v4, %v2234_v25 }
 0x22d   : > { %v2343_v35 = vadd.f32 %v2342_v22, %v2288_v44  ;;  %v2379_v20 = vadd.f32 %v2364_v40, %v2363_v37  ;;  %2928 = vst [vmem:[%s4635_s24] sm:$0xff] %v2927_v7   ;;  %v3272_v26 = vpop.f32.mrb[68].mxu0  ;;  %v2962_v24 = vpack.c.bf16 %v4647_v15, %v4642_v18 }
 0x22e   : > { %v2304_v47 = vadd.f32 %v3272_v26, %v4608_v62  ;;  %v2295_v19 = vpop.f32.mrb[69].mxu0  ;;  %v2957_v45 = vpack.c.bf16 %v4649_v5, %v4644_v49 }
 0x22f   : > { %v2380_v58 = vadd.f32 %v2379_v20, %v2365_v28  ;;  %v2296_v13 = vadd.f32 %v2295_v19, %v4602_v29  ;;  %v2344_v51 = vadd.f32 %v2343_v35, %v2291_v36  ;;  %v3273_v46 = vpop.f32.mrb[70].mxu0  ;;  %2977 = vst [vmem:[%s4635_s24 + $0x38] sm:$0xff] %v2962_v24  }
 0x230   : > { %v2307_v50 = vadd.f32 %v3273_v46, %v4610_v16  ;;  %v2298_v62 = vpop.f32.mrb[71].mxu0  ;;  %2976 = vst [vmem:[%s4635_s24 + $0x30] sm:$0xff] %v2957_v45   ;;  %v2369_v32 = vmul.f32 %v2304_v47, %v2304_v47 }
 0x231   : > { %v2345_v42 = vadd.f32 %v2344_v51, %v2296_v13  ;;  %v2367_v6 = vmul.f32 %v2296_v13, %v2296_v13  ;;  %v2381_v8 = vadd.f32 %v2380_v58, %v2366_v31  ;;  %v2299_v29 = vadd.f32 %v2298_v62, %v4604_v39 }
 0x232   : > { %v2942_v10 = vpack.c.bf16 %v2307_v50, %v2304_v47 }
 0x233   : > { %v2382_v16 = vadd.f32 %v2381_v8, %v2367_v6  ;;  %v2346_v14 = vadd.f32 %v2345_v42, %v2299_v29  ;;  %v2368_v25 = vmul.f32 %v2299_v29, %v2299_v29  ;;  %v2937_v17 = vpack.c.bf16 %v2299_v29, %v2296_v13 }
 0x234   : > { %2973 = vst [vmem:[%s4635_s24 + $0x18] sm:$0xff] %v2942_v10  }
 0x235   : > { %v2347_v59 = vadd.f32 %v2346_v14, %v2304_v47  ;;  %v2383_v39 = vadd.f32 %v2382_v16, %v2368_v25  ;;  %2972 = vst [vmem:[%s4635_s24 + $0x10] sm:$0xff] %v2937_v17  }
 0x236   : > { %3614 = shalt.err (!%p3611_p4)
}
 0x237   : > { %s3615_s12 = scalar_lea.hbm %s4667_s6, 1024  ;;  %s3619_s17 = scalar_lea.hbm %s4774_s4, 4096 }
 0x238   : > { %p3616_p9 = scmp.ne.s32.totalorder %s4667_s6, %s3615_s12  ;;  %p3620_p8 = scmp.lt.u32.totalorder %s4667_s6, %s4774_s4 }
 0x239   : > { %p3621_p12 = scmp.lt.u32.totalorder %s3619_s17, %s3615_s12  ;;  %p3623_p0 = scmp.lt.u32.totalorder %s3615_s12, %s4667_s6 }
 0x23a   : > { %p3617_p13 = pnand %p3616_p9, %p3898_p5 }
 0x23b   : > { %p3622_p6 = por %p3621_p12, %p3620_p8 }
 0x23c   : > { %p3618_p10 = pneg %p3617_p13 }
 0x23d   : > { %p3624_p3 = por %p3623_p0, %p3622_p6 }
 0x23f   : > { %p3625_p7 = pnand %p3624_p3, %p3618_p10 }
 0x241   : > { %3628 = shalt.err (!%p3625_p7)
}
 0x242   : > { %s3717_s27 = smov 64   ;;  %s3718_s16 = smov 4   ;;  %v2370_v41 = vmul.f32 %v2307_v50, %v2307_v50  ;;  %v2348_v38 = vadd.f32 %v2347_v59, %v2307_v50  ;;  %v2384_v61 = vadd.f32 %v2383_v39, %v2369_v32  ;;  %v2371_v2 = vmul.f32 %v4621_v0, %v4621_v0 }
 0x243   : > { %3312 = dma.vmem_to_hbm [thread:$0]  (%p3898_p5), %s4669_s23, 1024, %s4667_s6, %s2485_s30, %s3717_s27, %s3717_s27, %s3718_s16   ;;  %v2372_v60 = vmul.f32 %v4626_v3, %v4626_v3  ;;  %v2373_v34 = vmul.f32 %v4619_v12, %v4619_v12  ;;  %v2374_v44 = vmul.f32 %v4624_v55, %v4624_v55  ;;  %v2376_v53 = vmul.f32 %v4649_v5, %v4649_v5 }
 0x244   : > { %v2349_v52 = vadd.f32 %v2348_v38, %v4621_v0  ;;  %v2385_v54 = vadd.f32 %v2384_v61, %v2370_v41  ;;  %v2375_v0 = vmul.f32 %v4644_v49, %v4644_v49  ;;  %v2377_v23 = vmul.f32 %v4642_v18, %v4642_v18  ;;  %s2667_s23 = sshll.u32 %s3949_s7, 1  ;;  %s2853_s6 = sshll.u32 %s3771_s22, 5 }
 0x245   : > { %v2378_v9 = vmul.f32 %v4647_v15, %v4647_v15  ;;  %s294_s30 = scalar_lea.vmem [#allocation12], %s2667_s23  ;;  %s4726_s29 = scalar_lea.hbm %s4775_s5, %s2853_s6 }
 0x246   : > { %v2350_v21 = vadd.f32 %v2349_v52, %v4626_v3  ;;  %v2386_v30 = vadd.f32 %v2385_v54, %v2371_v2  ;;  %s2520_s15 = sshll.u32 %s294_s30, 4  ;;  %s2490_s12 = scalar_lea.sflag [#allocation13], %s3949_s7  ;;  %s4728_s15 = int_to_ptr.vmem [resolvable:$true] %s2520_s15 }
 0x247   : > { %s3629_s8 = scalar_lea.vmem %s4728_s15, 32  ;;  %s3719_s22 = smov [#allocation12]  }
 0x248   : > { %v2351_v43 = vadd.f32 %v2350_v21, %v4619_v12  ;;  %v2387_v48 = vadd.f32 %v2386_v30, %v2372_v60  ;;  %p3630_p11 = scmp.ne.s32.totalorder %s4728_s15, %s3629_s8  ;;  %s3633_s13 = sshll.u32 %s3719_s22, 4  ;;  %s3634_s13 = int_to_ptr.vmem [resolvable:$false] %s3633_s13 }
 0x249   : > { %s3635_s17 = scalar_lea.vmem %s3634_s13, 64  ;;  %p3636_p4 = scmp.lt.s32.totalorder %s4728_s15, %s3634_s13 }
 0x24a   : > { %v2352_v1 = vadd.f32 %v2351_v43, %v4624_v55  ;;  %v2388_v11 = vadd.f32 %v2387_v48, %v2373_v34  ;;  %p3631_p1 = pnand %p3630_p11, %p3898_p5  ;;  %p3637_p9 = scmp.lt.s32.totalorder %s3635_s17, %s3629_s8 }
 0x24c   : > { %v2353_v63 = vadd.f32 %v2352_v1, %v4644_v49  ;;  %v2389_v3 = vadd.f32 %v2388_v11, %v2374_v44  ;;  %p3632_p2 = pneg %p3631_p1  ;;  %p3638_p13 = por %p3637_p9, %p3636_p4 }
 0x24e   : > { %v2354_v36 = vadd.f32 %v2353_v63, %v4649_v5  ;;  %v2390_v12 = vadd.f32 %v2389_v3, %v2375_v0  ;;  %p3639_p10 = pnand %p3638_p13, %p3632_p2 }
 0x250   : > { %v2355_v27 = vadd.f32 %v2354_v36, %v4642_v18  ;;  %v2391_v55 = vadd.f32 %v2390_v12, %v2376_v53 }
 0x252   : > { %v2356_v33 = vadd.f32 %v2355_v27, %v4647_v15  ;;  %v2392_v56 = vadd.f32 %v2391_v55, %v2377_v23 }
 0x254   : > { %v2357_v49 = vrot.slane %v2356_v33, 4  ;;  %v2393_v57 = vadd.f32 %v2392_v56, %v2378_v9 }
 0x256   : > { %v2358_v37 = vadd.f32 %v2357_v49, %v2356_v33  ;;  %v2394_v22 = vrot.slane %v2393_v57, 4 }
 0x258   : > { %v2359_v40 = vrot.slane %v2358_v37, 2  ;;  %v2395_v7 = vadd.f32 %v2394_v22, %v2393_v57 }
 0x25a   : > { %v2360_v4 = vadd.f32 %v2359_v40, %v2358_v37  ;;  %v2396_v5 = vrot.slane %v2395_v7, 2 }
 0x25c   : > { %v2361_v18 = vrot.slane %v2360_v4, 1  ;;  %v2397_v28 = vadd.f32 %v2396_v5, %v2395_v7 }
 0x25e   : > { %v2398_v35 = vrot.slane %v2397_v28, 1  ;;  %v2362_v20 = vadd.f32 %v2361_v18, %v2360_v4 }
 0x260   : > { %v2399_v15 = vadd.f32 %v2398_v35, %v2397_v28 }
 0x262   : > { %v2401_v26 = vsel %vm449_vm2, %v2362_v20, %v2399_v15 }
 0x263   : > { %2483 = vst [vmem:[%s294_s30] sm:$0x3] %v2401_v26 }
 0x264   : > { %3642 = shalt.err (!%p3639_p10)
}
 0x265   : > { %s3643_s7 = scalar_lea.hbm %s4726_s29, 32  ;;  %s3647_s27 = scalar_lea.hbm %s4775_s5, 128 }
 0x266   : > { %p3644_p8 = scmp.ne.s32.totalorder %s4726_s29, %s3643_s7  ;;  %p3648_p0 = scmp.lt.u32.totalorder %s4726_s29, %s4775_s5 }
 0x267   : > { %p3649_p3 = scmp.lt.u32.totalorder %s3647_s27, %s3643_s7  ;;  %p3651_p11 = scmp.lt.u32.totalorder %s3643_s7, %s4726_s29 }
 0x268   : > { %p3645_p12 = pnand %p3644_p8, %p3898_p5 }
 0x269   : > { %p3650_p7 = por %p3649_p3, %p3648_p0 }
 0x26a   : > { %p3646_p6 = pneg %p3645_p12 }
 0x26b   : > { %p3652_p1 = por %p3651_p11, %p3650_p7 }
 0x26d   : > { %p3653_p2 = pnand %p3652_p1, %p3646_p6 }
 0x26f   : > { %3656 = shalt.err (!%p3653_p2)
}
 0x270   : > { %3313 = dma.vmem_to_hbm [thread:$0]  (%p3898_p5), %s4728_s15, 32, %s4726_s29, %s2490_s12  }
 0x271 PF: > { %p3344_p4 = scmp.ge.s32.totalorder %s3707_s21, 2  ;;  %s2532_s6 = sand.u32 1, %s3695_s18  }
 0x272   : > { %p4810_p9 = scmp.ne.s32.totalorder %s4784_s25, 0  ;;  %s2533_s30 = scalar_lea.sflag [#allocation5], %s2532_s6 }
 0x274   : > { %p3331_p13 = pnand %p3344_p4, %p4810_p9 }
 0x276   : > { %3686 = dma.done.wait (!%p3331_p13), %s2533_s30, 1024  }
 0x277   : > { %3688 = vsyncadd (!%p3331_p13), %s2533_s30, 4294966272  ;;  %s2542_s11 = scalar_lea.sflag [#allocation13], %s2532_s6 }
 0x278   : > { %3690 = dma.done.wait (!%p3331_p13), %s2542_s11, 32  }
 0x279   : > { %3692 = vsyncadd (!%p3331_p13), %s2542_s11, 4294967264  ;;  %p24_p5 = scmp.ge.s32.totalorder %s3884_s14, 6   ;;  %s4811_s18 = smov %s3699_s19 }
 0x27a   : > { %s4812_s19 = smov %s3703_s20  ;;  %s4813_s20 = smov %s3894_s9 }
 0x27b   : > { %s4814_s21 = smov %s3884_s14  ;;  %26 = sbr.rel (!%p24_p5) target bundleno = 9 (0x9), region = 112 }
 0x282   :  { %2547 = vsyncpa [#allocation4], 1 }
 0x283   :  { %2549 = vsyncpa [#allocation4 + $0x1], 1 }
 0x284   :  { %2550 = vsyncpa [#allocation7], 1 }
 0x285   :  { %2551 = vsyncpa [#allocation10], 1 }
 0x286   :  { %2552 = vsyncpa [#allocation5], 1 }
 0x287   :  { %2554 = vsyncpa [#allocation5 + $0x1], 1 }
 0x288   :  { %2555 = vsyncpa [#allocation13], 1 }
 0x289   :  { %2557 = vsyncpa [#allocation13 + $0x1], 1 }

</bundles_post_ra>
